<compile_context>
chip_gen: v7x
topology: tpu7x:2x2x1
jax: 0.10.0
libtpu: 0.0.40
codegen_flags: <defaults>
</compile_context>

<pallas_src>
import functools

import jax
import jax.numpy as jnp
from jax.experimental import pallas as pl
from jax.experimental.pallas import tpu as pltpu

BN_EPS = 1e-5
EXPANSION = 4
LANE = 128
SUBLANE_BF16 = 16


# ------------------------------- Pallas kernel -------------------------------

def _bottleneck_kernel(*refs, H, W, Ho, Wo, stride, has_sc, fuse_dx):
    """Fused Bottleneck forward for one image (one grid step = one image)."""
    x_ref, w1_ref, b1_ref, w2_ref, b2_ref, w3_ref, b3_ref = refs[:7]
    rest = list(refs[7:])
    if has_sc:
        if stride > 1:
            xs_ref = rest.pop(0)          # host-subsampled activation (rare path)
        else:
            xs_ref = x_ref                # reuse the resident activation block
        wsc_ref = rest.pop(0)
        bsc_ref = rest.pop(0)
    else:
        xs_ref = wsc_ref = bsc_ref = None
    o_ref, y1pad_ref = rest

    f32 = jnp.float32
    bf16 = jnp.bfloat16
    Pp = w1_ref.shape[1]                  # padded `planes`
    Wp2 = y1pad_ref.shape[1]              # sublane-padded W+2

    # ---- conv1 (1x1) + bn1 + relu : (H*W, Cin_p) @ (Cin_p, Pp) on the MXU.
    y1 = jnp.dot(x_ref[...], w1_ref[...], preferred_element_type=f32)
    y1 = jnp.maximum(y1 + b1_ref[...], 0.0).astype(bf16)   # cast ONCE to bf16

    # ---- halo scratch: zero only the 1-element border (interior is fully
    #      overwritten right below), then store y1 into the interior.
    zrow = jnp.zeros((Wp2, Pp), bf16)
    y1pad_ref[0, :, :] = zrow
    y1pad_ref[H + 1, :, :] = zrow
    zcol = jnp.zeros((H, 1, Pp), bf16)
    y1pad_ref[1:H + 1, 0:1, :] = zcol
    y1pad_ref[1:H + 1, W + 1:W + 2, :] = zcol
    y1pad_ref[1:H + 1, 1:W + 1, :] = y1.reshape(H, W, Pp)

    # ---- conv2 (3x3) + bn2 + relu.
    # Computed at full spatial resolution with plain (un-strided) tap slices.
    # For stride==1 this IS the output resolution (Ho=H, Wo=W); for stride>1
    # the result is subsampled once at the end (instead of 9 strided reads).
    acc2 = jnp.zeros((H * W, Pp), f32)
    if fuse_dx:
        # 3 matmuls with K = 3*Pp: partial im2col along dx only (v6e/v7x MXU).
        for dy in range(3):
            tap = jnp.concatenate(
                [y1pad_ref[dy:dy + H, dx:dx + W, :] for dx in range(3)],
                axis=-1)
            acc2 = acc2 + jnp.dot(tap.reshape(H * W, 3 * Pp), w2_ref[dy],
                                  preferred_element_type=f32)
    else:
        # 9 matmuls with K = Pp: already fills v5e's 128-wide MXU.
        for dy in range(3):
            for dx in range(3):
                tap = y1pad_ref[dy:dy + H, dx:dx + W, :].reshape(H * W, Pp)
                acc2 = acc2 + jnp.dot(tap, w2_ref[dy * 3 + dx],
                                      preferred_element_type=f32)
    y2 = jnp.maximum(acc2 + b2_ref[...], 0.0).astype(bf16)

    if stride > 1:
        # Reuse the (now free) halo scratch to do a single strided subsample.
        y1pad_ref[1:H + 1, 1:W + 1, :] = y2.reshape(H, W, Pp)
        y2 = y1pad_ref[pl.ds(1, Ho, stride=stride),
                       pl.ds(1, Wo, stride=stride), :].reshape(Ho * Wo, Pp)

    # ---- conv3 (1x1) + bn3.
    out = jnp.dot(y2, w3_ref[...], preferred_element_type=f32) + b3_ref[...]

    # ---- shortcut (1x1 conv + bn, or identity), residual add, final relu.
    if has_sc:
        res = jnp.dot(xs_ref[...], wsc_ref[...],
                      preferred_element_type=f32) + bsc_ref[...]
    else:
        res = x_ref[...].astype(f32)      # identity: Cin_p == Cout_p

    o_ref[...] = jnp.maximum(out + res, 0.0).astype(o_ref.dtype)


# ------------------------------ host-side wrapper -----------------------------

def _round_up(x, m):
    return ((x + m - 1) // m) * m


def _fold_bn(w2d, bn):
    """Fold inference-mode BN into a (K, Cout) weight; returns (w*scale, bias)."""
    scale = bn["gamma"] / jnp.sqrt(bn["rvar"] + BN_EPS)
    bias = bn["beta"] - bn["rmean"] * scale
    return w2d * scale[None, :], bias


def _pad2d(a, rows, cols):
    return jnp.pad(a, ((0, rows - a.shape[0]), (0, cols - a.shape[1])))


def bottleneck_forward(params, x_nchw, *, stride=1, fuse_conv2_dx=True,
                       out_dtype=jnp.float32):
    """x_nchw: (N, Cin, H, W) like PyTorch. Returns (N, 4*planes, Ho, Wo).

    fuse_conv2_dx=True  -> conv2 as 3 matmuls with K=3*128 (v6e / v7x).
    fuse_conv2_dx=False -> conv2 as 9 matmuls with K=128    (v5e).
    """
    N, Cin, H, W = x_nchw.shape
    planes = params["conv1_w"].shape[0]
    cout = EXPANSION * planes
    Ho = (H + 2 - 3) // stride + 1
    Wo = (W + 2 - 3) // stride + 1

    Cin_p = _round_up(Cin, LANE)
    Pp = _round_up(planes, LANE)
    Cout_p = _round_up(cout, LANE)
    Wp2 = _round_up(W + 2, SUBLANE_BF16)          # bf16 sublane-tile aligned

    has_sc = "sc_conv_w" in params
    if not has_sc:
        assert stride == 1 and Cin == cout, (
            "identity shortcut requires stride == 1 and in_planes == 4*planes")

    x = jnp.transpose(x_nchw, (0, 2, 3, 1)).astype(jnp.float32)   # NHWC

    # conv1: (planes, Cin, 1, 1) -> (Cin, planes), fold bn1, pad, bf16.
    w1, b1 = _fold_bn(jnp.transpose(params["conv1_w"][:, :, 0, 0]), params["bn1"])
    w1 = _pad2d(w1, Cin_p, Pp).astype(jnp.bfloat16)
    b1 = jnp.pad(b1, (0, Pp - planes)).reshape(1, Pp).astype(jnp.float32)

    # conv2: (planes, planes, 3, 3) -> HWIO, fold bn2, pad channels, bf16.
    scale2 = params["bn2"]["gamma"] / jnp.sqrt(params["bn2"]["rvar"] + BN_EPS)
    b2 = params["bn2"]["beta"] - params["bn2"]["rmean"] * scale2
    w2 = jnp.transpose(params["conv2_w"], (2, 3, 1, 0)) * scale2[None, None, None, :]
    w2 = jnp.pad(w2, ((0, 0), (0, 0), (0, Pp - planes), (0, Pp - planes)))
    if fuse_conv2_dx:
        w2 = w2.reshape(3, 3 * Pp, Pp).astype(jnp.bfloat16)   # (dy, dx*in, out)
    else:
        w2 = w2.reshape(9, Pp, Pp).astype(jnp.bfloat16)       # (dy*3+dx, in, out)
    b2 = jnp.pad(b2, (0, Pp - planes)).reshape(1, Pp).astype(jnp.float32)

    # conv3: (cout, planes, 1, 1) -> (planes, cout), fold bn3, pad, bf16.
    w3, b3 = _fold_bn(jnp.transpose(params["conv3_w"][:, :, 0, 0]), params["bn3"])
    w3 = _pad2d(w3, Pp, Cout_p).astype(jnp.bfloat16)
    b3 = jnp.pad(b3, (0, Cout_p - cout)).reshape(1, Cout_p).astype(jnp.float32)

    # Activation: NHWC, channel-padded, bf16, flattened spatial -> single input.
    xin = jnp.pad(x, ((0, 0), (0, 0), (0, 0), (0, Cin_p - Cin)))
    xin = xin.reshape(N, H * W, Cin_p).astype(jnp.bfloat16)

    args = [xin, w1, b1, w2, b2, w3, b3]
    in_specs = [
        pl.BlockSpec((None, H * W, Cin_p), lambda n: (n, 0, 0)),
        pl.BlockSpec(w1.shape, lambda n: (0, 0)),
        pl.BlockSpec(b1.shape, lambda n: (0, 0)),
        pl.BlockSpec(w2.shape, lambda n: (0, 0, 0)),
        pl.BlockSpec(b2.shape, lambda n: (0, 0)),
        pl.BlockSpec(w3.shape, lambda n: (0, 0)),
        pl.BlockSpec(b3.shape, lambda n: (0, 0)),
    ]

    if has_sc:
        if stride > 1:
            # TODO(synk): fuse this subsample into the kernel (rare path).
            xs = x[:, ::stride, ::stride, :]
            xs = jnp.pad(xs, ((0, 0), (0, 0), (0, 0), (0, Cin_p - Cin)))
            xs = xs.reshape(N, Ho * Wo, Cin_p).astype(jnp.bfloat16)
            args.append(xs)
            in_specs.append(
                pl.BlockSpec((None, Ho * Wo, Cin_p), lambda n: (n, 0, 0)))
        wsc, bsc = _fold_bn(jnp.transpose(params["sc_conv_w"][:, :, 0, 0]),
                            params["sc_bn"])
        wsc = _pad2d(wsc, Cin_p, Cout_p).astype(jnp.bfloat16)
        bsc = jnp.pad(bsc, (0, Cout_p - cout)).reshape(1, Cout_p).astype(jnp.float32)
        args += [wsc, bsc]
        in_specs += [pl.BlockSpec(wsc.shape, lambda n: (0, 0)),
                     pl.BlockSpec(bsc.shape, lambda n: (0, 0))]
    # (identity shortcut: no extra inputs at all — x_ref is reused in-kernel)

    kernel = functools.partial(_bottleneck_kernel, H=H, W=W, Ho=Ho, Wo=Wo,
                               stride=stride, has_sc=has_sc,
                               fuse_dx=fuse_conv2_dx)

    out = pl.pallas_call(
        kernel,
        grid=(N,),
        in_specs=in_specs,
        out_specs=pl.BlockSpec((None, Ho * Wo, Cout_p), lambda n: (n, 0, 0)),
        out_shape=jax.ShapeDtypeStruct((N, Ho * Wo, Cout_p), out_dtype),
        scratch_shapes=[pltpu.VMEM((H + 2, Wp2, Pp), jnp.bfloat16)],
        compiler_params=pltpu.CompilerParams(
            dimension_semantics=("parallel",)),
    )(*args)

    out = out.reshape(N, Ho, Wo, Cout_p)[:, :, :, :cout]
    return jnp.transpose(out, (0, 3, 1, 2))              # back to NCHW


# ------------------------ pure-JAX reference (same numerics) ------------------

def _bottleneck_reference(params, x_nchw, *, stride=1):
    """Mirrors the kernel's precision policy: bf16 operands, f32 accumulation."""
    def q(a):
        return a.astype(jnp.bfloat16).astype(jnp.float32)

    def conv(a, w_hwio, s, p):
        return jax.lax.conv_general_dilated(
            a, w_hwio, window_strides=(s, s), padding=[(p, p), (p, p)],
            dimension_numbers=("NHWC", "HWIO", "NHWC"))

    def fold(w_oihw, bn):
        scale = bn["gamma"] / jnp.sqrt(bn["rvar"] + BN_EPS)
        w = jnp.transpose(w_oihw, (2, 3, 1, 0)) * scale[None, None, None, :]
        b = bn["beta"] - bn["rmean"] * scale
        return q(w), b

    x = jnp.transpose(x_nchw, (0, 2, 3, 1)).astype(jnp.float32)

    w1, b1 = fold(params["conv1_w"], params["bn1"])
    w2, b2 = fold(params["conv2_w"], params["bn2"])
    w3, b3 = fold(params["conv3_w"], params["bn3"])

    y1 = jnp.maximum(conv(q(x), w1, 1, 0) + b1, 0.0)
    y2 = jnp.maximum(conv(q(y1), w2, stride, 1) + b2, 0.0)
    y3 = conv(q(y2), w3, 1, 0) + b3

    if "sc_conv_w" in params:
        wsc, bsc = fold(params["sc_conv_w"], params["sc_bn"])
        res = conv(q(x), wsc, stride, 0) + bsc
    else:
        res = q(x)

    out = jnp.maximum(y3 + res, 0.0)
    return jnp.transpose(out, (0, 3, 1, 2))


# ------------------------------- parameter init -------------------------------

def _init_conv(key, cout, cin, k):
    std = (2.0 / (cin * k * k)) ** 0.5
    return std * jax.random.normal(key, (cout, cin, k, k), jnp.float32)


def _init_bn(key, c):
    k1, k2, k3, k4 = jax.random.split(key, 4)
    return dict(
        gamma=1.0 + 0.1 * jax.random.normal(k1, (c,), jnp.float32),
        beta=0.1 * jax.random.normal(k2, (c,), jnp.float32),
        rmean=0.1 * jax.random.normal(k3, (c,), jnp.float32),
        rvar=1.0 + 0.1 * jax.random.uniform(k4, (c,), jnp.float32),
    )


def init_bottleneck_params(key, in_planes, planes, stride=1):
    keys = jax.random.split(key, 8)
    p = {
        "conv1_w": _init_conv(keys[0], planes, in_planes, 1),
        "bn1": _init_bn(keys[1], planes),
        "conv2_w": _init_conv(keys[2], planes, planes, 3),
        "bn2": _init_bn(keys[3], planes),
        "conv3_w": _init_conv(keys[4], EXPANSION * planes, planes, 1),
        "bn3": _init_bn(keys[5], EXPANSION * planes),
    }
    if stride != 1 or in_planes != EXPANSION * planes:
        p["sc_conv_w"] = _init_conv(keys[6], EXPANSION * planes, in_planes, 1)
        p["sc_bn"] = _init_bn(keys[7], EXPANSION * planes)
    return p


# ------------------------------------ main ------------------------------------

if __name__ == "__main__":
    key = jax.random.PRNGKey(0)
    kp1, kp2, kx1, kx2 = jax.random.split(key, 4)

    def run_and_check(params, x, stride, fuse):
        fwd = jax.jit(functools.partial(bottleneck_forward, params,
                                        stride=stride, fuse_conv2_dx=fuse))
        out = jax.block_until_ready(fwd(x))
        ref = _bottleneck_reference(params, x, stride=stride)
        assert out.shape == ref.shape and out.dtype == jnp.float32
        err = float(jnp.max(jnp.abs(out - ref) / (jnp.abs(ref) + 1.0)))
        assert err < 5e-2, f"mismatch vs reference: {err}"
        return out

    N, H, W, planes = 2, 16, 16, 8

    # Case 1: conv shortcut (in_planes != 4*planes), stride=1, fused dx taps
    # (v6e / v7x configuration).
    in_planes = 16
    params = init_bottleneck_params(kp1, in_planes, planes, stride=1)
    x = jax.random.normal(kx1, (N, in_planes, H, W), jnp.float32)   # NCHW
    out = run_and_check(params, x, stride=1, fuse=True)
    assert out.shape == (N, EXPANSION * planes, H, W)

    # Same case with the 9x K=128 tap structure (v5e configuration).
    run_and_check(params, x, stride=1, fuse=False)

    # Case 2: identity shortcut (in_planes == 4*planes, stride=1) — the
    # residual is taken directly from the resident x block inside the kernel.
    in_planes2 = EXPANSION * planes
    params2 = init_bottleneck_params(kp2, in_planes2, planes, stride=1)
    x2 = jax.random.normal(kx2, (N, in_planes2, H, W), jnp.float32)
    run_and_check(params2, x2, stride=1, fuse=True)

    print("KERNEL_OK")
</pallas_src>

<mosaic_0001>
module attributes {stable_mosaic.version = 11 : i64} {
  func.func @_bottleneck_kernel(%arg0: i32, %arg1: memref<1x256x128xbf16, #tpu.memory_space<vmem>>, %arg2: memref<128x128xbf16, #tpu.memory_space<vmem>>, %arg3: memref<1x128xf32, #tpu.memory_space<vmem>>, %arg4: memref<3x384x128xbf16, #tpu.memory_space<vmem>>, %arg5: memref<1x128xf32, #tpu.memory_space<vmem>>, %arg6: memref<128x128xbf16, #tpu.memory_space<vmem>>, %arg7: memref<1x128xf32, #tpu.memory_space<vmem>>, %arg8: memref<128x128xbf16, #tpu.memory_space<vmem>>, %arg9: memref<1x128xf32, #tpu.memory_space<vmem>>, %arg10: memref<1x256x128xf32, #tpu.memory_space<vmem>>, %arg11: memref<18x32x128xbf16, #tpu.memory_space<vmem>>) attributes {dimension_semantics = [#tpu.dimension_semantics<parallel>], iteration_bounds = array<i64: 2>, scalar_prefetch = 0 : i64, scratch_operands = 1 : i64, tpu.core_type = #tpu.core_type<tc>, window_params = [{transform_indices = @transform_0, window_bounds = array<i64: 1, 256, 128>}, {pipeline_mode = #tpu.pipeline_mode<synchronous>, transform_indices = @transform_1, window_bounds = array<i64: 128, 128>}, {pipeline_mode = #tpu.pipeline_mode<synchronous>, transform_indices = @transform_2, window_bounds = array<i64: 1, 128>}, {pipeline_mode = #tpu.pipeline_mode<synchronous>, transform_indices = @transform_3, window_bounds = array<i64: 3, 384, 128>}, {pipeline_mode = #tpu.pipeline_mode<synchronous>, transform_indices = @transform_4, window_bounds = array<i64: 1, 128>}, {pipeline_mode = #tpu.pipeline_mode<synchronous>, transform_indices = @transform_5, window_bounds = array<i64: 128, 128>}, {pipeline_mode = #tpu.pipeline_mode<synchronous>, transform_indices = @transform_6, window_bounds = array<i64: 1, 128>}, {pipeline_mode = #tpu.pipeline_mode<synchronous>, transform_indices = @transform_7, window_bounds = array<i64: 128, 128>}, {pipeline_mode = #tpu.pipeline_mode<synchronous>, transform_indices = @transform_8, window_bounds = array<i64: 1, 128>}, {transform_indices = @transform_9, window_bounds = array<i64: 1, 256, 128>}]} {
    %c0 = arith.constant 0 : index
    %c0_0 = arith.constant 0 : index
    %c0_1 = arith.constant 0 : index
    %0 = vector.load %arg1[%c0, %c0_0, %c0_1] : memref<1x256x128xbf16, #tpu.memory_space<vmem>>, vector<1x256x128xbf16>
    %1 = vector.shape_cast %0 : vector<1x256x128xbf16> to vector<256x128xbf16>
    %c0_2 = arith.constant 0 : index
    %c0_3 = arith.constant 0 : index
    %2 = vector.load %arg2[%c0_2, %c0_3] : memref<128x128xbf16, #tpu.memory_space<vmem>>, vector<128x128xbf16>
    %cst = arith.constant dense<0.000000e+00> : vector<256x128xf32>
    %3 = tpu.matmul %1, %2, %cst {dimension_numbers = #tpu.dot_dimension_numbers<[1], [0], [0], [1], [0, 0, 1, 1], [], []>} : vector<256x128xbf16>, vector<128x128xbf16>, vector<256x128xf32> -> vector<256x128xf32>
    %c0_4 = arith.constant 0 : index
    %c0_5 = arith.constant 0 : index
    %4 = vector.load %arg3[%c0_4, %c0_5] : memref<1x128xf32, #tpu.memory_space<vmem>>, vector<1x128xf32>
    %5 = vector.broadcast %4 : vector<1x128xf32> to vector<256x128xf32>
    %6 = arith.addf %3, %5 : vector<256x128xf32>
    %cst_6 = arith.constant 0.000000e+00 : f32
    %7 = vector.broadcast %cst_6 : f32 to vector<256x128xf32>
    %8 = arith.maximumf %6, %7 : vector<256x128xf32>
    %9 = arith.truncf %8 : vector<256x128xf32> to vector<256x128xbf16>
    %cst_7 = arith.constant 0.000000e+00 : bf16
    %10 = vector.broadcast %cst_7 : bf16 to vector<32x128xbf16>
    %c0_8 = arith.constant 0 : index
    %c0_9 = arith.constant 0 : index
    %c0_10 = arith.constant 0 : index
    %11 = vector.load %arg11[%c0_8, %c0_9, %c0_10] : memref<18x32x128xbf16, #tpu.memory_space<vmem>>, vector<1x32x128xbf16>
    %12 = vector.shape_cast %11 : vector<1x32x128xbf16> to vector<32x128xbf16>
    %13 = vector.shape_cast %10 : vector<32x128xbf16> to vector<1x32x128xbf16>
    tpu.vector_store %arg11[%c0_8, %c0_9, %c0_10], %13 {strides = array<i32>} : memref<18x32x128xbf16, #tpu.memory_space<vmem>>, vector<1x32x128xbf16>,
    %c17 = arith.constant 17 : index
    %c0_11 = arith.constant 0 : index
    %c0_12 = arith.constant 0 : index
    %14 = vector.load %arg11[%c17, %c0_11, %c0_12] : memref<18x32x128xbf16, #tpu.memory_space<vmem>>, vector<1x32x128xbf16>
    %15 = vector.shape_cast %14 : vector<1x32x128xbf16> to vector<32x128xbf16>
    %16 = vector.shape_cast %10 : vector<32x128xbf16> to vector<1x32x128xbf16>
    tpu.vector_store %arg11[%c17, %c0_11, %c0_12], %16 {strides = array<i32>} : memref<18x32x128xbf16, #tpu.memory_space<vmem>>, vector<1x32x128xbf16>,
    %cst_13 = arith.constant 0.000000e+00 : bf16
    %17 = vector.broadcast %cst_13 : bf16 to vector<16x1x128xbf16>
    %c1 = arith.constant 1 : index
    %c0_14 = arith.constant 0 : index
    %c0_15 = arith.constant 0 : index
    %18 = vector.load %arg11[%c1, %c0_14, %c0_15] : memref<18x32x128xbf16, #tpu.memory_space<vmem>>, vector<16x1x128xbf16>
    tpu.vector_store %arg11[%c1, %c0_14, %c0_15], %17 {strides = array<i32>} : memref<18x32x128xbf16, #tpu.memory_space<vmem>>, vector<16x1x128xbf16>,
    %c1_16 = arith.constant 1 : index
    %c17_17 = arith.constant 17 : index
    %c0_18 = arith.constant 0 : index
    %19 = vector.load %arg11[%c1_16, %c17_17, %c0_18] : memref<18x32x128xbf16, #tpu.memory_space<vmem>>, vector<16x1x128xbf16>
    tpu.vector_store %arg11[%c1_16, %c17_17, %c0_18], %17 {strides = array<i32>} : memref<18x32x128xbf16, #tpu.memory_space<vmem>>, vector<16x1x128xbf16>,
    %20 = vector.shape_cast %9 : vector<256x128xbf16> to vector<16x16x128xbf16>
    %c1_19 = arith.constant 1 : index
    %c1_20 = arith.constant 1 : index
    %c0_21 = arith.constant 0 : index
    %21 = vector.load %arg11[%c1_19, %c1_20, %c0_21] : memref<18x32x128xbf16, #tpu.memory_space<vmem>>, vector<16x16x128xbf16>
    tpu.vector_store %arg11[%c1_19, %c1_20, %c0_21], %20 {strides = array<i32>} : memref<18x32x128xbf16, #tpu.memory_space<vmem>>, vector<16x16x128xbf16>,
    %cst_22 = arith.constant 0.000000e+00 : f32
    %22 = vector.broadcast %cst_22 : f32 to vector<256x128xf32>
    %c0_23 = arith.constant 0 : index
    %c0_24 = arith.constant 0 : index
    %c0_25 = arith.constant 0 : index
    %23 = vector.load %arg11[%c0_23, %c0_24, %c0_25] : memref<18x32x128xbf16, #tpu.memory_space<vmem>>, vector<16x16x128xbf16>
    %c0_26 = arith.constant 0 : index
    %c1_27 = arith.constant 1 : index
    %c0_28 = arith.constant 0 : index
    %24 = vector.load %arg11[%c0_26, %c1_27, %c0_28] : memref<18x32x128xbf16, #tpu.memory_space<vmem>>, vector<16x16x128xbf16>
    %c0_29 = arith.constant 0 : index
    %c2 = arith.constant 2 : index
    %c0_30 = arith.constant 0 : index
    %25 = vector.load %arg11[%c0_29, %c2, %c0_30] : memref<18x32x128xbf16, #tpu.memory_space<vmem>>, vector<16x16x128xbf16>
    %26 = tpu.concatenate %23, %24, %25 in 2 : vector<16x16x128xbf16>, vector<16x16x128xbf16>, vector<16x16x128xbf16> -> vector<16x16x384xbf16>
    %27 = vector.shape_cast %26 : vector<16x16x384xbf16> to vector<256x384xbf16>
    %c0_31 = arith.constant 0 : index
    %c0_32 = arith.constant 0 : index
    %c0_33 = arith.constant 0 : index
    %28 = vector.load %arg4[%c0_31, %c0_32, %c0_33] : memref<3x384x128xbf16, #tpu.memory_space<vmem>>, vector<1x384x128xbf16>
    %29 = vector.shape_cast %28 : vector<1x384x128xbf16> to vector<384x128xbf16>
    %cst_34 = arith.constant dense<0.000000e+00> : vector<256x128xf32>
    %30 = tpu.matmul %27, %29, %cst_34 {dimension_numbers = #tpu.dot_dimension_numbers<[1], [0], [0], [1], [0, 0, 1, 1], [], []>} : vector<256x384xbf16>, vector<384x128xbf16>, vector<256x128xf32> -> vector<256x128xf32>
    %31 = arith.addf %22, %30 : vector<256x128xf32>
    %c1_35 = arith.constant 1 : index
    %c0_36 = arith.constant 0 : index
    %c0_37 = arith.constant 0 : index
    %32 = vector.load %arg11[%c1_35, %c0_36, %c0_37] : memref<18x32x128xbf16, #tpu.memory_space<vmem>>, vector<16x16x128xbf16>
    %c1_38 = arith.constant 1 : index
    %c1_39 = arith.constant 1 : index
    %c0_40 = arith.constant 0 : index
    %33 = vector.load %arg11[%c1_38, %c1_39, %c0_40] : memref<18x32x128xbf16, #tpu.memory_space<vmem>>, vector<16x16x128xbf16>
    %c1_41 = arith.constant 1 : index
    %c2_42 = arith.constant 2 : index
    %c0_43 = arith.constant 0 : index
    %34 = vector.load %arg11[%c1_41, %c2_42, %c0_43] : memref<18x32x128xbf16, #tpu.memory_space<vmem>>, vector<16x16x128xbf16>
    %35 = tpu.concatenate %32, %33, %34 in 2 : vector<16x16x128xbf16>, vector<16x16x128xbf16>, vector<16x16x128xbf16> -> vector<16x16x384xbf16>
    %36 = vector.shape_cast %35 : vector<16x16x384xbf16> to vector<256x384xbf16>
    %c1_44 = arith.constant 1 : index
    %c0_45 = arith.constant 0 : index
    %c0_46 = arith.constant 0 : index
    %37 = vector.load %arg4[%c1_44, %c0_45, %c0_46] : memref<3x384x128xbf16, #tpu.memory_space<vmem>>, vector<1x384x128xbf16>
    %38 = vector.shape_cast %37 : vector<1x384x128xbf16> to vector<384x128xbf16>
    %cst_47 = arith.constant dense<0.000000e+00> : vector<256x128xf32>
    %39 = tpu.matmul %36, %38, %cst_47 {dimension_numbers = #tpu.dot_dimension_numbers<[1], [0], [0], [1], [0, 0, 1, 1], [], []>} : vector<256x384xbf16>, vector<384x128xbf16>, vector<256x128xf32> -> vector<256x128xf32>
    %40 = arith.addf %31, %39 : vector<256x128xf32>
    %c2_48 = arith.constant 2 : index
    %c0_49 = arith.constant 0 : index
    %c0_50 = arith.constant 0 : index
    %41 = vector.load %arg11[%c2_48, %c0_49, %c0_50] : memref<18x32x128xbf16, #tpu.memory_space<vmem>>, vector<16x16x128xbf16>
    %c2_51 = arith.constant 2 : index
    %c1_52 = arith.constant 1 : index
    %c0_53 = arith.constant 0 : index
    %42 = vector.load %arg11[%c2_51, %c1_52, %c0_53] : memref<18x32x128xbf16, #tpu.memory_space<vmem>>, vector<16x16x128xbf16>
    %c2_54 = arith.constant 2 : index
    %c2_55 = arith.constant 2 : index
    %c0_56 = arith.constant 0 : index
    %43 = vector.load %arg11[%c2_54, %c2_55, %c0_56] : memref<18x32x128xbf16, #tpu.memory_space<vmem>>, vector<16x16x128xbf16>
    %44 = tpu.concatenate %41, %42, %43 in 2 : vector<16x16x128xbf16>, vector<16x16x128xbf16>, vector<16x16x128xbf16> -> vector<16x16x384xbf16>
    %45 = vector.shape_cast %44 : vector<16x16x384xbf16> to vector<256x384xbf16>
    %c2_57 = arith.constant 2 : index
    %c0_58 = arith.constant 0 : index
    %c0_59 = arith.constant 0 : index
    %46 = vector.load %arg4[%c2_57, %c0_58, %c0_59] : memref<3x384x128xbf16, #tpu.memory_space<vmem>>, vector<1x384x128xbf16>
    %47 = vector.shape_cast %46 : vector<1x384x128xbf16> to vector<384x128xbf16>
    %cst_60 = arith.constant dense<0.000000e+00> : vector<256x128xf32>
    %48 = tpu.matmul %45, %47, %cst_60 {dimension_numbers = #tpu.dot_dimension_numbers<[1], [0], [0], [1], [0, 0, 1, 1], [], []>} : vector<256x384xbf16>, vector<384x128xbf16>, vector<256x128xf32> -> vector<256x128xf32>
    %49 = arith.addf %40, %48 : vector<256x128xf32>
    %c0_61 = arith.constant 0 : index
    %c0_62 = arith.constant 0 : index
    %50 = vector.load %arg5[%c0_61, %c0_62] : memref<1x128xf32, #tpu.memory_space<vmem>>, vector<1x128xf32>
    %51 = vector.broadcast %50 : vector<1x128xf32> to vector<256x128xf32>
    %52 = arith.addf %49, %51 : vector<256x128xf32>
    %cst_63 = arith.constant 0.000000e+00 : f32
    %53 = vector.broadcast %cst_63 : f32 to vector<256x128xf32>
    %54 = arith.maximumf %52, %53 : vector<256x128xf32>
    %55 = arith.truncf %54 : vector<256x128xf32> to vector<256x128xbf16>
    %c0_64 = arith.constant 0 : index
    %c0_65 = arith.constant 0 : index
    %56 = vector.load %arg6[%c0_64, %c0_65] : memref<128x128xbf16, #tpu.memory_space<vmem>>, vector<128x128xbf16>
    %cst_66 = arith.constant dense<0.000000e+00> : vector<256x128xf32>
    %57 = tpu.matmul %55, %56, %cst_66 {dimension_numbers = #tpu.dot_dimension_numbers<[1], [0], [0], [1], [0, 0, 1, 1], [], []>} : vector<256x128xbf16>, vector<128x128xbf16>, vector<256x128xf32> -> vector<256x128xf32>
    %c0_67 = arith.constant 0 : index
    %c0_68 = arith.constant 0 : index
    %58 = vector.load %arg7[%c0_67, %c0_68] : memref<1x128xf32, #tpu.memory_space<vmem>>, vector<1x128xf32>
    %59 = vector.broadcast %58 : vector<1x128xf32> to vector<256x128xf32>
    %60 = arith.addf %57, %59 : vector<256x128xf32>
    %c0_69 = arith.constant 0 : index
    %c0_70 = arith.constant 0 : index
    %c0_71 = arith.constant 0 : index
    %61 = vector.load %arg1[%c0_69, %c0_70, %c0_71] : memref<1x256x128xbf16, #tpu.memory_space<vmem>>, vector<1x256x128xbf16>
    %62 = vector.shape_cast %61 : vector<1x256x128xbf16> to vector<256x128xbf16>
    %c0_72 = arith.constant 0 : index
    %c0_73 = arith.constant 0 : index
    %63 = vector.load %arg8[%c0_72, %c0_73] : memref<128x128xbf16, #tpu.memory_space<vmem>>, vector<128x128xbf16>
    %cst_74 = arith.constant dense<0.000000e+00> : vector<256x128xf32>
    %64 = tpu.matmul %62, %63, %cst_74 {dimension_numbers = #tpu.dot_dimension_numbers<[1], [0], [0], [1], [0, 0, 1, 1], [], []>} : vector<256x128xbf16>, vector<128x128xbf16>, vector<256x128xf32> -> vector<256x128xf32>
    %c0_75 = arith.constant 0 : index
    %c0_76 = arith.constant 0 : index
    %65 = vector.load %arg9[%c0_75, %c0_76] : memref<1x128xf32, #tpu.memory_space<vmem>>, vector<1x128xf32>
    %66 = vector.broadcast %65 : vector<1x128xf32> to vector<256x128xf32>
    %67 = arith.addf %64, %66 : vector<256x128xf32>
    %68 = arith.addf %60, %67 : vector<256x128xf32>
    %cst_77 = arith.constant 0.000000e+00 : f32
    %69 = vector.broadcast %cst_77 : f32 to vector<256x128xf32>
    %70 = arith.maximumf %68, %69 : vector<256x128xf32>
    %c0_78 = arith.constant 0 : index
    %c0_79 = arith.constant 0 : index
    %c0_80 = arith.constant 0 : index
    %71 = vector.load %arg10[%c0_78, %c0_79, %c0_80] : memref<1x256x128xf32, #tpu.memory_space<vmem>>, vector<1x256x128xf32>
    %72 = vector.shape_cast %71 : vector<1x256x128xf32> to vector<256x128xf32>
    %73 = vector.shape_cast %70 : vector<256x128xf32> to vector<1x256x128xf32>
    tpu.vector_store %arg10[%c0_78, %c0_79, %c0_80], %73 {strides = array<i32>} : memref<1x256x128xf32, #tpu.memory_space<vmem>>, vector<1x256x128xf32>,
    return
  }
  func.func @transform_0(%arg0: i32) -> (i32, i32, i32) {
    %c0_i32 = arith.constant 0 : i32
    %c0_i32_0 = arith.constant 0 : i32
    %c0_i32_1 = arith.constant 0 : i32
    return %arg0, %c0_i32, %c0_i32_0 : i32, i32, i32
  }
  func.func @transform_1(%arg0: i32) -> (i32, i32) {
    %c0_i32 = arith.constant 0 : i32
    %c0_i32_0 = arith.constant 0 : i32
    %c0_i32_1 = arith.constant 0 : i32
    return %c0_i32, %c0_i32_0 : i32, i32
  }
  func.func @transform_2(%arg0: i32) -> (i32, i32) {
    %c0_i32 = arith.constant 0 : i32
    %c0_i32_0 = arith.constant 0 : i32
    %c0_i32_1 = arith.constant 0 : i32
    return %c0_i32, %c0_i32_0 : i32, i32
  }
  func.func @transform_3(%arg0: i32) -> (i32, i32, i32) {
    %c0_i32 = arith.constant 0 : i32
    %c0_i32_0 = arith.constant 0 : i32
    %c0_i32_1 = arith.constant 0 : i32
    %c0_i32_2 = arith.constant 0 : i32
    return %c0_i32, %c0_i32_0, %c0_i32_1 : i32, i32, i32
  }
  func.func @transform_4(%arg0: i32) -> (i32, i32) {
    %c0_i32 = arith.constant 0 : i32
    %c0_i32_0 = arith.constant 0 : i32
    %c0_i32_1 = arith.constant 0 : i32
    return %c0_i32, %c0_i32_0 : i32, i32
  }
  func.func @transform_5(%arg0: i32) -> (i32, i32) {
    %c0_i32 = arith.constant 0 : i32
    %c0_i32_0 = arith.constant 0 : i32
    %c0_i32_1 = arith.constant 0 : i32
    return %c0_i32, %c0_i32_0 : i32, i32
  }
  func.func @transform_6(%arg0: i32) -> (i32, i32) {
    %c0_i32 = arith.constant 0 : i32
    %c0_i32_0 = arith.constant 0 : i32
    %c0_i32_1 = arith.constant 0 : i32
    return %c0_i32, %c0_i32_0 : i32, i32
  }
  func.func @transform_7(%arg0: i32) -> (i32, i32) {
    %c0_i32 = arith.constant 0 : i32
    %c0_i32_0 = arith.constant 0 : i32
    %c0_i32_1 = arith.constant 0 : i32
    return %c0_i32, %c0_i32_0 : i32, i32
  }
  func.func @transform_8(%arg0: i32) -> (i32, i32) {
    %c0_i32 = arith.constant 0 : i32
    %c0_i32_0 = arith.constant 0 : i32
    %c0_i32_1 = arith.constant 0 : i32
    return %c0_i32, %c0_i32_0 : i32, i32
  }
  func.func @transform_9(%arg0: i32) -> (i32, i32, i32) {
    %c0_i32 = arith.constant 0 : i32
    %c0_i32_0 = arith.constant 0 : i32
    %c0_i32_1 = arith.constant 0 : i32
    return %arg0, %c0_i32, %c0_i32_0 : i32, i32, i32
  }
}

</mosaic_0001>

<bundles_post_ra>
// kernel: bottleneck_forward.1
= control target key start
LH: loop header
LB: loop body
LE: loop exit
PB: predicated region body
PF: predicated region fallthrough
CT: control target
= control target key end

     0   :  { %s6018_s30 = smov 0   ;;  %s7496_s0 = inlined_call_operand.vmem [shape: bf16[2,256,128], index: 0, kind: input, shape index: {}]   ;;  %s7497_s1 = inlined_call_operand.vmem [shape: bf16[128,128], index: 1, kind: input, shape index: {}]   ;;  %s7498_s2 = inlined_call_operand.vmem [shape: f32[1,128], index: 2, kind: input, shape index: {}]   ;;  %s7499_s3 = inlined_call_operand.vmem [shape: bf16[3,384,128], index: 3, kind: input, shape index: {}]   ;;  %s7500_s4 = inlined_call_operand.vmem [shape: f32[1,128], index: 4, kind: input, shape index: {}]   ;;  %s7501_s5 = inlined_call_operand.vmem [shape: bf16[128,128], index: 5, kind: input, shape index: {}]   ;;  %s7502_s6 = inlined_call_operand.vmem [shape: f32[1,128], index: 6, kind: input, shape index: {}]   ;;  %s7503_s7 = inlined_call_operand.vmem [shape: bf16[128,128], index: 7, kind: input, shape index: {}]   ;;  %s7504_s8 = inlined_call_operand.vmem [shape: f32[1,128], index: 8, kind: input, shape index: {}]   ;;  %s7505_s9 = inlined_call_operand.vmem [shape: f32[2,256,128], index: 9, kind: output, shape index: {}]  }
   0x1 LB: > { %s4556_s10 = sadd.s32 4294967295, %s5965_s30   ;;  %p4560_p0 = scmp.ge.s32.totalorder %s5965_s30, 1  ;;  %s5965_s30 = sphi %s6018_s30, %s19_s30  }
   0x2   : > { %p287_p1 = scmp.lt.s32.totalorder %s5965_s30, 3 }
   0x4   : > { %p288_p2 = pnand %p4560_p0, %p287_p1 }
   0x5   : > { %v5830_v0 = vld [vmem:[%s7497_s1] sm:$0xff] (!%p288_p2)   ;;  %p323_p3 = scmp.lt.s32.totalorder (!%p288_p2), %s4556_s10, 1  ;;  %v5831_v1 = vld [vmem:[%s7497_s1 + $0x8] sm:$0xff] (!%p288_p2)   ;;  %v5832_v2 = vld [vmem:[%s7497_s1 + $0x10] sm:$0xff] (!%p288_p2)   ;;  %vm748_vm0 = vcmask (!%p288_p2), 1040384   ;;  %vm993_vm5 = vcmask (!%p288_p2), 1047552  }
   0x6   : > { %291 = sbr.rel (%p288_p2) target bundleno = 1105 (0x451), region = 56  ;;  %5277 = vmatprep.subr.bf16.mxu0 (!%p288_p2), %v5830_v0  ;;  %v5833_v3 = vld [vmem:[%s7497_s1 + $0x18] sm:$0xff] (!%p288_p2)   ;;  %v5834_v5 = vld [vmem:[%s7497_s1 + $0x20] sm:$0xff] (!%p288_p2)   ;;  %v5835_v6 = vld [vmem:[%s7497_s1 + $0x28] sm:$0xff] (!%p288_p2)   ;;  %vm799_vm1 = vsmask.f32 (!%p288_p2), 7938 }
   0x7   : > { %5278 = vmatpush3.bf16.msra.mxu0 (!%p288_p2), %v5830_v0  ;;  %v5836_v7 = vld [vmem:[%s7497_s1 + $0x30] sm:$0xff] (!%p288_p2)   ;;  %v5837_v8 = vld [vmem:[%s7497_s1 + $0x38] sm:$0xff] (!%p288_p2)   ;;  %v5854_v10 = vld [vmem:[%s7499_s3 + $0x140] sm:$0xff] (!%p288_p2)   ;;  %vm749_vm3 = vsmask.f32 (!%p288_p2), 256  ;;  %vm1380_vm7 = vcmask (!%p288_p2), 1046528  }
   0x8   : > { %5279 = vmatprep.subr.bf16.mxu0 (!%p288_p2), %v5831_v1  ;;  %v5855_v12 = vld [vmem:[%s7499_s3 + $0x148] sm:$0xff] (!%p288_p2)   ;;  %v5856_v13 = vld [vmem:[%s7499_s3 + $0x150] sm:$0xff] (!%p288_p2)   ;;  %v5857_v16 = vld [vmem:[%s7499_s3 + $0x158] sm:$0xff] (!%p288_p2)   ;;  %vm1139_vm8 = vsmask.f32 (!%p288_p2), 7424 }
   0x9   : > { %v5858_v17 = vld [vmem:[%s7499_s3 + $0x160] sm:$0xff] (!%p288_p2)   ;;  %v5862_v31 = vld [vmem:[%s7499_s3 + $0x108] sm:$0xff] (!%p288_p2)   ;;  %vm6102_vm2 = vmand (!%p288_p2), %vm748_vm0, %vm799_vm1 }
   0xa   : > { %v5859_v29 = vld [vmem:[%s7499_s3 + $0x100] sm:$0xff] (!%p288_p2)   ;;  %v5863_v32 = vld [vmem:[%s7499_s3 + $0xc8] sm:$0xff] (!%p288_p2)   ;;  %v5864_v35 = vld [vmem:[%s7499_s3 + $0x110] sm:$0xff] (!%p288_p2)  }
   0xb   : > { %5280 = vmatpush3.bf16.msra.mxu0 (!%p288_p2), %v5831_v1  ;;  %v5860_v30 = vld [vmem:[%s7499_s3 + $0xc0] sm:$0xff] (!%p288_p2)   ;;  %4821 = vmatprep.subr.bf16.mxu1 (!%p288_p2), %v5859_v29  ;;  %v804_v34 = vld [vmem:[#allocation2 + $0x28] sm:$0x1] (!%p288_p2)  ;;  %v801_v37 = vld [vmem:[#allocation2 + $0x18] sm:$0x1] (!%p288_p2) }
   0xc   : > { %5281 = vmatprep.subr.bf16.mxu0 (!%p288_p2), %v5832_v2  ;;  %4822 = vmatpush3.bf16.msra.mxu1 (!%p288_p2), %v5860_v30  ;;  %v805_v36 = vsel (!%p288_p2), %vm6102_vm2, 0, %v804_v34  ;;  %v5865_v38 = vld [vmem:[%s7499_s3 + $0xd0] sm:$0xff] (!%p288_p2)   ;;  %vm6114_vm4 = vmand (!%p288_p2), %vm748_vm0, %vm749_vm3  ;;  %v754_v40 = vld [vmem:[#allocation2 + $0x20] sm:$0x1] (!%p288_p2)  ;;  %v802_v41 = vsel (!%p288_p2), %vm6102_vm2, 0, %v801_v37 }
   0xd   : > { %s7513_s10 = smov (!%p323_p3, %s4556_s10), 1  ;;  %4823 = vmatprep.subr.bf16.mxu1 %v5862_v31  ;;  %806 = vst [vmem:[#allocation2 + $0x28] sm:$0x1] %v805_v36  ;;  %v755_v42 = vsel %vm6114_vm4, 0, %v754_v40  ;;  %v751_v43 = vld [vmem:[#allocation2 + $0x10] sm:$0x1]  ;;  %vm6242_vm6 = vmand %vm993_vm5, %vm799_vm1 }
   0xe   : > { %s4795_s17 = sshll.u32 %s7513_s10, 7  ;;  %803 = vst [vmem:[#allocation2 + $0x18] sm:$0x1] %v802_v41  ;;  %756 = vst [vmem:[#allocation2 + $0x20] sm:$0x1] %v755_v42  ;;  %v752_v44 = vsel %vm6114_vm4, 0, %v751_v43 }
   0xf   : > { %s6041_s20 = scalar_lea.vmem %s7496_s0, %s4795_s17  ;;  %5282 = vmatpush3.bf16.msra.mxu0 %v5832_v2  ;;  %v5867_v45 = vld [vmem:[%s7499_s3 + $0x118] sm:$0xff]   ;;  %753 = vst [vmem:[#allocation2 + $0x10] sm:$0x1] %v752_v44  ;;  %v810_v47 = vld [vmem:[#allocation2 + $0x48] sm:$0x1]  ;;  %v5869_v48 = vld [vmem:[%s7499_s3 + $0x120] sm:$0xff]  }
  0x10   : > { %v5838_v4 = vld [vmem:[%s6041_s20] sm:$0xff]   ;;  %5283 = vmatprep.subr.bf16.mxu0 %v5833_v3  ;;  %v5839_v9 = vld [vmem:[%s6041_s20 + $0x8] sm:$0xff]   ;;  %v5840_v11 = vld [vmem:[%s6041_s20 + $0x10] sm:$0xff]   ;;  %4824 = vmatpush3.bf16.msra.mxu1 %v5863_v32  ;;  %v811_v49 = vsel %vm6102_vm2, 0, %v810_v47  ;;  %s4796_s16 = sshll.u32 %s7513_s10, 8 }
  0x11   : > { %5293 = vmatprep.mubr.bf16.mxu0 %v5838_v4  ;;  %v5841_v14 = vld [vmem:[%s6041_s20 + $0x18] sm:$0xff]   ;;  %v5842_v15 = vld [vmem:[%s6041_s20 + $0x20] sm:$0xff]   ;;  %v5843_v18 = vld [vmem:[%s6041_s20 + $0x28] sm:$0xff]   ;;  %4825 = vmatprep.subr.bf16.mxu1 %v5864_v35  ;;  %812 = vst [vmem:[#allocation2 + $0x48] sm:$0x1] %v811_v49  ;;  %s7430_s18 = scalar_lea.vmem %s7505_s9, %s4796_s16 }
  0x12   : > { %v5844_v19 = vld [vmem:[%s6041_s20 + $0x30] sm:$0xff]   ;;  %v5845_v20 = vld [vmem:[%s6041_s20 + $0x38] sm:$0xff]   ;;  %v5846_v21 = vld [vmem:[%s6041_s20 + $0x40] sm:$0xff]  }
  0x13   : > { %5284 = vmatpush3.bf16.msra.mxu0 %v5833_v3  ;;  %v5847_v22 = vld [vmem:[%s6041_s20 + $0x48] sm:$0xff]   ;;  %v5848_v23 = vld [vmem:[%s6041_s20 + $0x50] sm:$0xff]   ;;  %v5849_v24 = vld [vmem:[%s6041_s20 + $0x58] sm:$0xff]  }
  0x14   : > { %5285 = vmatprep.subr.bf16.mxu0 %v5834_v5  ;;  %v5850_v25 = vld [vmem:[%s6041_s20 + $0x60] sm:$0xff]   ;;  %v5851_v26 = vld [vmem:[%s6041_s20 + $0x68] sm:$0xff]   ;;  %v5852_v27 = vld [vmem:[%s6041_s20 + $0x70] sm:$0xff]   ;;  %4826 = vmatpush3.bf16.msra.mxu1 %v5865_v38 }
  0x15   : > { %v5853_v28 = vld [vmem:[%s6041_s20 + $0x78] sm:$0xff]   ;;  %4827 = vmatprep.subr.bf16.mxu1 %v5867_v45  ;;  %v5870_v51 = vld [vmem:[%s7499_s3 + $0xe0] sm:$0xff]   ;;  %v757_v55 = vld [vmem:[#allocation2 + $0x30] sm:$0x1] }
  0x16   : > { %v5868_v46 = vld [vmem:[%s7499_s3 + $0xd8] sm:$0xff]   ;;  %v760_v52 = vld [vmem:[#allocation2 + $0x40] sm:$0x1]  ;;  %v5861_v56 = vld [vmem:[%s7499_s3 + $0x168] sm:$0xff]   ;;  %v758_v57 = vsel %vm6114_vm4, 0, %v757_v55 }
  0x17   : > { %5286 = vmatpush3.bf16.msra.mxu0 %v5834_v5  ;;  %v807_v50 = vld [vmem:[#allocation2 + $0x38] sm:$0x1]  ;;  %v761_v54 = vsel %vm6114_vm4, 0, %v760_v52  ;;  %v5872_v58 = vld [vmem:[%s7499_s3 + $0x128] sm:$0xff]   ;;  %759 = vst [vmem:[#allocation2 + $0x30] sm:$0x1] %v758_v57 }
  0x18   : > { %5287 = vmatprep.subr.bf16.mxu0 %v5835_v6  ;;  %4828 = vmatpush3.bf16.msra.mxu1 %v5868_v46  ;;  %v808_v53 = vsel %vm6102_vm2, 0, %v807_v50  ;;  %762 = vst [vmem:[#allocation2 + $0x40] sm:$0x1] %v761_v54  ;;  %v5873_v59 = vld [vmem:[%s7499_s3 + $0xe8] sm:$0xff]   ;;  %v5866_v60 = vld [vmem:[%s7499_s3 + $0x170] sm:$0xff]   ;;  %v5967_v54 = vmov 0  }
  0x19   : > { %4829 = vmatprep.subr.bf16.mxu1 %v5869_v48  ;;  %809 = vst [vmem:[#allocation2 + $0x38] sm:$0x1] %v808_v53  ;;  %v816_v61 = vld [vmem:[#allocation2 + $0x68] sm:$0x1]  ;;  %v5874_v62 = vld [vmem:[%s7499_s3 + $0x130] sm:$0xff]   ;;  %v5894_v53 = vld [vmem:[%s7499_s3 + $0x1c0] sm:$0xff]  }
  0x1a   : > { %v817_v63 = vsel %vm6102_vm2, 0, %v816_v61  ;;  %v813_v0 = vld [vmem:[#allocation2 + $0x58] sm:$0x1]  ;;  %v5875_v1 = vld [vmem:[%s7499_s3 + $0xf0] sm:$0xff]   ;;  %v766_v2 = vld [vmem:[#allocation2 + $0x60] sm:$0x1] }
  0x1b   : > { %5288 = vmatpush3.bf16.msra.mxu0 %v5835_v6  ;;  %818 = vst [vmem:[#allocation2 + $0x68] sm:$0x1] %v817_v63  ;;  %v814_v3 = vsel %vm6102_vm2, 0, %v813_v0  ;;  %v767_v4 = vsel %vm6114_vm4, 0, %v766_v2  ;;  %v763_v5 = vld [vmem:[#allocation2 + $0x50] sm:$0x1] }
  0x1c   : > { %5289 = vmatprep.subr.bf16.mxu0 %v5836_v7  ;;  %4830 = vmatpush3.bf16.msra.mxu1 %v5870_v51  ;;  %815 = vst [vmem:[#allocation2 + $0x58] sm:$0x1] %v814_v3  ;;  %768 = vst [vmem:[#allocation2 + $0x60] sm:$0x1] %v767_v4  ;;  %v764_v6 = vsel %vm6114_vm4, 0, %v763_v5 }
  0x1d   : > { %4831 = vmatprep.subr.bf16.mxu1 %v5872_v58  ;;  %765 = vst [vmem:[#allocation2 + $0x50] sm:$0x1] %v764_v6  ;;  %v781_v31 = vld [vmem:[#allocation2 + $0xb0] sm:$0x1]  ;;  %v831_v32 = vld [vmem:[#allocation2 + $0xb8] sm:$0x1] }
  0x1e   : > { %v782_v34 = vsel %vm6114_vm4, 0, %v781_v31  ;;  %v832_v35 = vsel %vm6102_vm2, 0, %v831_v32  ;;  %v790_v36 = vld [vmem:[#allocation2 + $0xe0] sm:$0x1]  ;;  %v840_v38 = vld [vmem:[#allocation2 + $0xe8] sm:$0x1] }
  0x1f   : > { %5290 = vmatpush3.bf16.msra.mxu0 %v5836_v7  ;;  %v5871_v7 = vld [vmem:[%s7499_s3 + $0x178] sm:$0xff]   ;;  %783 = vst [vmem:[#allocation2 + $0xb0] sm:$0x1] %v782_v34  ;;  %833 = vst [vmem:[#allocation2 + $0xb8] sm:$0x1] %v832_v35  ;;  %v791_v37 = vsel %vm6114_vm4, 0, %v790_v36 }
  0x20   : > { %5291 = vmatprep.subr.bf16.mxu0 %v5837_v8  ;;  %4832 = vmatpush3.bf16.msra.mxu1 %v5873_v59  ;;  %792 = vst [vmem:[#allocation2 + $0xe0] sm:$0x1] %v791_v37  ;;  %v841_v40 = vsel %vm6102_vm2, 0, %v840_v38  ;;  %v787_v41 = vld [vmem:[#allocation2 + $0xd0] sm:$0x1]  ;;  %742 = vst [vmem:[#allocation2] sm:$0xff] %v5967_v54 }
  0x21   : > { %4833 = vmatprep.subr.bf16.mxu1 %v5874_v62  ;;  %842 = vst [vmem:[#allocation2 + $0xe8] sm:$0x1] %v841_v40  ;;  %v837_v42 = vld [vmem:[#allocation2 + $0xd8] sm:$0x1]  ;;  %v788_v43 = vsel %vm6114_vm4, 0, %v787_v41  ;;  %743 = vst [vmem:[#allocation2 + $0x8] sm:$0xff] %v5967_v54 }
  0x22   : > { %v838_v44 = vsel %vm6102_vm2, 0, %v837_v42  ;;  %789 = vst [vmem:[#allocation2 + $0xd0] sm:$0x1] %v788_v43  ;;  %v796_v45 = vld [vmem:[#allocation2 + $0x100] sm:$0x1]  ;;  %745 = vst [vmem:[#allocation2 + $0x110] sm:$0xff] %v5967_v54 }
  0x23   : > { %5292 = vmatpush3.bf16.msra.mxu0 %v5837_v8  ;;  %v5877_v8 = vld [vmem:[%s7499_s3 + $0x138] sm:$0xff]   ;;  %839 = vst [vmem:[#allocation2 + $0xd8] sm:$0x1] %v838_v44  ;;  %v797_v46 = vsel %vm6114_vm4, 0, %v796_v45  ;;  %v846_v47 = vld [vmem:[#allocation2 + $0x108] sm:$0x1] }
  0x24   : > { %5325 = vmatprep.subr.bf16.mxu0 %v5854_v10  ;;  %4834 = vmatpush3.bf16.msra.mxu1 %v5875_v1  ;;  %798 = vst [vmem:[#allocation2 + $0x100] sm:$0x1] %v797_v46  ;;  %v847_v48 = vsel %vm6102_vm2, 0, %v846_v47  ;;  %v793_v49 = vld [vmem:[#allocation2 + $0xf0] sm:$0x1]  ;;  %746 = vst [vmem:[#allocation2 + $0x118] sm:$0xff] %v5967_v54 }
  0x25   : > { %4835 = vmatprep.subr.bf16.mxu1 %v5877_v8  ;;  %848 = vst [vmem:[#allocation2 + $0x108] sm:$0x1] %v847_v48  ;;  %v843_v50 = vld [vmem:[#allocation2 + $0xf8] sm:$0x1]  ;;  %v794_v51 = vsel %vm6114_vm4, 0, %v793_v49 }
  0x26   : > { %5294 = vmatmul.mubr.bf16.vlgmr.msra.gmra.mrb[0].mxu0 %v5839_v9  ;;  %v5879_v9 = vld [vmem:[%s7499_s3 + $0xf8] sm:$0xff]   ;;  %v844_v52 = vsel %vm6102_vm2, 0, %v843_v50  ;;  %795 = vst [vmem:[#allocation2 + $0xf0] sm:$0x1] %v794_v51  ;;  %v6232_v33 = vld [vmem:[%s7498_s2] ss:$0 sm:$0xff] }
  0x27   : > { %5297 = vmatprep.mubr.bf16.mxu0 %v5840_v11  ;;  %5326 = vmatpush3.bf16.msra.mxu0 %v5854_v10  ;;  %v822_v10 = vld [vmem:[#allocation2 + $0x88] sm:$0x1]  ;;  %845 = vst [vmem:[#allocation2 + $0xf8] sm:$0x1] %v844_v52 }
  0x28   : > { %5327 = vmatprep.subr.bf16.mxu0 %v5855_v12  ;;  %4836 = vmatpush3.bf16.msra.mxu1 %v5879_v9  ;;  %v823_v11 = vsel %vm6102_vm2, 0, %v822_v10  ;;  %v1004_v9 = vld [vmem:[#allocation2 + $0x28] sm:$0x1] }
  0x29   : > { %824 = vst [vmem:[#allocation2 + $0x88] sm:$0x1] %v823_v11  ;;  %5093 = vmatprep.subr.bf16.mxu1 %v5894_v53  ;;  %v1016_v46 = vld [vmem:[#allocation2 + $0x48] sm:$0x1]  ;;  %v1010_v53 = vld [vmem:[#allocation2 + $0x38] sm:$0x1] }
  0x2b   : > { %5328 = vmatpush3.bf16.msra.mxu0 %v5855_v12  ;;  %v819_v12 = vld [vmem:[#allocation2 + $0x78] sm:$0x1] }
  0x2c   : > { %5329 = vmatprep.subr.bf16.mxu0 %v5856_v13 }
  0x2e   : > { %5298 = vmatmul.mubr.bf16.gmra.mrb[4].mxu0 %v5841_v14  ;;  %v820_v14 = vsel %vm6102_vm2, 0, %v819_v12 }
  0x2f   : > { %5301 = vmatprep.mubr.bf16.mxu0 %v5842_v15  ;;  %5330 = vmatpush3.bf16.msra.mxu0 %v5856_v13  ;;  %v772_v13 = vld [vmem:[#allocation2 + $0x80] sm:$0x1]  ;;  %821 = vst [vmem:[#allocation2 + $0x78] sm:$0x1] %v820_v14 }
  0x30   : > { %5331 = vmatprep.subr.bf16.mxu0 %v5857_v16  ;;  %v773_v15 = vsel %vm6114_vm4, 0, %v772_v13 }
  0x31   : > { %774 = vst [vmem:[#allocation2 + $0x80] sm:$0x1] %v773_v15  ;;  %v998_v15 = vld [vmem:[#allocation2 + $0x18] sm:$0x1] }
  0x33   : > { %5332 = vmatpush3.bf16.msra.mxu0 %v5857_v16  ;;  %v769_v16 = vld [vmem:[#allocation2 + $0x70] sm:$0x1] }
  0x34   : > { %5333 = vmatprep.subr.bf16.mxu0 %v5858_v17 }
  0x36   : > { %5302 = vmatmul.mubr.bf16.gmra.mrb[8].mxu0 %v5843_v18  ;;  %v828_v18 = vld [vmem:[#allocation2 + $0xa8] sm:$0x1] }
  0x37   : > { %5305 = vmatprep.mubr.bf16.mxu0 %v5844_v19  ;;  %5334 = vmatpush3.bf16.msra.mxu0 %v5858_v17  ;;  %v770_v17 = vsel %vm6114_vm4, 0, %v769_v16  ;;  %v829_v19 = vsel %vm6102_vm2, 0, %v828_v18 }
  0x38   : > { %5335 = vmatprep.subr.bf16.mxu0 %v5861_v56  ;;  %771 = vst [vmem:[#allocation2 + $0x70] sm:$0x1] %v770_v17  ;;  %830 = vst [vmem:[#allocation2 + $0xa8] sm:$0x1] %v829_v19  ;;  %v1001_v19 = vld [vmem:[#allocation2 + $0x20] sm:$0xff] }
  0x3b   : > { %5336 = vmatpush3.bf16.msra.mxu0 %v5861_v56 }
  0x3c   : > { %5337 = vmatprep.subr.bf16.mxu0 %v5866_v60 }
  0x3e   : > { %5306 = vmatmul.mubr.bf16.gmra.mrb[12].mxu0 %v5845_v20  ;;  %v778_v20 = vld [vmem:[#allocation2 + $0xa0] sm:$0x1] }
  0x3f   : > { %5309 = vmatprep.mubr.bf16.mxu0 %v5846_v21  ;;  %5338 = vmatpush3.bf16.msra.mxu0 %v5866_v60  ;;  %v5876_v21 = vld [vmem:[%s7499_s3 + $0x40] sm:$0xff]  }
  0x40   : > { %5339 = vmatprep.subr.bf16.mxu0 %v5871_v7 }
  0x43   : > { %5340 = vmatpush3.bf16.msra.mxu0 %v5871_v7 }
  0x44   : > { %4957 = vmatprep.subr.bf16.mxu0 %v5876_v21 }
  0x46   : > { %5310 = vmatmul.mubr.bf16.gmra.mrb[16].mxu0 %v5847_v22  ;;  %v779_v22 = vsel %vm6114_vm4, 0, %v778_v20 }
  0x47   : > { %5313 = vmatprep.mubr.bf16.mxu0 %v5848_v23  ;;  %780 = vst [vmem:[#allocation2 + $0xa0] sm:$0x1] %v779_v22  ;;  %v825_v23 = vld [vmem:[#allocation2 + $0x98] sm:$0x1] }
  0x4e   : > { %5314 = vmatmul.mubr.bf16.gmra.mrb[20].mxu0 %v5849_v24  ;;  %v826_v24 = vsel %vm6102_vm2, 0, %v825_v23 }
  0x4f   : > { %5317 = vmatprep.mubr.bf16.mxu0 %v5850_v25  ;;  %v775_v25 = vld [vmem:[#allocation2 + $0x90] sm:$0x1]  ;;  %827 = vst [vmem:[#allocation2 + $0x98] sm:$0x1] %v826_v24 }
  0x56   : > { %5318 = vmatmul.mubr.bf16.gmra.mrb[24].mxu0 %v5851_v26  ;;  %v776_v26 = vsel %vm6114_vm4, 0, %v775_v25  ;;  %v995_v25 = vld [vmem:[#allocation2 + $0x10] sm:$0xff] }
  0x57   : > { %5321 = vmatprep.mubr.bf16.mxu0 %v5852_v27  ;;  %777 = vst [vmem:[#allocation2 + $0x90] sm:$0x1] %v776_v26  ;;  %v784_v27 = vld [vmem:[#allocation2 + $0xc0] sm:$0x1] }
  0x58   : > { %v785_v29 = vsel %vm6114_vm4, 0, %v784_v27 }
  0x59   : > { %786 = vst [vmem:[#allocation2 + $0xc0] sm:$0x1] %v785_v29 }
  0x5e   : > { %5322 = vmatmul.mubr.bf16.gmra.mrb[28].mxu0 %v5853_v28  ;;  %v834_v28 = vld [vmem:[#allocation2 + $0xc8] sm:$0x1] }
  0x5f   : > { %v835_v30 = vsel %vm6102_vm2, 0, %v834_v28 }
  0x60   : > { %836 = vst [vmem:[#allocation2 + $0xc8] sm:$0x1] %v835_v30 }
  0xf9   : > { %v5295_v55 = vpop.f32.mrb[0].mxu0 }
  0xfa   : > { %v576_v56 = vadd.f32 %v5295_v55, %v6232_v33  ;;  %v567_v57 = vpop.f32.mrb[1].mxu0 }
  0xfb   : > { %v568_v58 = vadd.f32 %v6232_v33, %v567_v57  ;;  %v5296_v59 = vpop.f32.mrb[2].mxu0 }
  0xfc   : > { %v579_v60 = vadd.f32 %v5296_v59, %v6232_v33  ;;  %v570_v61 = vpop.f32.mrb[3].mxu0  ;;  %v696_v63 = vmax.f32 %v576_v56, 0.0  ;;  %v1013_v59 = vld [vmem:[#allocation2 + $0x40] sm:$0xff] }
  0xfd   : > { %v571_v62 = vadd.f32 %v6232_v33, %v570_v61  ;;  %v694_v1 = vmax.f32 %v568_v58, 0.0 }
  0xfe   : > { %v697_v0 = vmax.f32 %v579_v60, 0.0 }
  0xff   : > { %v695_v2 = vmax.f32 %v571_v62, 0.0 }
 0x100   : > { %v727_v3 = vpack.c.bf16 %v697_v0, %v696_v63 }
 0x101   : > { %v726_v4 = vpack.c.bf16 %v695_v2, %v694_v1  ;;  %v5299_v5 = vpop.f32.mrb[4].mxu0  ;;  %v1007_v2 = vld [vmem:[#allocation2 + $0x30] sm:$0xff] }
 0x102   : > { %v857_v6 = vshrl.u32 %v727_v3, 16  ;;  %v592_v7 = vadd.f32 %v5299_v5, %v6232_v33  ;;  %v583_v8 = vpop.f32.mrb[5].mxu0  ;;  %v860_v14 = vshll.u32 %v727_v3, 16 }
 0x103   : > { %v850_v10 = vshrl.u32 %v726_v4, 16  ;;  %v584_v11 = vadd.f32 %v6232_v33, %v583_v8  ;;  %v5300_v12 = vpop.f32.mrb[6].mxu0  ;;  %v853_v21 = vshll.u32 %v726_v4, 16 }
 0x104   : > { %v859_v13 = vrot.slane %v857_v6, 7  ;;  %v595_v16 = vadd.f32 %v5300_v12, %v6232_v33  ;;  %v586_v17 = vpop.f32.mrb[7].mxu0  ;;  %v700_v26 = vmax.f32 %v592_v7, 0.0 }
 0x105   : > { %v852_v20 = vrot.slane %v850_v10, 7  ;;  %v587_v22 = vadd.f32 %v6232_v33, %v586_v17  ;;  %v698_v30 = vmax.f32 %v584_v11, 0.0 }
 0x106   : > { %v862_v23 = vor.u32 %v860_v14, %v859_v13  ;;  %v1005_v24 = vsel %vm6114_vm4, %v859_v13, %v1004_v9  ;;  %v701_v27 = vmax.f32 %v595_v16, 0.0 }
 0x107   : > { %1006 = vst [vmem:[#allocation2 + $0x28] sm:$0x1] %v1005_v24  ;;  %v855_v28 = vor.u32 %v853_v21, %v852_v20  ;;  %v999_v29 = vsel %vm6114_vm4, %v852_v20, %v998_v15  ;;  %v699_v31 = vmax.f32 %v587_v22, 0.0 }
 0x108   : > { %v6253_v32 = vsel %vm6242_vm6, %v862_v23, %v1001_v19  ;;  %1000 = vst [vmem:[#allocation2 + $0x18] sm:$0x1] %v999_v29  ;;  %v729_v34 = vpack.c.bf16 %v701_v27, %v700_v26 }
 0x109   : > { %1003 = vst [vmem:[#allocation2 + $0x20] sm:$0xff] %v6253_v32  ;;  %v6258_v35 = vsel %vm6242_vm6, %v855_v28, %v995_v25  ;;  %v728_v36 = vpack.c.bf16 %v699_v31, %v698_v30  ;;  %v5303_v37 = vpop.f32.mrb[8].mxu0  ;;  %v1554_v38 = vshrl.u32 %v6253_v32, 16  ;;  %v1556_v40 = vshll.u32 %v6253_v32, 16  ;;  %v1028_v28 = vld [vmem:[#allocation2 + $0x68] sm:$0x1] }
 0x10a   : > { %997 = vst [vmem:[#allocation2 + $0x10] sm:$0xff] %v6258_v35  ;;  %v871_v41 = vshrl.u32 %v729_v34, 16  ;;  %v874_v42 = vshll.u32 %v729_v34, 16  ;;  %v608_v43 = vadd.f32 %v5303_v37, %v6232_v33  ;;  %v599_v44 = vpop.f32.mrb[9].mxu0  ;;  %v1542_v45 = vshrl.u32 %v6258_v35, 16  ;;  %v5878_v37 = vld [vmem:[%s7499_s3] sm:$0xff]  }
 0x10b   : > { %v864_v47 = vshrl.u32 %v728_v36, 16  ;;  %v867_v48 = vshll.u32 %v728_v36, 16  ;;  %v600_v49 = vadd.f32 %v6232_v33, %v599_v44  ;;  %v5304_v50 = vpop.f32.mrb[10].mxu0  ;;  %v1544_v51 = vshll.u32 %v6258_v35, 16 }
 0x10c   : > { %v873_v52 = vrot.slane %v871_v41, 7  ;;  %v704_v55 = vmax.f32 %v608_v43, 0.0  ;;  %v611_v56 = vadd.f32 %v5304_v50, %v6232_v33  ;;  %v602_v57 = vpop.f32.mrb[11].mxu0  ;;  %v1558_v58 = vrot.slane %v1556_v40, 1  ;;  %v1022_v40 = vld [vmem:[#allocation2 + $0x58] sm:$0x1] }
 0x10d   : > { %v866_v60 = vrot.slane %v864_v47, 7  ;;  %v702_v61 = vmax.f32 %v600_v49, 0.0  ;;  %v603_v62 = vadd.f32 %v6232_v33, %v602_v57  ;;  %v1546_v63 = vrot.slane %v1544_v51, 1 }
 0x10e   : > { %v876_v0 = vor.u32 %v874_v42, %v873_v52  ;;  %v1017_v1 = vsel %vm6114_vm4, %v873_v52, %v1016_v46  ;;  %v705_v3 = vmax.f32 %v611_v56, 0.0  ;;  %v6271_v4 = vld [vmem:[#allocation2 + $0x28] sm:$0x1]  ;;  %v6273_v5 = vor.u32 %v1558_v58, %v1554_v38  ;;  %v1025_v46 = vld [vmem:[#allocation2 + $0x60] sm:$0xff] }
 0x10f   : > { %1018 = vst [vmem:[#allocation2 + $0x48] sm:$0x1] %v1017_v1  ;;  %v869_v6 = vor.u32 %v867_v48, %v866_v60  ;;  %v1011_v7 = vsel %vm6114_vm4, %v866_v60, %v1010_v53  ;;  %v703_v8 = vmax.f32 %v603_v62, 0.0  ;;  %v1509_v9 = vld [vmem:[#allocation2 + $0x18] sm:$0x1]  ;;  %v1785_v10 = vrot.slane %v6271_v4, 1 }
 0x110   : > { %v6280_v11 = vsel %vm6242_vm6, %v876_v0, %v1013_v59  ;;  %1012 = vst [vmem:[#allocation2 + $0x38] sm:$0x1] %v1011_v7  ;;  %v731_v12 = vpack.c.bf16 %v705_v3, %v704_v55  ;;  %v1782_v13 = vrot.slane %v1509_v9, 1  ;;  %v1526_v14 = vld [vmem:[#allocation2 + $0x20] sm:$0xfe]  ;;  %v1547_v15 = vor.u32 %v1546_v63, %v1542_v45  ;;  %v5880_v45 = vld [vmem:[%s7499_s3 + $0x48] sm:$0xff]  }
 0x111   : > { %1015 = vst [vmem:[#allocation2 + $0x40] sm:$0xff] %v6280_v11  ;;  %v6285_v16 = vsel %vm6242_vm6, %v869_v6, %v1007_v2  ;;  %v730_v17 = vpack.c.bf16 %v703_v8, %v702_v61  ;;  %v5307_v19 = vpop.f32.mrb[12].mxu0  ;;  %v1525_v20 = vld [vmem:[#allocation2 + $0x10] sm:$0xfe]  ;;  %v1784_v21 = vrot.slane %v1526_v14, 1  ;;  %v1549_v22 = vshll.u32 %v1509_v9, 16 }
 0x112   : > { %1009 = vst [vmem:[#allocation2 + $0x30] sm:$0xff] %v6285_v16  ;;  %v885_v23 = vshrl.u32 %v731_v12, 16  ;;  %v888_v24 = vshll.u32 %v731_v12, 16  ;;  %v624_v25 = vadd.f32 %v5307_v19, %v6232_v33  ;;  %v615_v26 = vpop.f32.mrb[13].mxu0  ;;  %v1781_v27 = vrot.slane %v1525_v20, 1  ;;  %v1019_v53 = vld [vmem:[#allocation2 + $0x50] sm:$0xff] }
 0x113   : > { %v878_v29 = vshrl.u32 %v730_v17, 16  ;;  %v881_v30 = vshll.u32 %v730_v17, 16  ;;  %v616_v31 = vadd.f32 %v6232_v33, %v615_v26  ;;  %v5308_v34 = vpop.f32.mrb[14].mxu0  ;;  %v1786_v36 = vsel %vm1380_vm7, %v1784_v21, %v1785_v10  ;;  %v5895_v58 = vld [vmem:[%s7499_s3 + $0x180] sm:$0xff]   ;;  %v5881_v0 = vld [vmem:[%s7499_s3 + $0x8] sm:$0xff]   ;;  %v5882_v7 = vld [vmem:[%s7499_s3 + $0x50] sm:$0xff]  }
 0x114   : > { %v887_v38 = vrot.slane %v885_v23, 7  ;;  %v708_v41 = vmax.f32 %v624_v25, 0.0  ;;  %v627_v42 = vadd.f32 %v5308_v34, %v6232_v33  ;;  %v618_v43 = vpop.f32.mrb[15].mxu0  ;;  %v1783_v44 = vsel %vm1380_vm7, %v1781_v27, %v1782_v13  ;;  %v5897_v8 = vld [vmem:[%s7499_s3 + $0x1c8] sm:$0xff]  }
 0x115   : > { %v880_v47 = vrot.slane %v878_v29, 7  ;;  %v706_v48 = vmax.f32 %v616_v31, 0.0  ;;  %v619_v49 = vadd.f32 %v6232_v33, %v618_v43  ;;  %5341 = vmatprep.mubr.bf16.mxu0 %v1783_v44  ;;  %v1551_v50 = vrot.slane %v1549_v22, 1  ;;  %v1040_v20 = vld [vmem:[#allocation2 + $0x88] sm:$0x1]  ;;  %v5900_v29 = vld [vmem:[%s7499_s3 + $0x1d0] sm:$0xff]  }
 0x116   : > { %v890_v51 = vor.u32 %v888_v24, %v887_v38  ;;  %v1029_v52 = vsel %vm6114_vm4, %v887_v38, %v1028_v28  ;;  %v709_v55 = vmax.f32 %v627_v42, 0.0  ;;  %5342 = vmatmul.mubr.bf16.vlgmr.msra.gmra.mrb[32].mxu0 %v1786_v36  ;;  %v1561_v56 = vshll.u32 %v6271_v4, 16  ;;  %v6303_v57 = vld [vmem:[#allocation2 + $0x48] sm:$0x1]  ;;  %v1034_v31 = vld [vmem:[#allocation2 + $0x78] sm:$0x1] }
 0x117   : > { %1030 = vst [vmem:[#allocation2 + $0x68] sm:$0x1] %v1029_v52  ;;  %v883_v59 = vor.u32 %v881_v30, %v880_v47  ;;  %v1023_v60 = vsel %vm6114_vm4, %v880_v47, %v1022_v40  ;;  %v707_v61 = vmax.f32 %v619_v49, 0.0  ;;  %4958 = vmatpush3.bf16.msra.mxu0 %v5878_v37  ;;  %v1552_v62 = vsel %vm1139_vm8, %v1547_v15, %v1551_v50  ;;  %v6311_v63 = vld [vmem:[#allocation2 + $0x38] sm:$0x1]  ;;  %v5883_v38 = vld [vmem:[%s7499_s3 + $0x10] sm:$0xff]  }
 0x118   : > { %v6318_v1 = vsel %vm6242_vm6, %v890_v51, %v1025_v46  ;;  %1024 = vst [vmem:[#allocation2 + $0x58] sm:$0x1] %v1023_v60  ;;  %v733_v2 = vpack.c.bf16 %v709_v55, %v708_v41  ;;  %2070 = vmatprep.mubr.bf16.mxu1 %v1552_v62  ;;  %v1563_v3 = vrot.slane %v1561_v56, 1  ;;  %v1788_v4 = vrot.slane %v6311_v63, 1  ;;  %4959 = vmatprep.subr.bf16.mxu0 %v5880_v45  ;;  %v1528_v6 = vld [vmem:[#allocation2 + $0x40] sm:$0xfe] }
 0x119   : > { %1027 = vst [vmem:[#allocation2 + $0x60] sm:$0xff] %v6318_v1  ;;  %v6330_v9 = vsel %vm6242_vm6, %v883_v59, %v1019_v53  ;;  %v732_v10 = vpack.c.bf16 %v707_v61, %v706_v48  ;;  %v5311_v12 = vpop.f32.mrb[16].mxu0  ;;  %2071 = vmatmul.mubr.bf16.vlgmr.msra.gmra.mrb[0].mxu1 %v6258_v35  ;;  %v1527_v13 = vld [vmem:[#allocation2 + $0x30] sm:$0xfe]  ;;  %v1790_v14 = vrot.slane %v1528_v6, 1  ;;  %v1791_v15 = vrot.slane %v6303_v57, 1 }
 0x11a   : > { %1021 = vst [vmem:[#allocation2 + $0x50] sm:$0xff] %v6330_v9  ;;  %v899_v17 = vshrl.u32 %v733_v2, 16  ;;  %v902_v19 = vshll.u32 %v733_v2, 16  ;;  %v640_v21 = vadd.f32 %v5311_v12, %v6232_v33  ;;  %v631_v22 = vpop.f32.mrb[17].mxu0  ;;  %v1564_v23 = vsel %vm1139_vm8, %v6273_v5, %v1563_v3  ;;  %5094 = vmatpush3.bf16.msra.mxu1 %v5895_v58  ;;  %v5898_v35 = vld [vmem:[%s7499_s3 + $0x188] sm:$0xff]   ;;  %v1037_v40 = vld [vmem:[#allocation2 + $0x80] sm:$0xff] }
 0x11b   : > { %v892_v24 = vshrl.u32 %v732_v10, 16  ;;  %v895_v25 = vshll.u32 %v732_v10, 16  ;;  %v632_v26 = vadd.f32 %v6232_v33, %v631_v22  ;;  %v5312_v27 = vpop.f32.mrb[18].mxu0  ;;  %2078 = vmatprep.mubr.bf16.mxu1 %v1564_v23  ;;  %v1787_v28 = vrot.slane %v1527_v13, 1  ;;  %4960 = vmatpush3.bf16.msra.mxu0 %v5881_v0  ;;  %v5884_v45 = vld [vmem:[%s7499_s3 + $0x58] sm:$0xff]   ;;  %v1031_v48 = vld [vmem:[#allocation2 + $0x70] sm:$0xff] }
 0x11c   : > { %v901_v30 = vrot.slane %v899_v17, 7  ;;  %v712_v5 = vmax.f32 %v640_v21, 0.0  ;;  %v643_v34 = vadd.f32 %v5312_v27, %v6232_v33  ;;  %v634_v36 = vpop.f32.mrb[19].mxu0  ;;  %v1792_v37 = vsel %vm1380_vm7, %v1790_v14, %v1791_v15  ;;  %4961 = vmatprep.subr.bf16.mxu0 %v5882_v7  ;;  %5095 = vmatprep.subr.bf16.mxu1 %v5897_v8  ;;  %v5901_v51 = vld [vmem:[%s7499_s3 + $0x190] sm:$0xff]   ;;  %v5903_v59 = vld [vmem:[%s7499_s3 + $0x1d8] sm:$0xff]   ;;  %v5886_v13 = vld [vmem:[%s7499_s3 + $0x60] sm:$0xff]  }
 0x11d   : > { %v894_v41 = vrot.slane %v892_v24, 7  ;;  %v710_v42 = vmax.f32 %v632_v26, 0.0  ;;  %v635_v43 = vadd.f32 %v6232_v33, %v634_v36  ;;  %v1789_v44 = vsel %vm1380_vm7, %v1787_v28, %v1788_v4  ;;  %v5885_v3 = vld [vmem:[%s7499_s3 + $0x18] sm:$0xff]   ;;  %v1052_v6 = vld [vmem:[#allocation2 + $0xa8] sm:$0x1]  ;;  %v5887_v26 = vld [vmem:[%s7499_s3 + $0x20] sm:$0xff]  }
 0x11e   : > { %v904_v46 = vor.u32 %v902_v19, %v901_v30  ;;  %v1041_v47 = vsel %vm6114_vm4, %v901_v30, %v1040_v20  ;;  %v713_v49 = vmax.f32 %v643_v34, 0.0  ;;  %5345 = vmatprep.mubr.bf16.mxu0 %v1789_v44  ;;  %v1566_v50 = vshrl.u32 %v6285_v16, 16  ;;  %5096 = vmatpush3.bf16.msra.mxu1 %v5898_v35  ;;  %v1046_v17 = vld [vmem:[#allocation2 + $0x98] sm:$0x1]  ;;  %v5906_v27 = vld [vmem:[%s7499_s3 + $0x1e0] sm:$0xff]  }
 0x11f   : > { %1042 = vst [vmem:[#allocation2 + $0x88] sm:$0x1] %v1041_v47  ;;  %v897_v52 = vor.u32 %v895_v25, %v894_v41  ;;  %v1035_v53 = vsel %vm6114_vm4, %v894_v41, %v1034_v31  ;;  %v711_v55 = vmax.f32 %v635_v43, 0.0  ;;  %5346 = vmatmul.mubr.bf16.gmra.mrb[36].mxu0 %v1792_v37  ;;  %v1568_v56 = vshll.u32 %v6285_v16, 16  ;;  %v6364_v58 = vld [vmem:[#allocation2 + $0x58] sm:$0x1]  ;;  %5097 = vmatprep.subr.bf16.mxu1 %v5900_v29 }
 0x120   : > { %v6371_v60 = vsel %vm6242_vm6, %v904_v46, %v1037_v40  ;;  %1036 = vst [vmem:[#allocation2 + $0x78] sm:$0x1] %v1035_v53  ;;  %v735_v61 = vpack.c.bf16 %v713_v49, %v712_v5  ;;  %v1573_v62 = vshll.u32 %v6311_v63, 16  ;;  %v1794_v0 = vrot.slane %v6364_v58, 1  ;;  %v6375_v2 = vld [vmem:[#allocation2 + $0x60] sm:$0xfe]  ;;  %4962 = vmatpush3.bf16.msra.mxu0 %v5883_v38 }
 0x121   : > { %1039 = vst [vmem:[#allocation2 + $0x80] sm:$0xff] %v6371_v60  ;;  %v6383_v4 = vsel %vm6242_vm6, %v897_v52, %v1031_v48  ;;  %v734_v7 = vpack.c.bf16 %v711_v55, %v710_v42  ;;  %v5315_v8 = vpop.f32.mrb[20].mxu0  ;;  %2079 = vmatmul.mubr.bf16.gmra.mrb[4].mxu1 %v6253_v32  ;;  %v1570_v63 = vrot.slane %v1568_v56, 1  ;;  %v1529_v10 = vld [vmem:[#allocation2 + $0x50] sm:$0xfe]  ;;  %v1796_v12 = vrot.slane %v6375_v2, 1  ;;  %4963 = vmatprep.subr.bf16.mxu0 %v5884_v45 }
 0x122   : > { %1033 = vst [vmem:[#allocation2 + $0x70] sm:$0xff] %v6383_v4  ;;  %v913_v14 = vshrl.u32 %v735_v61, 16  ;;  %v916_v15 = vshll.u32 %v735_v61, 16  ;;  %v656_v19 = vadd.f32 %v5315_v8, %v6232_v33  ;;  %v647_v20 = vpop.f32.mrb[21].mxu0  ;;  %v1575_v21 = vrot.slane %v1573_v62, 1  ;;  %5098 = vmatpush3.bf16.msra.mxu1 %v5901_v51  ;;  %v5904_v32 = vld [vmem:[%s7499_s3 + $0x198] sm:$0xff]  }
 0x123   : > { %v906_v22 = vshrl.u32 %v734_v7, 16  ;;  %v909_v23 = vshll.u32 %v734_v7, 16  ;;  %v648_v35 = vadd.f32 %v6232_v33, %v647_v20  ;;  %v5316_v24 = vpop.f32.mrb[22].mxu0  ;;  %v1571_v25 = vor.u32 %v1570_v63, %v1566_v50  ;;  %5099 = vmatprep.subr.bf16.mxu1 %v5903_v59  ;;  %v6403_v34 = vld [vmem:[#allocation2 + $0x68] sm:$0x1]  ;;  %v1049_v36 = vld [vmem:[#allocation2 + $0xa0] sm:$0xff] }
 0x124   : > { %v915_v28 = vrot.slane %v913_v14, 7  ;;  %v716_v29 = vmax.f32 %v656_v19, 0.0  ;;  %v659_v30 = vadd.f32 %v5316_v24, %v6232_v33  ;;  %v650_v31 = vpop.f32.mrb[23].mxu0  ;;  %v1793_v5 = vrot.slane %v1529_v10, 1  ;;  %4964 = vmatpush3.bf16.msra.mxu0 %v5885_v3  ;;  %v5888_v42 = vld [vmem:[%s7499_s3 + $0x68] sm:$0xff]   ;;  %v1043_v45 = vld [vmem:[#allocation2 + $0x90] sm:$0xff] }
 0x125   : > { %v908_v37 = vrot.slane %v906_v22, 7  ;;  %v714_v38 = vmax.f32 %v648_v35, 0.0  ;;  %v1576_v40 = vsel %vm1139_vm8, %v1571_v25, %v1575_v21  ;;  %v651_v41 = vadd.f32 %v6232_v33, %v650_v31  ;;  %4965 = vmatprep.subr.bf16.mxu0 %v5886_v13  ;;  %v5907_v48 = vld [vmem:[%s7499_s3 + $0x1a0] sm:$0xff]   ;;  %v5908_v53 = vld [vmem:[%s7499_s3 + $0x1e8] sm:$0xff]   ;;  %v5890_v63 = vld [vmem:[%s7499_s3 + $0x70] sm:$0xff]  }
 0x126   : > { %v918_v43 = vor.u32 %v916_v15, %v915_v28  ;;  %v1053_v44 = vsel %vm6114_vm4, %v915_v28, %v1052_v6  ;;  %v717_v46 = vmax.f32 %v659_v30, 0.0  ;;  %2086 = vmatprep.mubr.bf16.mxu1 %v1576_v40  ;;  %v1795_v47 = vsel %vm1380_vm7, %v1793_v5, %v1794_v0  ;;  %5100 = vmatpush3.bf16.msra.mxu1 %v5904_v32  ;;  %v5889_v62 = vld [vmem:[%s7499_s3 + $0x28] sm:$0xff]   ;;  %v5910_v13 = vld [vmem:[%s7499_s3 + $0x1f0] sm:$0xff]   ;;  %v1061_v20 = vld [vmem:[#allocation2 + $0xc0] sm:$0xff] }
 0x127   : > { %1054 = vst [vmem:[#allocation2 + $0xa8] sm:$0x1] %v1053_v44  ;;  %v911_v49 = vor.u32 %v909_v23, %v908_v37  ;;  %v1047_v50 = vsel %vm6114_vm4, %v908_v37, %v1046_v17  ;;  %v715_v51 = vmax.f32 %v651_v41, 0.0  ;;  %5349 = vmatprep.mubr.bf16.mxu0 %v1795_v47  ;;  %v1797_v52 = vrot.slane %v6403_v34, 1  ;;  %5101 = vmatprep.subr.bf16.mxu1 %v5906_v27  ;;  %v1064_v2 = vld [vmem:[#allocation2 + $0xc8] sm:$0x1] }
 0x128   : > { %v6424_v55 = vsel %vm6242_vm6, %v918_v43, %v1049_v36  ;;  %1048 = vst [vmem:[#allocation2 + $0x98] sm:$0x1] %v1047_v50  ;;  %v737_v56 = vpack.c.bf16 %v717_v46, %v716_v29  ;;  %v1578_v59 = vshrl.u32 %v6280_v11, 16  ;;  %v1580_v61 = vshll.u32 %v6280_v11, 16  ;;  %4966 = vmatpush3.bf16.msra.mxu0 %v5887_v26  ;;  %v5909_v10 = vld [vmem:[%s7499_s3 + $0x1a8] sm:$0xff]   ;;  %v5891_v31 = vld [vmem:[%s7499_s3 + $0x30] sm:$0xff]  }
 0x129   : > { %1051 = vst [vmem:[#allocation2 + $0xa0] sm:$0xff] %v6424_v55  ;;  %v6434_v0 = vsel %vm6242_vm6, %v911_v49, %v1043_v45  ;;  %v736_v3 = vpack.c.bf16 %v715_v51, %v714_v38  ;;  %v1798_v6 = vsel %vm1380_vm7, %v1796_v12, %v1797_v52  ;;  %v5319_v7 = vpop.f32.mrb[24].mxu0  ;;  %2087 = vmatmul.mubr.bf16.gmra.mrb[8].mxu1 %v6285_v16  ;;  %v1585_v8 = vshll.u32 %v6303_v57, 16  ;;  %v1058_v16 = vld [vmem:[#allocation2 + $0xb8] sm:$0x1]  ;;  %v1055_v44 = vld [vmem:[#allocation2 + $0xb0] sm:$0xff] }
 0x12a   : > { %4967 = vmatprep.subr.bf16.mxu0 %v5888_v42  ;;  %1045 = vst [vmem:[#allocation2 + $0x90] sm:$0xff] %v6434_v0  ;;  %v927_v12 = vshrl.u32 %v737_v56, 16  ;;  %v930_v14 = vshll.u32 %v737_v56, 16  ;;  %5350 = vmatmul.mubr.bf16.gmra.mrb[40].mxu0 %v1798_v6  ;;  %v672_v57 = vadd.f32 %v5319_v7, %v6232_v33  ;;  %v663_v15 = vpop.f32.mrb[25].mxu0  ;;  %v1582_v17 = vrot.slane %v1580_v61, 1  ;;  %v5892_v41 = vld [vmem:[%s7499_s3 + $0x78] sm:$0xff]  }
 0x12b   : > { %v1531_v19 = vld [vmem:[#allocation2 + $0x70] sm:$0xfe]  ;;  %5102 = vmatpush3.bf16.msra.mxu1 %v5907_v48  ;;  %v920_v21 = vshrl.u32 %v736_v3, 16  ;;  %v923_v32 = vshll.u32 %v736_v3, 16  ;;  %v664_v22 = vadd.f32 %v6232_v33, %v663_v15  ;;  %v5320_v23 = vpop.f32.mrb[26].mxu0  ;;  %v1587_v35 = vrot.slane %v1585_v8, 1 }
 0x12c   : > { %v6451_v24 = vld [vmem:[#allocation2 + $0x88] sm:$0x1]  ;;  %5103 = vmatprep.subr.bf16.mxu1 %v5908_v53  ;;  %v929_v25 = vrot.slane %v927_v12, 7  ;;  %v720_v26 = vmax.f32 %v672_v57, 0.0  ;;  %v675_v27 = vadd.f32 %v5320_v23, %v6232_v33  ;;  %v1583_v28 = vor.u32 %v1582_v17, %v1578_v59  ;;  %v666_v29 = vpop.f32.mrb[27].mxu0  ;;  %4968 = vmatpush3.bf16.msra.mxu0 %v5889_v62  ;;  %v5911_v47 = vld [vmem:[%s7499_s3 + $0x1b0] sm:$0xff]  }
 0x12d   : > { %v6454_v30 = vld [vmem:[#allocation2 + $0x78] sm:$0x1]  ;;  %v922_v5 = vrot.slane %v920_v21, 7  ;;  %v718_v36 = vmax.f32 %v664_v22, 0.0  ;;  %v667_v37 = vadd.f32 %v6232_v33, %v666_v29  ;;  %v1799_v38 = vrot.slane %v1531_v19, 1  ;;  %4969 = vmatprep.subr.bf16.mxu0 %v5890_v63  ;;  %v6494_v63 = vld [vmem:[%s7499_s3 + $0x80] sm:$0xff]  }
 0x12e   : > { %v1532_v40 = vld [vmem:[#allocation2 + $0x80] sm:$0xfe]  ;;  %v932_v42 = vor.u32 %v930_v14, %v929_v25  ;;  %v1065_v43 = vsel %vm6114_vm4, %v929_v25, %v1064_v2  ;;  %v721_v45 = vmax.f32 %v675_v27, 0.0  ;;  %v1588_v46 = vsel %vm1139_vm8, %v1583_v28, %v1587_v35  ;;  %v5913_v52 = vld [vmem:[%s7499_s3 + $0x1f8] sm:$0xff]   ;;  %v1076_v12 = vld [vmem:[#allocation2 + $0xe8] sm:$0x1] }
 0x12f   : > { %5104 = vmatpush3.bf16.msra.mxu1 %v5909_v10  ;;  %1066 = vst [vmem:[#allocation2 + $0xc8] sm:$0x1] %v1065_v43  ;;  %v925_v48 = vor.u32 %v923_v32, %v922_v5  ;;  %v1059_v49 = vsel %vm6114_vm4, %v922_v5, %v1058_v16  ;;  %2094 = vmatprep.mubr.bf16.mxu1 %v1588_v46  ;;  %v719_v50 = vmax.f32 %v667_v37, 0.0  ;;  %v1800_v51 = vrot.slane %v6454_v30, 1  ;;  %v5893_v62 = vld [vmem:[%s7499_s3 + $0x38] sm:$0xff]   ;;  %v1073_v28 = vld [vmem:[#allocation2 + $0xe0] sm:$0xff] }
 0x130   : > { %5105 = vmatprep.subr.bf16.mxu1 %v5910_v13  ;;  %v6477_v53 = vsel %vm6242_vm6, %v932_v42, %v1061_v20  ;;  %1060 = vst [vmem:[#allocation2 + $0xb8] sm:$0x1] %v1059_v49  ;;  %v739_v56 = vpack.c.bf16 %v721_v45, %v720_v26  ;;  %v1802_v59 = vrot.slane %v1532_v40, 1  ;;  %v1803_v61 = vrot.slane %v6451_v24, 1  ;;  %4970 = vmatpush3.bf16.msra.mxu0 %v5891_v31  ;;  %v1070_v19 = vld [vmem:[#allocation2 + $0xd8] sm:$0x1] }
 0x131   : > { %1063 = vst [vmem:[#allocation2 + $0xc0] sm:$0xff] %v6477_v53  ;;  %v6486_v2 = vsel %vm6242_vm6, %v925_v48, %v1055_v44  ;;  %v738_v3 = vpack.c.bf16 %v719_v50, %v718_v36  ;;  %v1801_v6 = vsel %vm1380_vm7, %v1799_v38, %v1800_v51  ;;  %v5323_v7 = vpop.f32.mrb[28].mxu0  ;;  %2095 = vmatmul.mubr.bf16.gmra.mrb[12].mxu1 %v6280_v11  ;;  %v1590_v8 = vshrl.u32 %v6330_v9, 16  ;;  %v5914_v11 = vld [vmem:[%s7499_s3 + $0x1b8] sm:$0xff]   ;;  %v1533_v37 = vld [vmem:[#allocation2 + $0x90] sm:$0xfe] }
 0x132   : > { %4971 = vmatprep.subr.bf16.mxu0 %v5892_v41  ;;  %1057 = vst [vmem:[#allocation2 + $0xb0] sm:$0xff] %v6486_v2  ;;  %v941_v10 = vshrl.u32 %v739_v56, 16  ;;  %v944_v13 = vshll.u32 %v739_v56, 16  ;;  %5353 = vmatprep.mubr.bf16.mxu0 %v1801_v6  ;;  %v1804_v14 = vsel %vm1380_vm7, %v1802_v59, %v1803_v61  ;;  %v688_v16 = vadd.f32 %v5323_v7, %v6232_v33  ;;  %v679_v57 = vpop.f32.mrb[29].mxu0  ;;  %v6506_v27 = vld [vmem:[#allocation2 + $0x98] sm:$0x1] }
 0x133   : > { %5106 = vmatpush3.bf16.msra.mxu1 %v5911_v47  ;;  %v934_v15 = vshrl.u32 %v738_v3, 16  ;;  %v937_v17 = vshll.u32 %v738_v3, 16  ;;  %5354 = vmatmul.mubr.bf16.gmra.mrb[44].mxu0 %v1804_v14  ;;  %v680_v20 = vadd.f32 %v6232_v33, %v679_v57  ;;  %v5324_v21 = vpop.f32.mrb[30].mxu0  ;;  %v1592_v32 = vshll.u32 %v6330_v9, 16  ;;  %v1067_v41 = vld [vmem:[#allocation2 + $0xd0] sm:$0xff] }
 0x134   : > { %5107 = vmatprep.subr.bf16.mxu1 %v5913_v52  ;;  %v943_v22 = vrot.slane %v941_v10, 7  ;;  %v724_v23 = vmax.f32 %v688_v16, 0.0  ;;  %v691_v35 = vadd.f32 %v5324_v21, %v6232_v33  ;;  %v1597_v25 = vshll.u32 %v6364_v58, 16  ;;  %v682_v26 = vpop.f32.mrb[31].mxu0  ;;  %4972 = vmatpush3.bf16.msra.mxu0 %v5893_v62  ;;  %v1534_v43 = vld [vmem:[#allocation2 + $0xa0] sm:$0xfe] }
 0x135   : > { %v936_v29 = vrot.slane %v934_v15, 7  ;;  %v722_v31 = vmax.f32 %v680_v20, 0.0  ;;  %v1594_v5 = vrot.slane %v1592_v32, 1  ;;  %v683_v36 = vadd.f32 %v6232_v33, %v682_v26  ;;  %5373 = vmatprep.subr.bf16.mxu0 %v6494_v63  ;;  %v6514_v33 = vld [vmem:[#allocation2 + $0xa8] sm:$0x1]  ;;  %v1079_v26 = vld [vmem:[#allocation2 + $0xf0] sm:$0xff] }
 0x136   : > { %v946_v38 = vor.u32 %v944_v13, %v943_v22  ;;  %v1077_v40 = vsel %vm6114_vm4, %v943_v22, %v1076_v12  ;;  %v725_v42 = vmax.f32 %v691_v35, 0.0  ;;  %v1599_v58 = vrot.slane %v1597_v25, 1  ;;  %v1088_v13 = vld [vmem:[#allocation2 + $0x108] sm:$0x1]  ;;  %v1082_v15 = vld [vmem:[#allocation2 + $0xf8] sm:$0x1] }
 0x137   : > { %5108 = vmatpush3.bf16.msra.mxu1 %v5914_v11  ;;  %1078 = vst [vmem:[#allocation2 + $0xe8] sm:$0x1] %v1077_v40  ;;  %v939_v44 = vor.u32 %v937_v17, %v936_v29  ;;  %v1071_v45 = vsel %vm6114_vm4, %v936_v29, %v1070_v19  ;;  %v1595_v46 = vor.u32 %v1594_v5, %v1590_v8  ;;  %v723_v47 = vmax.f32 %v683_v36, 0.0  ;;  %v6530_v8 = vld [vmem:[#allocation2 + $0xb8] sm:$0x1]  ;;  %v1085_v11 = vld [vmem:[#allocation2 + $0x100] sm:$0xff] }
 0x138   : > { %v6518_v48 = vsel %vm6242_vm6, %v946_v38, %v1073_v28  ;;  %1072 = vst [vmem:[#allocation2 + $0xd8] sm:$0x1] %v1071_v45  ;;  %v741_v49 = vpack.c.bf16 %v725_v42, %v724_v23  ;;  %v1805_v50 = vrot.slane %v1533_v37, 1  ;;  %v1806_v51 = vrot.slane %v6506_v27, 1  ;;  %v1536_v35 = vld [vmem:[#allocation2 + $0xc0] sm:$0xfe] }
 0x139   : > { %1075 = vst [vmem:[#allocation2 + $0xe0] sm:$0xff] %v6518_v48  ;;  %v6524_v52 = vsel %vm6242_vm6, %v939_v44, %v1067_v41  ;;  %v1600_v56 = vsel %vm1139_vm8, %v1595_v46, %v1599_v58  ;;  %v740_v59 = vpack.c.bf16 %v723_v47, %v722_v31  ;;  %v1808_v61 = vrot.slane %v1534_v43, 1  ;;  %v1535_v62 = vld [vmem:[#allocation2 + $0xb0] sm:$0xfe]  ;;  %v6540_v29 = vld [vmem:[#allocation2 + $0xc8] sm:$0x1] }
 0x13a   : > { %1069 = vst [vmem:[#allocation2 + $0xd0] sm:$0xff] %v6524_v52  ;;  %v955_v3 = vshrl.u32 %v741_v49, 16  ;;  %2102 = vmatprep.mubr.bf16.mxu1 %v1600_v56  ;;  %v1807_v6 = vsel %vm1380_vm7, %v1805_v50, %v1806_v51  ;;  %v1809_v7 = vrot.slane %v6514_v33, 1  ;;  %v958_v10 = vshll.u32 %v741_v49, 16 }
 0x13b   : > { %v948_v12 = vshrl.u32 %v740_v59, 16  ;;  %v951_v14 = vshll.u32 %v740_v59, 16  ;;  %5357 = vmatprep.mubr.bf16.mxu0 %v1807_v6  ;;  %2103 = vmatmul.mubr.bf16.gmra.mrb[16].mxu1 %v6330_v9  ;;  %v1604_v16 = vshll.u32 %v6318_v1, 16  ;;  %v1609_v19 = vshll.u32 %v6403_v34, 16 }
 0x13c   : > { %v957_v57 = vrot.slane %v955_v3, 7  ;;  %v1810_v17 = vsel %vm1380_vm7, %v1808_v61, %v1809_v7  ;;  %v1811_v20 = vrot.slane %v1535_v62, 1  ;;  %v1602_v32 = vshrl.u32 %v6318_v1, 16 }
 0x13d   : > { %v950_v21 = vrot.slane %v948_v12, 7  ;;  %5358 = vmatmul.mubr.bf16.gmra.mrb[48].mxu0 %v1810_v17  ;;  %v1606_v22 = vrot.slane %v1604_v16, 1  ;;  %v1812_v23 = vrot.slane %v6530_v8, 1  ;;  %v1611_v28 = vrot.slane %v1609_v19, 1 }
 0x13e   : > { %v960_v25 = vor.u32 %v958_v10, %v957_v57  ;;  %v1089_v9 = vsel %vm6114_vm4, %v957_v57, %v1088_v13  ;;  %v1814_v40 = vrot.slane %v1536_v35, 1  ;;  %v1616_v41 = vshll.u32 %v6383_v4, 16  ;;  %v6569_v6 = vld [vmem:[#allocation2 + $0xe8] sm:$0x1] }
 0x13f   : > { %1090 = vst [vmem:[#allocation2 + $0x108] sm:$0x1] %v1089_v9  ;;  %v953_v31 = vor.u32 %v951_v14, %v950_v21  ;;  %v1083_v34 = vsel %vm6114_vm4, %v950_v21, %v1082_v15  ;;  %v1607_v5 = vor.u32 %v1606_v22, %v1602_v32  ;;  %v1813_v36 = vsel %vm1380_vm7, %v1811_v20, %v1812_v23  ;;  %v6545_v37 = vld [vmem:[#allocation2 + $0xd8] sm:$0x1]  ;;  %v6574_v13 = vld [vmem:[#allocation2 + $0x8] sm:$0x1] }
 0x140   : > { %v6549_v38 = vsel %vm6242_vm6, %v960_v25, %v1085_v11  ;;  %1084 = vst [vmem:[#allocation2 + $0xf8] sm:$0x1] %v1083_v34  ;;  %5361 = vmatprep.mubr.bf16.mxu0 %v1813_v36  ;;  %v1815_v58 = vrot.slane %v6540_v29, 1  ;;  %v1621_v43 = vshll.u32 %v6454_v30, 16  ;;  %v1614_v45 = vshrl.u32 %v6383_v4, 16  ;;  %v6586_v25 = vld [vmem:[#allocation2 + $0x10] sm:$0xff] }
 0x141   : > { %1087 = vst [vmem:[#allocation2 + $0x100] sm:$0xff] %v6549_v38  ;;  %v6555_v39 = vsel %vm6242_vm6, %v953_v31, %v1079_v26  ;;  %v1612_v42 = vsel %vm1139_vm8, %v1607_v5, %v1611_v28  ;;  %v1537_v44 = vld [vmem:[#allocation2 + $0xd0] sm:$0xfe]  ;;  %v1618_v46 = vrot.slane %v1616_v41, 1  ;;  %v1818_v49 = vrot.slane %v6545_v37, 1 }
 0x142   : > { %1081 = vst [vmem:[#allocation2 + $0xf0] sm:$0xff] %v6555_v39  ;;  %2110 = vmatprep.mubr.bf16.mxu1 %v1612_v42  ;;  %v1817_v47 = vrot.slane %v1537_v44, 1  ;;  %v1623_v18 = vrot.slane %v1621_v43, 1  ;;  %v1628_v50 = vshll.u32 %v6371_v60, 16  ;;  %v1633_v51 = vshll.u32 %v6451_v24, 16 }
 0x143   : > { %2111 = vmatmul.mubr.bf16.gmra.mrb[20].mxu1 %v6318_v1  ;;  %v1816_v56 = vsel %vm1380_vm7, %v1814_v40, %v1815_v58  ;;  %v1619_v30 = vor.u32 %v1618_v46, %v1614_v45  ;;  %v1538_v61 = vld [vmem:[#allocation2 + $0xe0] sm:$0xfe]  ;;  %v1626_v1 = vshrl.u32 %v6371_v60, 16  ;;  %v1640_v16 = vshll.u32 %v6434_v0, 16  ;;  %v6599_v58 = vld [vmem:[#allocation2 + $0x18] sm:$0x1] }
 0x144   : > { %v1819_v59 = vsel %vm1380_vm7, %v1817_v47, %v1818_v49  ;;  %v1630_v62 = vrot.slane %v1628_v50, 1  ;;  %v1635_v7 = vrot.slane %v1633_v51, 1  ;;  %v1820_v24 = vrot.slane %v1538_v61, 1  ;;  %v6601_v45 = vld [vmem:[#allocation2 + $0x20] sm:$0xff]  ;;  %v5899_v61 = vld [vmem:[%s7499_s3 + $0x88] sm:$0xff]  }
 0x145   : > { %5362 = vmatmul.mubr.bf16.gmra.mrb[52].mxu0 %v1816_v56  ;;  %v1624_v3 = vsel %vm1139_vm8, %v1619_v30, %v1623_v18  ;;  %v1821_v57 = vrot.slane %v6569_v6, 1  ;;  %v1645_v19 = vshll.u32 %v6506_v27, 16  ;;  %v1145_v20 = vrot.slane %v5967_v54, 1 }
 0x146   : > { %5365 = vmatprep.mubr.bf16.mxu0 %v1819_v59  ;;  %2118 = vmatprep.mubr.bf16.mxu1 %v1624_v3  ;;  %v1631_v12 = vor.u32 %v1630_v62, %v1626_v1  ;;  %v1148_v21 = vshll.u32 %v6574_v13, 16  ;;  %v1642_v35 = vrot.slane %v1640_v16, 1  ;;  %v1638_v9 = vshrl.u32 %v6434_v0, 16  ;;  %v6614_v62 = vld [vmem:[#allocation2 + $0x28] sm:$0x1]  ;;  %v6616_v3 = vld [vmem:[#allocation2] sm:$0xff] }
 0x147   : > { %v6572_v10 = vld [vmem:[#allocation2 + $0xf8] sm:$0x1]  ;;  %v1822_v32 = vsel %vm1380_vm7, %v1820_v24, %v1821_v57  ;;  %v1647_v27 = vrot.slane %v1645_v19, 1  ;;  %v1155_v31 = vshll.u32 %v6586_v25, 16  ;;  %v1652_v34 = vshll.u32 %v6424_v55, 16  ;;  %v5902_v57 = vld [vmem:[%s7499_s3 + $0x90] sm:$0xff]  }
 0x148   : > { %v1824_v15 = vrot.slane %v6572_v10, 1  ;;  %v1636_v17 = vsel %vm1139_vm8, %v1631_v12, %v1635_v7  ;;  %v1540_v23 = vld [vmem:[#allocation2 + $0x100] sm:$0xfe]  ;;  %v1150_v26 = vrot.slane %v1148_v21, 1  ;;  %v1643_v28 = vor.u32 %v1642_v35, %v1638_v9 }
 0x149   : > { %v1539_v14 = vld [vmem:[#allocation2 + $0xf0] sm:$0xfe]  ;;  %v1826_v54 = vrot.slane %v1540_v23, 1  ;;  %v1657_v41 = vshll.u32 %v6514_v33, 16  ;;  %v1157_v43 = vrot.slane %v1155_v31, 1  ;;  %v1654_v44 = vrot.slane %v1652_v34, 1 }
 0x14a   : > { %v1823_v11 = vrot.slane %v1539_v14, 1  ;;  %v1648_v36 = vsel %vm1139_vm8, %v1643_v28, %v1647_v27  ;;  %v1151_v40 = vsel %vm1139_vm8, %v1145_v20, %v1150_v26  ;;  %v1153_v46 = vshrl.u32 %v6586_v25, 16 }
 0x14b   : > { %2119 = vmatmul.mubr.bf16.gmra.mrb[24].mxu1 %v6383_v4  ;;  %v6588_v4 = vld [vmem:[#allocation2 + $0x108] sm:$0x1]  ;;  %v1650_v47 = vshrl.u32 %v6424_v55, 16  ;;  %v1659_v49 = vrot.slane %v1657_v41, 1  ;;  %v1167_v50 = vshll.u32 %v6601_v45, 16  ;;  %v1664_v51 = vshll.u32 %v6486_v2, 16 }
 0x14c   : > { %2126 = vmatprep.mubr.bf16.mxu1 %v1636_v17  ;;  %v1825_v22 = vsel %vm1380_vm7, %v1823_v11, %v1824_v15  ;;  %v1827_v5 = vrot.slane %v6588_v4, 1  ;;  %v1158_v18 = vor.u32 %v1157_v43, %v1153_v46  ;;  %v1669_v59 = vshll.u32 %v6530_v8, 16  ;;  %v6662_v43 = vld [vmem:[#allocation2 + $0x48] sm:$0x1] }
 0x14d   : > { %5366 = vmatmul.mubr.bf16.gmra.mrb[56].mxu0 %v1822_v32  ;;  %v1655_v33 = vor.u32 %v1654_v44, %v1650_v47  ;;  %v1169_v7 = vrot.slane %v1167_v50, 1  ;;  %v1666_v24 = vrot.slane %v1664_v51, 1  ;;  %v1165_v8 = vshrl.u32 %v6601_v45, 16  ;;  %v5905_v32 = vld [vmem:[%s7499_s3 + $0x98] sm:$0xff]  }
 0x14e   : > { %5369 = vmatprep.mubr.bf16.mxu0 %v1825_v22  ;;  %v1828_v42 = vsel %vm1380_vm7, %v1826_v54, %v1827_v5  ;;  %v1172_v12 = vshll.u32 %v6614_v62, 16  ;;  %v1662_v14 = vshrl.u32 %v6486_v2, 16  ;;  %v1671_v16 = vrot.slane %v1669_v59, 1  ;;  %v6639_v22 = vld [vmem:[#allocation2 + $0x38] sm:$0x1] }
 0x14f   : > { %v1660_v30 = vsel %vm1139_vm8, %v1655_v33, %v1659_v49  ;;  %v6629_v11 = vor.u32 %v1169_v7, %v1165_v8  ;;  %v1676_v17 = vshll.u32 %v6477_v53, 16  ;;  %v1681_v21 = vshll.u32 %v6540_v29, 16  ;;  %v5916_v33 = vld [vmem:[%s7499_s3 + $0xb0] sm:$0xff]   ;;  %v5917_v7 = vld [vmem:[%s7499_s3 + $0xb8] sm:$0xff]  }
 0x150   : > { %v1667_v15 = vor.u32 %v1666_v24, %v1662_v14  ;;  %v1174_v19 = vrot.slane %v1172_v12, 1  ;;  %v1184_v27 = vshll.u32 %v6639_v22, 16  ;;  %v1674_v26 = vshrl.u32 %v6477_v53, 16  ;;  %v6685_v24 = vld [vmem:[#allocation2 + $0x58] sm:$0x1] }
 0x151   : > { %v1678_v9 = vrot.slane %v1676_v17, 1  ;;  %v1683_v54 = vrot.slane %v1681_v21, 1  ;;  %v1688_v5 = vshll.u32 %v6524_v52, 16  ;;  %v1693_v41 = vshll.u32 %v6545_v37, 16 }
 0x152   : > { %v1672_v20 = vsel %vm1139_vm8, %v1667_v15, %v1671_v16  ;;  %v1175_v23 = vsel %vm1139_vm8, %v6629_v11, %v1174_v19  ;;  %v1196_v47 = vshll.u32 %v6662_v43, 16  ;;  %v1686_v49 = vshrl.u32 %v6524_v52, 16 }
 0x153   : > { %2127 = vmatmul.mubr.bf16.gmra.mrb[28].mxu1 %v6371_v60  ;;  %v1160_v60 = vshll.u32 %v6599_v58, 16  ;;  %v1679_v31 = vor.u32 %v1678_v9, %v1674_v26  ;;  %v1208_v16 = vshll.u32 %v6685_v24, 16  ;;  %v1712_v21 = vshll.u32 %v6555_v39, 16  ;;  %v6708_v9 = vld [vmem:[#allocation2 + $0x68] sm:$0x1] }
 0x154   : > { %2134 = vmatprep.mubr.bf16.mxu1 %v1648_v36  ;;  %v1186_v36 = vrot.slane %v1184_v27, 1  ;;  %v1198_v59 = vrot.slane %v1196_v47, 1 }
 0x155   : > { %5370 = vmatmul.mubr.bf16.gmra.mrb[60].mxu0 %v1828_v42  ;;  %v1162_v56 = vrot.slane %v1160_v60, 1  ;;  %v5915_v42 = vld [vmem:[%s7499_s3 + $0xa8] sm:$0xff]   ;;  %v1690_v60 = vrot.slane %v1688_v5, 1  ;;  %v1714_v26 = vrot.slane %v1712_v21, 1 }
 0x156   : > { %2536 = vmatprep.mubr.bf16.mxu0 %v1151_v40  ;;  %v1684_v40 = vsel %vm1139_vm8, %v1679_v31, %v1683_v54  ;;  %v6713_v54 = vld [vmem:[#allocation2 + $0x70] sm:$0xff] }
 0x157   : > { %v1163_v1 = vsel %vm1139_vm8, %v1158_v18, %v1162_v56  ;;  %v1695_v18 = vrot.slane %v1693_v41, 1  ;;  %v1691_v51 = vor.u32 %v1690_v60, %v1686_v49  ;;  %v6730_v49 = vld [vmem:[#allocation2 + $0x80] sm:$0xff] }
 0x15b   : > { %2135 = vmatmul.mubr.bf16.gmra.mrb[32].mxu1 %v6434_v0  ;;  %v6621_v0 = vld [vmem:[#allocation2 + $0x30] sm:$0xff] }
 0x15c   : > { %2142 = vmatprep.mubr.bf16.mxu1 %v1660_v30  ;;  %v1177_v29 = vshrl.u32 %v6621_v0, 16  ;;  %v1700_v30 = vshll.u32 %v6518_v48, 16 }
 0x15d   : > { %2537 = vmatmul.mubr.bf16.vlgmr.msra.gmra.mrb[64].mxu0 %v6616_v3 }
 0x15e   : > { %5374 = vmatpush3.bf16.msra.mxu0 %v6494_v63  ;;  %2544 = vmatprep.mubr.bf16.mxu0 %v1163_v1  ;;  %v1179_v63 = vshll.u32 %v6621_v0, 16  ;;  %v1705_v1 = vshll.u32 %v6569_v6, 16  ;;  %v1702_v14 = vrot.slane %v1700_v30, 1  ;;  %v1239_v30 = vshll.u32 %v6730_v49, 16 }
 0x15f   : > { %5375 = vmatprep.subr.bf16.mxu0 %v5899_v61 }
 0x160   : > { %v1181_v35 = vrot.slane %v1179_v63, 1  ;;  %v1707_v15 = vrot.slane %v1705_v1, 1  ;;  %v6698_v63 = vld [vmem:[%s7499_s3 + $0x200] sm:$0xff]  }
 0x162   : > { %5376 = vmatpush3.bf16.msra.mxu0 %v5899_v61  ;;  %v6652_v28 = vor.u32 %v1181_v35, %v1177_v29  ;;  %v1696_v61 = vsel %vm1139_vm8, %v1691_v51, %v1695_v18  ;;  %v1717_v35 = vshll.u32 %v6572_v10, 16  ;;  %v1710_v10 = vshrl.u32 %v6555_v39, 16 }
 0x163   : > { %2143 = vmatmul.mubr.bf16.gmra.mrb[36].mxu1 %v6424_v55  ;;  %5377 = vmatprep.subr.bf16.mxu0 %v5902_v57  ;;  %v6644_v55 = vld [vmem:[#allocation2 + $0x40] sm:$0xff]  ;;  %v1225_v18 = vshrl.u32 %v6713_v54, 16 }
 0x164   : > { %2150 = vmatprep.mubr.bf16.mxu1 %v1672_v20  ;;  %v1191_v34 = vshll.u32 %v6644_v55, 16  ;;  %v1187_v44 = vsel %vm1139_vm8, %v6652_v28, %v1186_v36  ;;  %v1189_v37 = vshrl.u32 %v6644_v55, 16  ;;  %v1719_v31 = vrot.slane %v1717_v35, 1 }
 0x165   : > { %2545 = vmatmul.mubr.bf16.gmra.mrb[68].mxu0 %v6586_v25  ;;  %v5912_v25 = vld [vmem:[%s7499_s3 + $0xa0] sm:$0xff]   ;;  %v1715_v5 = vor.u32 %v1714_v26, %v1710_v10  ;;  %v1227_v36 = vshll.u32 %v6713_v54, 16 }
 0x166   : > { %2552 = vmatprep.mubr.bf16.mxu0 %v1175_v23  ;;  %5378 = vmatpush3.bf16.msra.mxu0 %v5902_v57  ;;  %v1193_v46 = vrot.slane %v1191_v34, 1  ;;  %v1698_v57 = vshrl.u32 %v6518_v48, 16  ;;  %v6766_v26 = vld [vmem:[#allocation2 + $0xa0] sm:$0xff] }
 0x167   : > { %5379 = vmatprep.subr.bf16.mxu0 %v5905_v32  ;;  %v1263_v10 = vshll.u32 %v6766_v26, 16 }
 0x168   : > { %v6675_v50 = vor.u32 %v1193_v46, %v1189_v37  ;;  %v1703_v19 = vor.u32 %v1702_v14, %v1698_v57  ;;  %v6725_v46 = vld [vmem:[#allocation2 + $0x78] sm:$0x1]  ;;  %v1229_v37 = vrot.slane %v1227_v36, 1 }
 0x16a   : > { %5380 = vmatpush3.bf16.msra.mxu0 %v5905_v32  ;;  %v1199_v8 = vsel %vm1139_vm8, %v6675_v50, %v1198_v59  ;;  %v1210_v32 = vrot.slane %v1208_v16, 1  ;;  %v1708_v23 = vsel %vm1139_vm8, %v1703_v19, %v1707_v15  ;;  %v6735_v51 = vor.u32 %v1229_v37, %v1225_v18  ;;  %v6738_v59 = vld [vmem:[#allocation2 + $0x28] sm:$0x1] }
 0x16b   : > { %2151 = vmatmul.mubr.bf16.gmra.mrb[40].mxu1 %v6486_v2  ;;  %5381 = vmatprep.subr.bf16.mxu0 %v5912_v25  ;;  %v6667_v2 = vld [vmem:[#allocation2 + $0x50] sm:$0xff]  ;;  %v2883_v14 = vshll.u32 %v6738_v59, 16  ;;  %v1237_v16 = vshrl.u32 %v6730_v49, 16  ;;  %v1261_v37 = vshrl.u32 %v6766_v26, 16 }
 0x16c   : > { %2158 = vmatprep.mubr.bf16.mxu1 %v1684_v40  ;;  %v1203_v56 = vshll.u32 %v6667_v2, 16  ;;  %v1201_v6 = vshrl.u32 %v6667_v2, 16  ;;  %v1724_v40 = vshll.u32 %v6549_v38, 16 }
 0x16d   : > { %2553 = vmatmul.mubr.bf16.gmra.mrb[72].mxu0 %v6601_v45  ;;  %v2885_v15 = vrot.slane %v2883_v14, 1 }
 0x16e   : > { %2560 = vmatprep.mubr.bf16.mxu0 %v1187_v44  ;;  %5382 = vmatpush3.bf16.msra.mxu0 %v5912_v25  ;;  %v1205_v12 = vrot.slane %v1203_v56, 1  ;;  %v1220_v25 = vshll.u32 %v6708_v9, 16  ;;  %v1729_v44 = vshll.u32 %v6588_v4, 16  ;;  %v1726_v47 = vrot.slane %v1724_v40, 1  ;;  %v6778_v40 = vld [vmem:[#allocation2 + $0xa8] sm:$0x1] }
 0x16f   : > { %5383 = vmatprep.subr.bf16.mxu0 %v5915_v42 }
 0x170   : > { %v6700_v17 = vor.u32 %v1205_v12, %v1201_v6  ;;  %v1222_v41 = vrot.slane %v1220_v25, 1  ;;  %v1731_v4 = vrot.slane %v1729_v44, 1  ;;  %v1241_v12 = vrot.slane %v1239_v30, 1  ;;  %v6748_v6 = vld [vmem:[#allocation2 + $0x90] sm:$0xff] }
 0x171   : > { %v1251_v19 = vshll.u32 %v6748_v6, 16 }
 0x172   : > { %5384 = vmatpush3.bf16.msra.mxu0 %v5915_v42  ;;  %v1211_v29 = vsel %vm1139_vm8, %v6700_v17, %v1210_v32  ;;  %v1720_v42 = vsel %vm1139_vm8, %v1715_v5, %v1719_v31  ;;  %v6752_v57 = vor.u32 %v1241_v12, %v1237_v16  ;;  %v2886_v32 = vsel %vm1139_vm8, %v6629_v11, %v2885_v15  ;;  %v6773_v31 = vld [vmem:[#allocation2 + $0x48] sm:$0x1] }
 0x173   : > { %2159 = vmatmul.mubr.bf16.gmra.mrb[44].mxu1 %v6477_v53  ;;  %5385 = vmatprep.subr.bf16.mxu0 %v5916_v33  ;;  %v6690_v53 = vld [vmem:[#allocation2 + $0x60] sm:$0xff]  ;;  %v2907_v44 = vshll.u32 %v6773_v31, 16 }
 0x174   : > { %2166 = vmatprep.mubr.bf16.mxu1 %v1696_v61  ;;  %v1215_v20 = vshll.u32 %v6690_v53, 16 }
 0x175   : > { %2561 = vmatmul.mubr.bf16.gmra.mrb[76].mxu0 %v6621_v0 }
 0x176   : > { %2568 = vmatprep.mubr.bf16.mxu0 %v1199_v8  ;;  %5386 = vmatpush3.bf16.msra.mxu0 %v5916_v33  ;;  %v1217_v27 = vrot.slane %v1215_v20, 1  ;;  %v1722_v33 = vshrl.u32 %v6549_v38, 16  ;;  %v6755_v20 = vld [vmem:[#allocation2 + $0x38] sm:$0x1] }
 0x177   : > { %5387 = vmatprep.subr.bf16.mxu0 %v5917_v7 }
 0x178   : > { %v1727_v56 = vor.u32 %v1726_v47, %v1722_v33 }
 0x17a   : > { %5388 = vmatpush3.bf16.msra.mxu0 %v5917_v7  ;;  %v1732_v1 = vsel %vm1139_vm8, %v1727_v56, %v1731_v4  ;;  %v6742_v7 = vld [vmem:[#allocation2 + $0x88] sm:$0x1]  ;;  %v6796_v56 = vld [vmem:[#allocation2 + $0xb8] sm:$0x1] }
 0x17b   : > { %2167 = vmatmul.mubr.bf16.gmra.mrb[48].mxu1 %v6524_v52  ;;  %5421 = vmatprep.subr.bf16.mxu0 %v6698_v63  ;;  %v1213_v52 = vshrl.u32 %v6690_v53, 16 }
 0x17c   : > { %2174 = vmatprep.mubr.bf16.mxu1 %v1708_v23  ;;  %v6760_v23 = vld [vmem:[#allocation2 + $0x98] sm:$0x1] }
 0x17d   : > { %2569 = vmatmul.mubr.bf16.gmra.mrb[80].mxu0 %v6644_v55  ;;  %v6718_v34 = vor.u32 %v1217_v27, %v1213_v52  ;;  %v2895_v27 = vshll.u32 %v6755_v20, 16  ;;  %v1249_v52 = vshrl.u32 %v6748_v6, 16 }
 0x17e   : > { %2576 = vmatprep.mubr.bf16.mxu0 %v1211_v29  ;;  %v1253_v29 = vrot.slane %v1251_v19, 1 }
 0x17f   : > { %v1223_v60 = vsel %vm1139_vm8, %v6718_v34, %v1222_v41  ;;  %v2897_v11 = vrot.slane %v2895_v27, 1  ;;  %v6820_v27 = vld [vmem:[#allocation2 + $0xd0] sm:$0xff] }
 0x180   : > { %v6770_v25 = vor.u32 %v1253_v29, %v1249_v52 }
 0x181   : > { %v2898_v36 = vsel %vm1139_vm8, %v6652_v28, %v2897_v11  ;;  %v2909_v28 = vrot.slane %v2907_v44, 1  ;;  %v1299_v11 = vshll.u32 %v6820_v27, 16 }
 0x183   : > { %2175 = vmatmul.mubr.bf16.gmra.mrb[52].mxu1 %v6518_v48  ;;  %v1232_v48 = vshll.u32 %v6725_v46, 16  ;;  %v2910_v4 = vsel %vm1139_vm8, %v6675_v50, %v2909_v28  ;;  %v1301_v44 = vrot.slane %v1299_v11, 1  ;;  %v1297_v28 = vshrl.u32 %v6820_v27, 16 }
 0x184   : > { %2182 = vmatprep.mubr.bf16.mxu1 %v1720_v42  ;;  %v1265_v42 = vrot.slane %v1263_v10, 1  ;;  %v6827_v10 = vld [vmem:[#allocation2 + $0x78] sm:$0x1] }
 0x185   : > { %2577 = vmatmul.mubr.bf16.gmra.mrb[84].mxu0 %v6667_v2  ;;  %v1234_v61 = vrot.slane %v1232_v48, 1  ;;  %v6791_v48 = vld [vmem:[#allocation2 + $0x58] sm:$0x1] }
 0x186   : > { %2584 = vmatprep.mubr.bf16.mxu0 %v1223_v60  ;;  %v6784_v60 = vld [vmem:[#allocation2 + $0xb0] sm:$0xff]  ;;  %v6788_v47 = vor.u32 %v1265_v42, %v1261_v37  ;;  %v2943_v37 = vshll.u32 %v6827_v10, 16 }
 0x187   : > { %v1235_v8 = vsel %vm1139_vm8, %v6735_v51, %v1234_v61  ;;  %v1275_v18 = vshll.u32 %v6784_v60, 16  ;;  %v1273_v12 = vshrl.u32 %v6784_v60, 16 }
 0x189   : > { %v1277_v61 = vrot.slane %v1275_v18, 1  ;;  %v6842_v18 = vor.u32 %v1301_v44, %v1297_v28 }
 0x18b   : > { %2183 = vmatmul.mubr.bf16.gmra.mrb[56].mxu1 %v6555_v39  ;;  %v1244_v39 = vshll.u32 %v6742_v7, 16  ;;  %v6806_v14 = vor.u32 %v1277_v61, %v1273_v12 }
 0x18c   : > { %2190 = vmatprep.mubr.bf16.mxu1 %v1732_v1  ;;  %v2919_v1 = vshll.u32 %v6791_v48, 16 }
 0x18d   : > { %2585 = vmatmul.mubr.bf16.gmra.mrb[88].mxu0 %v6690_v53  ;;  %v1246_v21 = vrot.slane %v1244_v39, 1  ;;  %v6809_v39 = vld [vmem:[#allocation2 + $0x68] sm:$0x1] }
 0x18e   : > { %2592 = vmatprep.mubr.bf16.mxu0 %v1235_v8  ;;  %v6802_v8 = vld [vmem:[#allocation2 + $0xc0] sm:$0xff]  ;;  %v2921_v50 = vrot.slane %v2919_v1, 1  ;;  %v2931_v29 = vshll.u32 %v6809_v39, 16  ;;  %v6850_v1 = vld [vmem:[#allocation2 + $0xe8] sm:$0x1] }
 0x18f   : > { %v1247_v35 = vsel %vm1139_vm8, %v6752_v57, %v1246_v21  ;;  %v1287_v16 = vshll.u32 %v6802_v8, 16  ;;  %v6814_v21 = vld [vmem:[#allocation2 + $0xc8] sm:$0x1]  ;;  %v1285_v52 = vshrl.u32 %v6802_v8, 16 }
 0x190   : > { %v2922_v19 = vsel %vm1139_vm8, %v6700_v17, %v2921_v50  ;;  %v2933_v17 = vrot.slane %v2931_v29, 1 }
 0x193   : > { %2191 = vmatmul.mubr.bf16.gmra.mrb[60].mxu1 %v6549_v38  ;;  %v1256_v38 = vshll.u32 %v6760_v23, 16 }
 0x194   : > { %3404 = vmatprep.mubr.bf16.mxu1 %v2886_v32 }
 0x195   : > { %2593 = vmatmul.mubr.bf16.gmra.mrb[92].mxu0 %v6713_v54  ;;  %v1258_v5 = vrot.slane %v1256_v38, 1 }
 0x196   : > { %2600 = vmatprep.mubr.bf16.mxu0 %v1247_v35  ;;  %v1289_v35 = vrot.slane %v1287_v16, 1  ;;  %v6856_v16 = vld [vmem:[#allocation2 + $0xf0] sm:$0xff] }
 0x197   : > { %v1259_v41 = vsel %vm1139_vm8, %v6770_v25, %v1258_v5 }
 0x198   : > { %v6824_v38 = vor.u32 %v1289_v35, %v1285_v52  ;;  %v6863_v35 = vld [vmem:[#allocation2 + $0x98] sm:$0x1] }
 0x19b   : > { %3405 = vmatmul.mubr.bf16.vlgmr.msra.gmra.mrb[64].mxu1 %v6601_v45  ;;  %v1268_v45 = vshll.u32 %v6778_v40, 16 }
 0x19c   : > { %3412 = vmatprep.mubr.bf16.mxu1 %v2898_v36  ;;  %v2934_v36 = vsel %vm1139_vm8, %v6718_v34, %v2933_v17  ;;  %v2945_v34 = vrot.slane %v2943_v37, 1 }
 0x19d   : > { %2601 = vmatmul.mubr.bf16.gmra.mrb[96].mxu0 %v6730_v49  ;;  %v1270_v33 = vrot.slane %v1268_v45, 1  ;;  %v6838_v45 = vld [vmem:[#allocation2 + $0xe0] sm:$0xff] }
 0x19e   : > { %2608 = vmatprep.mubr.bf16.mxu0 %v1259_v41  ;;  %v6832_v41 = vld [vmem:[#allocation2 + $0xd8] sm:$0x1]  ;;  %v2946_v61 = vsel %vm1139_vm8, %v6735_v51, %v2945_v34 }
 0x19f   : > { %v1271_v30 = vsel %vm1139_vm8, %v6788_v47, %v1270_v33  ;;  %v1311_v33 = vshll.u32 %v6838_v45, 16 }
 0x1a3   : > { %3413 = vmatmul.mubr.bf16.gmra.mrb[68].mxu1 %v6621_v0  ;;  %v1280_v0 = vshll.u32 %v6796_v56, 16 }
 0x1a4   : > { %3420 = vmatprep.mubr.bf16.mxu1 %v2910_v4  ;;  %v6845_v4 = vld [vmem:[#allocation2 + $0x88] sm:$0x1] }
 0x1a5   : > { %2609 = vmatmul.mubr.bf16.gmra.mrb[100].mxu0 %v6748_v6  ;;  %v1282_v15 = vrot.slane %v1280_v0, 1  ;;  %v1313_v0 = vrot.slane %v1311_v33, 1  ;;  %v2955_v50 = vshll.u32 %v6845_v4, 16 }
 0x1a6   : > { %2616 = vmatprep.mubr.bf16.mxu0 %v1271_v30 }
 0x1a7   : > { %v1283_v32 = vsel %vm1139_vm8, %v6806_v14, %v1282_v15  ;;  %v1309_v15 = vshrl.u32 %v6838_v45, 16  ;;  %v2957_v51 = vrot.slane %v2955_v50, 1  ;;  %v1124_v50 = vld [vmem:[#allocation2 + $0x10] sm:$0xfe] }
 0x1a9   : > { %v2958_v52 = vsel %vm1139_vm8, %v6752_v57, %v2957_v51  ;;  %v6878_v57 = vld [vmem:[#allocation2 + $0xa8] sm:$0x1]  ;;  %v1384_v51 = vrot.slane %v1124_v50, 1 }
 0x1aa   : > { %v2979_v33 = vshll.u32 %v6878_v57, 16  ;;  %v6930_v50 = vld [vmem:[#allocation2 + $0xe8] sm:$0x1] }
 0x1ab   : > { %3421 = vmatmul.mubr.bf16.gmra.mrb[72].mxu1 %v6644_v55  ;;  %v1292_v55 = vshll.u32 %v6814_v21, 16 }
 0x1ac   : > { %3428 = vmatprep.mubr.bf16.mxu1 %v2922_v19  ;;  %v6860_v19 = vor.u32 %v1313_v0, %v1309_v15  ;;  %v6888_v0 = vld [vmem:[#allocation2 + $0xb8] sm:$0x1] }
 0x1ad   : > { %2617 = vmatmul.mubr.bf16.gmra.mrb[104].mxu0 %v6766_v26  ;;  %v1294_v5 = vrot.slane %v1292_v55, 1  ;;  %v6868_v55 = vld [vmem:[#allocation2 + $0xf8] sm:$0x1]  ;;  %v2991_v15 = vshll.u32 %v6888_v0, 16 }
 0x1ae   : > { %2624 = vmatprep.mubr.bf16.mxu0 %v1283_v32  ;;  %v1323_v32 = vshll.u32 %v6856_v16, 16 }
 0x1af   : > { %v1295_v42 = vsel %vm1139_vm8, %v6824_v38, %v1294_v5  ;;  %v2967_v5 = vshll.u32 %v6863_v35, 16 }
 0x1b0   : > { %v1325_v11 = vrot.slane %v1323_v32, 1  ;;  %v2993_v32 = vrot.slane %v2991_v15, 1  ;;  %v1400_v15 = vrot.slane %v6708_v9, 1  ;;  %v3027_v9 = vshll.u32 %v6930_v50, 16 }
 0x1b1   : > { %v2969_v44 = vrot.slane %v2967_v5, 1 }
 0x1b3   : > { %3429 = vmatmul.mubr.bf16.gmra.mrb[76].mxu1 %v6667_v2  ;;  %v1304_v2 = vshll.u32 %v6832_v41, 16  ;;  %v2970_v28 = vsel %vm1139_vm8, %v6770_v25, %v2969_v44 }
 0x1b4   : > { %3436 = vmatprep.mubr.bf16.mxu1 %v2934_v36  ;;  %v1321_v36 = vshrl.u32 %v6856_v16, 16 }
 0x1b5   : > { %2625 = vmatmul.mubr.bf16.gmra.mrb[108].mxu0 %v6784_v60  ;;  %v1306_v30 = vrot.slane %v1304_v2, 1  ;;  %v1123_v2 = vld [vmem:[#allocation2] sm:$0xfe] }
 0x1b6   : > { %2632 = vmatprep.mubr.bf16.mxu0 %v1295_v42  ;;  %v1328_v42 = vshll.u32 %v6868_v55, 16 }
 0x1b7   : > { %v1307_v12 = vsel %vm1139_vm8, %v6842_v18, %v1306_v30  ;;  %v1381_v30 = vrot.slane %v1123_v2, 1  ;;  %v1394_v2 = vrot.slane %v6662_v43, 1  ;;  %v1129_v43 = vld [vmem:[#allocation2 + $0x60] sm:$0xfe] }
 0x1b8   : > { %v1330_v37 = vrot.slane %v1328_v42, 1 }
 0x1bb   : > { %3437 = vmatmul.mubr.bf16.gmra.mrb[80].mxu1 %v6690_v53  ;;  %v1316_v53 = vshll.u32 %v6850_v1, 16 }
 0x1bc   : > { %3444 = vmatprep.mubr.bf16.mxu1 %v2946_v61  ;;  %v1382_v61 = vrot.slane %v6574_v13, 1 }
 0x1bd   : > { %2633 = vmatmul.mubr.bf16.gmra.mrb[112].mxu0 %v6802_v8  ;;  %v1318_v29 = vrot.slane %v1316_v53, 1  ;;  %v1125_v53 = vld [vmem:[#allocation2 + $0x20] sm:$0xfe] }
 0x1be   : > { %2640 = vmatprep.mubr.bf16.mxu0 %v1307_v12  ;;  %v2981_v12 = vrot.slane %v2979_v33, 1  ;;  %v1383_v25 = vsel %vm1380_vm7, %v1381_v30, %v1382_v61  ;;  %v1387_v13 = vrot.slane %v1125_v53, 1  ;;  %v1128_v30 = vld [vmem:[#allocation2 + $0x50] sm:$0xfe] }
 0x1bf   : > { %v1319_v17 = vsel %vm1139_vm8, %v6860_v19, %v1318_v29  ;;  %v1385_v29 = vrot.slane %v6599_v58, 1  ;;  %v1126_v58 = vld [vmem:[#allocation2 + $0x30] sm:$0xfe] }
 0x1c3   : > { %3445 = vmatmul.mubr.bf16.gmra.mrb[84].mxu1 %v6713_v54  ;;  %v6876_v54 = vor.u32 %v1325_v11, %v1321_v36  ;;  %v1386_v11 = vsel %vm1380_vm7, %v1384_v51, %v1385_v29  ;;  %v5923_v51 = vld [vmem:[%s7499_s3 + $0x228] sm:$0xff]  }
 0x1c4   : > { %3452 = vmatprep.mubr.bf16.mxu1 %v2958_v52  ;;  %v6897_v52 = vld [vmem:[#allocation2 + $0xc8] sm:$0x1] }
 0x1c5   : > { %2641 = vmatmul.mubr.bf16.gmra.mrb[116].mxu0 %v6820_v27  ;;  %v1331_v34 = vsel %vm1139_vm8, %v6876_v54, %v1330_v37  ;;  %v3003_v36 = vshll.u32 %v6897_v52, 16  ;;  %v1391_v37 = vrot.slane %v6639_v22, 1 }
 0x1c6   : > { %2648 = vmatprep.mubr.bf16.mxu0 %v1319_v17  ;;  %v5919_v17 = vld [vmem:[%s7499_s3 + $0x208] sm:$0xff]  }
 0x1c7   : > { %v3005_v44 = vrot.slane %v3003_v36, 1 }
 0x1cb   : > { %3453 = vmatmul.mubr.bf16.gmra.mrb[88].mxu1 %v6730_v49  ;;  %v2982_v49 = vsel %vm1139_vm8, %v6788_v47, %v2981_v12  ;;  %v2994_v47 = vsel %vm1139_vm8, %v6806_v14, %v2993_v32  ;;  %v1390_v14 = vrot.slane %v1126_v58, 1  ;;  %v1399_v12 = vrot.slane %v1129_v43, 1 }
 0x1cc   : > { %3460 = vmatprep.mubr.bf16.mxu1 %v2970_v28  ;;  %v6914_v28 = vld [vmem:[#allocation2 + $0xd8] sm:$0x1] }
 0x1cd   : > { %2649 = vmatmul.mubr.bf16.gmra.mrb[120].mxu0 %v6838_v45  ;;  %v1392_v33 = vsel %vm1380_vm7, %v1390_v14, %v1391_v37  ;;  %v3015_v61 = vshll.u32 %v6914_v28, 16  ;;  %v6950_v14 = vld [vmem:[#allocation2 + $0xf8] sm:$0x1] }
 0x1ce   : > { %2656 = vmatprep.mubr.bf16.mxu0 %v1331_v34  ;;  %v5921_v34 = vld [vmem:[%s7499_s3 + $0x218] sm:$0xff]  }
 0x1cf   : > { %v5925_v37 = vld [vmem:[%s7499_s3 + $0x238] sm:$0xff]  }
 0x1d3   : > { %3461 = vmatmul.mubr.bf16.gmra.mrb[92].mxu1 %v6748_v6  ;;  %v1388_v6 = vrot.slane %v6614_v62, 1  ;;  %v1127_v62 = vld [vmem:[#allocation2 + $0x40] sm:$0xfe] }
 0x1d4   : > { %3468 = vmatprep.mubr.bf16.mxu1 %v2982_v49  ;;  %v1393_v42 = vrot.slane %v1127_v62, 1  ;;  %v3017_v49 = vrot.slane %v3015_v61, 1  ;;  %v3029_v62 = vrot.slane %v3027_v9, 1  ;;  %v1135_v9 = vld [vmem:[#allocation2 + $0xc0] sm:$0xfe] }
 0x1d5   : > { %2657 = vmatmul.mubr.bf16.gmra.mrb[124].mxu0 %v6856_v16  ;;  %v1389_v5 = vsel %vm1380_vm7, %v1387_v13, %v1388_v6  ;;  %v1130_v6 = vld [vmem:[#allocation2 + $0x70] sm:$0xfe] }
 0x1d6   : > { %5389 = vmatprep.mubr.bf16.mxu0 %v1383_v25  ;;  %v1395_v22 = vsel %vm1380_vm7, %v1393_v42, %v1394_v2  ;;  %v1397_v25 = vrot.slane %v6685_v24, 1  ;;  %v3018_v53 = vsel %vm1139_vm8, %v6842_v18, %v3017_v49  ;;  %v1401_v24 = vsel %vm1380_vm7, %v1399_v12, %v1400_v15  ;;  %v6970_v15 = vld [vmem:[#allocation2 + $0x108] sm:$0x1] }
 0x1d7   : > { %v1406_v42 = vrot.slane %v6742_v7, 1 }
 0x1db   : > { %3469 = vmatmul.mubr.bf16.gmra.mrb[96].mxu1 %v6766_v26  ;;  %v5920_v26 = vld [vmem:[%s7499_s3 + $0x210] sm:$0xff]  }
 0x1dc   : > { %3476 = vmatprep.mubr.bf16.mxu1 %v2994_v47  ;;  %v1131_v47 = vld [vmem:[#allocation2 + $0x80] sm:$0xfe] }
 0x1dd   : > { %5390 = vmatmul.mubr.bf16.vlgmr.msra.gmra.mrb[32].mxu0 %v1386_v11  ;;  %v5924_v11 = vld [vmem:[%s7499_s3 + $0x230] sm:$0xff]   ;;  %v1405_v36 = vrot.slane %v1131_v47, 1 }
 0x1de   : > { %5422 = vmatpush3.bf16.msra.mxu0 %v6698_v63  ;;  %5393 = vmatprep.mubr.bf16.mxu0 %v1389_v5  ;;  %v3006_v63 = vsel %vm1139_vm8, %v6824_v38, %v3005_v44  ;;  %v1396_v38 = vrot.slane %v1128_v30, 1  ;;  %v1402_v5 = vrot.slane %v1130_v6, 1  ;;  %v3030_v44 = vsel %vm1139_vm8, %v6860_v19, %v3029_v62  ;;  %v1133_v30 = vld [vmem:[#allocation2 + $0xa0] sm:$0xfe] }
 0x1df   : > { %5423 = vmatprep.subr.bf16.mxu0 %v5919_v17  ;;  %v1411_v12 = vrot.slane %v1133_v30, 1 }
 0x1e0   : > { %v1398_v13 = vsel %vm1380_vm7, %v1396_v38, %v1397_v25  ;;  %v1409_v25 = vrot.slane %v6760_v23, 1 }
 0x1e2   : > { %5424 = vmatpush3.bf16.msra.mxu0 %v5919_v17 }
 0x1e3   : > { %3477 = vmatmul.mubr.bf16.gmra.mrb[100].mxu1 %v6784_v60  ;;  %5425 = vmatprep.subr.bf16.mxu0 %v5920_v26  ;;  %v5922_v60 = vld [vmem:[%s7499_s3 + $0x220] sm:$0xff]  }
 0x1e4   : > { %3484 = vmatprep.mubr.bf16.mxu1 %v3006_v63 }
 0x1e5   : > { %5394 = vmatmul.mubr.bf16.gmra.mrb[36].mxu0 %v1392_v33  ;;  %v1132_v33 = vld [vmem:[#allocation2 + $0x90] sm:$0xfe] }
 0x1e6   : > { %5397 = vmatprep.mubr.bf16.mxu0 %v1395_v22  ;;  %5426 = vmatpush3.bf16.msra.mxu0 %v5920_v26  ;;  %v1403_v26 = vrot.slane %v6725_v46, 1  ;;  %v6960_v46 = vld [vmem:[#allocation2 + $0x100] sm:$0xff] }
 0x1e7   : > { %5427 = vmatprep.subr.bf16.mxu0 %v5921_v34  ;;  %v3046_v43 = vshll.u32 %v6960_v46, 16 }
 0x1e8   : > { %v1404_v2 = vsel %vm1380_vm7, %v1402_v5, %v1403_v26  ;;  %v1417_v26 = vrot.slane %v1135_v9, 1 }
 0x1ea   : > { %5428 = vmatpush3.bf16.msra.mxu0 %v5921_v34  ;;  %v1407_v34 = vsel %vm1380_vm7, %v1405_v36, %v1406_v42 }
 0x1eb   : > { %3485 = vmatmul.mubr.bf16.gmra.mrb[104].mxu1 %v6802_v8  ;;  %5429 = vmatprep.subr.bf16.mxu0 %v5922_v60 }
 0x1ec   : > { %3492 = vmatprep.mubr.bf16.mxu1 %v3018_v53  ;;  %v4837_v32 = vpop.f32.mrb[0].mxu1  ;;  %v1412_v53 = vrot.slane %v6778_v40, 1  ;;  %v3051_v40 = vshll.u32 %v6970_v15, 16 }
 0x1ed   : > { %5398 = vmatmul.mubr.bf16.gmra.mrb[40].mxu0 %v1398_v13  ;;  %v4838_v29 = vpop.f32.mrb[1].mxu1  ;;  %v3048_v13 = vrot.slane %v3046_v43, 1  ;;  %v1136_v43 = vld [vmem:[#allocation2 + $0xd0] sm:$0xfe] }
 0x1ee   : > { %5401 = vmatprep.mubr.bf16.mxu0 %v1401_v24  ;;  %v6942_v8 = vadd.f32 %v4838_v29, %v4837_v32  ;;  %v4840_v18 = vpop.f32.mrb[2].mxu1  ;;  %5430 = vmatpush3.bf16.msra.mxu0 %v5922_v60  ;;  %v1408_v60 = vrot.slane %v1132_v33, 1  ;;  %v1134_v29 = vld [vmem:[#allocation2 + $0xb0] sm:$0xfe]  ;;  %v1413_v6 = vsel %vm1380_vm7, %v1411_v12, %v1412_v53 }
 0x1ef   : > { %v4841_v17 = vpop.f32.mrb[3].mxu1  ;;  %5431 = vmatprep.subr.bf16.mxu0 %v5923_v51  ;;  %v1414_v62 = vrot.slane %v1134_v29, 1 }
 0x1f0   : > { %v6947_v58 = vadd.f32 %v4841_v17, %v4840_v18  ;;  %v1410_v32 = vsel %vm1380_vm7, %v1408_v60, %v1409_v25  ;;  %v3044_v18 = vshrl.u32 %v6960_v46, 16  ;;  %v6983_v17 = vld [vmem:[#allocation2 + $0x118] sm:$0x1] }
 0x1f2   : > { %5432 = vmatpush3.bf16.msra.mxu0 %v5923_v51  ;;  %v3049_v36 = vor.u32 %v3048_v13, %v3044_v18  ;;  %v2859_v18 = vld [vmem:[#allocation2 + $0x20] sm:$0xfe] }
 0x1f3   : > { %3493 = vmatmul.mubr.bf16.gmra.mrb[108].mxu1 %v6820_v27  ;;  %5433 = vmatprep.subr.bf16.mxu0 %v5924_v11  ;;  %v3039_v27 = vshll.u32 %v6950_v14, 16 }
 0x1f4   : > { %3500 = vmatprep.mubr.bf16.mxu1 %v3030_v44  ;;  %v4843_v63 = vpop.f32.mrb[4].mxu1  ;;  %v3053_v44 = vrot.slane %v3051_v40, 1  ;;  %v5927_v40 = vld [vmem:[%s7501_s5 + $0x8] sm:$0xff]  }
 0x1f5   : > { %5402 = vmatmul.mubr.bf16.gmra.mrb[44].mxu0 %v1404_v2  ;;  %v4844_v7 = vpop.f32.mrb[5].mxu1  ;;  %v3041_v49 = vrot.slane %v3039_v27, 1 }
 0x1f6   : > { %5405 = vmatprep.mubr.bf16.mxu0 %v1407_v34  ;;  %v6964_v19 = vadd.f32 %v4844_v7, %v4843_v63  ;;  %v4846_v22 = vpop.f32.mrb[6].mxu1  ;;  %5434 = vmatpush3.bf16.msra.mxu0 %v5924_v11  ;;  %v5926_v11 = vld [vmem:[%s7501_s5] sm:$0xff]   ;;  %v3063_v63 = vshll.u32 %v6983_v17, 16  ;;  %v1415_v34 = vrot.slane %v6796_v56, 1  ;;  %v1418_v7 = vrot.slane %v6814_v21, 1 }
 0x1f7   : > { %v4847_v61 = vpop.f32.mrb[7].mxu1  ;;  %5435 = vmatprep.subr.bf16.mxu0 %v5925_v37  ;;  %v3042_v51 = vsel %vm1139_vm8, %v6876_v54, %v3041_v49  ;;  %5469 = vmatprep.subr.bf16.mxu1 %v5926_v11  ;;  %v3054_v33 = vsel %vm1139_vm8, %v3049_v36, %v3053_v44  ;;  %v1137_v21 = vld [vmem:[#allocation2 + $0xe0] sm:$0xfe] }
 0x1f8   : > { %v6967_v38 = vadd.f32 %v4847_v61, %v4846_v22  ;;  %5470 = vmatpush3.bf16.msra.mxu1 %v5926_v11  ;;  %v1416_v27 = vsel %vm1380_vm7, %v1414_v62, %v1415_v34  ;;  %v1419_v30 = vsel %vm1380_vm7, %v1417_v26, %v1418_v7  ;;  %v3065_v12 = vrot.slane %v3063_v63, 1  ;;  %v2861_v63 = vld [vmem:[#allocation2 + $0x40] sm:$0xfe] }
 0x1f9   : > { %5471 = vmatprep.subr.bf16.mxu1 %v5927_v40  ;;  %v3116_v62 = vrot.slane %v6738_v59, 1  ;;  %v3119_v59 = vrot.slane %v6755_v20, 1 }
 0x1fa   : > { %5436 = vmatpush3.bf16.msra.mxu0 %v5925_v37  ;;  %v3056_v37 = vshrl.u32 %v6616_v3, 16 }
 0x1fb   : > { %3501 = vmatmul.mubr.bf16.gmra.mrb[112].mxu1 %v6838_v45  ;;  %v3058_v45 = vshll.u32 %v6616_v3, 16 }
 0x1fc   : > { %3508 = vmatprep.mubr.bf16.mxu1 %v3042_v51  ;;  %v4849_v24 = vpop.f32.mrb[8].mxu1  ;;  %v1423_v51 = vrot.slane %v1137_v21, 1  ;;  %5472 = vmatpush3.bf16.msra.mxu1 %v5927_v40  ;;  %v5928_v21 = vld [vmem:[%s7501_s5 + $0x10] sm:$0xff]   ;;  %v2865_v40 = vld [vmem:[#allocation2 + $0x80] sm:$0xfe] }
 0x1fd   : > { %5406 = vmatmul.mubr.bf16.gmra.mrb[48].mxu0 %v1410_v32  ;;  %v4850_v23 = vpop.f32.mrb[9].mxu1  ;;  %v3060_v2 = vrot.slane %v3058_v45, 1  ;;  %v1421_v32 = vrot.slane %v6832_v41, 1  ;;  %5473 = vmatprep.subr.bf16.mxu1 %v5928_v21 }
 0x1fe   : > { %5409 = vmatprep.mubr.bf16.mxu0 %v1413_v6  ;;  %v6981_v47 = vadd.f32 %v4850_v23, %v4849_v24  ;;  %v4852_v54 = vpop.f32.mrb[10].mxu1  ;;  %v1424_v24 = vrot.slane %v6850_v1, 1  ;;  %v1138_v23 = vld [vmem:[#allocation2 + $0xf0] sm:$0xfe] }
 0x1ff   : > { %v4853_v5 = vpop.f32.mrb[11].mxu1  ;;  %v3061_v60 = vor.u32 %v3060_v2, %v3056_v37  ;;  %v1426_v1 = vrot.slane %v1138_v23, 1  ;;  %v2860_v37 = vld [vmem:[#allocation2 + $0x30] sm:$0xfe] }
 0x200   : > { %v6988_v42 = vadd.f32 %v4853_v5, %v4852_v54  ;;  %v1425_v6 = vsel %vm1380_vm7, %v1423_v51, %v1424_v24  ;;  %v1427_v5 = vrot.slane %v6868_v55, 1  ;;  %5474 = vmatpush3.bf16.msra.mxu1 %v5928_v21  ;;  %v3140_v21 = vrot.slane %v6878_v57, 1  ;;  %v5930_v57 = vld [vmem:[%s7501_s5 + $0x20] sm:$0xff]  }
 0x201   : > { %v3066_v13 = vsel %vm1139_vm8, %v3061_v60, %v3065_v12  ;;  %v2862_v60 = vld [vmem:[#allocation2 + $0x50] sm:$0xfe] }
 0x202   : > { %v1428_v26 = vsel %vm1380_vm7, %v1426_v1, %v1427_v5  ;;  %v3124_v20 = vrot.slane %v2862_v60, 1  ;;  %v3131_v5 = vrot.slane %v6827_v10, 1  ;;  %v3137_v60 = vrot.slane %v6863_v35, 1 }
 0x203   : > { %3509 = vmatmul.mubr.bf16.gmra.mrb[116].mxu1 %v6856_v16  ;;  %v1420_v16 = vrot.slane %v1136_v43, 1 }
 0x204   : > { %3516 = vmatprep.mubr.bf16.mxu1 %v3054_v33  ;;  %v4855_v22 = vpop.f32.mrb[12].mxu1  ;;  %v3118_v33 = vrot.slane %v2860_v37, 1  ;;  %v2866_v37 = vld [vmem:[#allocation2 + $0x90] sm:$0xfe] }
 0x205   : > { %5410 = vmatmul.mubr.bf16.gmra.mrb[52].mxu0 %v1416_v27  ;;  %v4856_v61 = vpop.f32.mrb[13].mxu1  ;;  %v1422_v29 = vsel %vm1380_vm7, %v1420_v16, %v1421_v32  ;;  %v3121_v27 = vrot.slane %v2861_v63, 1  ;;  %v3125_v32 = vrot.slane %v6791_v48, 1  ;;  %v2867_v63 = vld [vmem:[#allocation2 + $0xa0] sm:$0xfe] }
 0x206   : > { %5413 = vmatprep.mubr.bf16.mxu0 %v1419_v30  ;;  %v6998_v49 = vadd.f32 %v4856_v61, %v4855_v22  ;;  %v4858_v56 = vpop.f32.mrb[14].mxu1  ;;  %v3120_v61 = vsel %vm1380_vm7, %v3118_v33, %v3119_v59  ;;  %v3139_v59 = vrot.slane %v2867_v63, 1  ;;  %v2870_v63 = vld [vmem:[#allocation2 + $0xd0] sm:$0xfe] }
 0x207   : > { %v4859_v25 = vpop.f32.mrb[15].mxu1 }
 0x208   : > { %v7000_v53 = vadd.f32 %v4859_v25, %v4858_v56  ;;  %v2863_v56 = vld [vmem:[#allocation2 + $0x60] sm:$0xfe] }
 0x20b   : > { %3517 = vmatmul.mubr.bf16.gmra.mrb[120].mxu1 %v6960_v46  ;;  %v3115_v46 = vrot.slane %v2859_v18, 1 }
 0x20c   : > { %3524 = vmatprep.mubr.bf16.mxu1 %v3066_v13 }
 0x20d   : > { %5414 = vmatmul.mubr.bf16.gmra.mrb[56].mxu0 %v1422_v29  ;;  %v3117_v44 = vsel %vm1380_vm7, %v3115_v46, %v3116_v62  ;;  %v3128_v29 = vrot.slane %v6809_v39, 1  ;;  %v3134_v39 = vrot.slane %v6845_v4, 1 }
 0x20e   : > { %5417 = vmatprep.mubr.bf16.mxu0 %v1425_v6  ;;  %v4861_v9 = vpop.f32.mrb[16].mxu1  ;;  %v3126_v6 = vsel %vm1380_vm7, %v3124_v20, %v3125_v32 }
 0x20f   : > { %v4862_v45 = vpop.f32.mrb[17].mxu1 }
 0x210   : > { %v7011_v41 = vadd.f32 %v4862_v45, %v4861_v9  ;;  %v4864_v54 = vpop.f32.mrb[18].mxu1  ;;  %v2864_v9 = vld [vmem:[#allocation2 + $0x70] sm:$0xfe] }
 0x211   : > { %v4865_v11 = vpop.f32.mrb[19].mxu1 }
 0x212   : > { %v7014_v36 = vadd.f32 %v4865_v11, %v4864_v54  ;;  %v3130_v54 = vrot.slane %v2864_v9, 1  ;;  %v3133_v11 = vrot.slane %v2865_v40, 1 }
 0x213   : > { %3525 = vmatmul.mubr.bf16.gmra.mrb[124].mxu1 %v6616_v3  ;;  %v3122_v3 = vrot.slane %v6773_v31, 1  ;;  %v3127_v31 = vrot.slane %v2863_v56, 1 }
 0x215   : > { %5418 = vmatmul.mubr.bf16.gmra.mrb[60].mxu0 %v1428_v26  ;;  %v3123_v43 = vsel %vm1380_vm7, %v3121_v27, %v3122_v3  ;;  %v3129_v23 = vsel %vm1380_vm7, %v3127_v31, %v3128_v29  ;;  %v3132_v26 = vsel %vm1380_vm7, %v3130_v54, %v3131_v5  ;;  %v3136_v27 = vrot.slane %v2866_v37, 1  ;;  %v2869_v29 = vld [vmem:[#allocation2 + $0xc0] sm:$0xfe] }
 0x216   : > { %5437 = vmatprep.mubr.bf16.mxu0 %v3117_v44  ;;  %v4867_v2 = vpop.f32.mrb[20].mxu1  ;;  %v3135_v44 = vsel %vm1380_vm7, %v3133_v11, %v3134_v39  ;;  %v3141_v31 = vsel %vm1380_vm7, %v3139_v59, %v3140_v21  ;;  %v3143_v11 = vrot.slane %v6888_v0, 1  ;;  %v3146_v39 = vrot.slane %v6897_v52, 1 }
 0x217   : > { %v4868_v34 = vpop.f32.mrb[21].mxu1  ;;  %v3148_v52 = vrot.slane %v2870_v63, 1  ;;  %v3152_v21 = vrot.slane %v6930_v50, 1  ;;  %v5931_v50 = vld [vmem:[%s7501_s5 + $0x28] sm:$0xff]  }
 0x218   : > { %v7020_v7 = vadd.f32 %v4868_v34, %v4867_v2  ;;  %v4870_v55 = vpop.f32.mrb[22].mxu1  ;;  %v5929_v34 = vld [vmem:[%s7501_s5 + $0x18] sm:$0xff]  }
 0x219   : > { %v4871_v22 = vpop.f32.mrb[23].mxu1  ;;  %5475 = vmatprep.subr.bf16.mxu1 %v5929_v34 }
 0x21a   : > { %v7023_v30 = vadd.f32 %v4871_v22, %v4870_v55  ;;  %5476 = vmatpush3.bf16.msra.mxu1 %v5929_v34 }
 0x21b   : > { %5477 = vmatprep.subr.bf16.mxu1 %v5930_v57 }
 0x21d   : > { %5438 = vmatmul.mubr.bf16.vlgmr.msra.gmra.mrb[32].mxu0 %v3120_v61 }
 0x21e   : > { %5441 = vmatprep.mubr.bf16.mxu0 %v3123_v43  ;;  %v4873_v12 = vpop.f32.mrb[24].mxu1  ;;  %5478 = vmatpush3.bf16.msra.mxu1 %v5930_v57  ;;  %v2873_v57 = vld [vmem:[#allocation2 + $0x100] sm:$0xfe] }
 0x21f   : > { %v4874_v25 = vpop.f32.mrb[25].mxu1  ;;  %5479 = vmatprep.subr.bf16.mxu1 %v5931_v50 }
 0x220   : > { %v7031_v16 = vadd.f32 %v4874_v25, %v4873_v12  ;;  %v4876_v51 = vpop.f32.mrb[26].mxu1 }
 0x221   : > { %v4877_v13 = vpop.f32.mrb[27].mxu1 }
 0x222   : > { %v7034_v24 = vadd.f32 %v4877_v13, %v4876_v51  ;;  %v3138_v51 = vsel %vm1380_vm7, %v3136_v27, %v3137_v60  ;;  %v2868_v13 = vld [vmem:[#allocation2 + $0xb0] sm:$0xfe]  ;;  %v3149_v60 = vrot.slane %v6914_v28, 1  ;;  %5480 = vmatpush3.bf16.msra.mxu1 %v5931_v50 }
 0x223   : > { %v3142_v9 = vrot.slane %v2868_v13, 1 }
 0x225   : > { %5442 = vmatmul.mubr.bf16.gmra.mrb[36].mxu0 %v3126_v6  ;;  %v3144_v37 = vsel %vm1380_vm7, %v3142_v9, %v3143_v11 }
 0x226   : > { %5445 = vmatprep.mubr.bf16.mxu0 %v3129_v23  ;;  %v4879_v18 = vpop.f32.mrb[28].mxu1 }
 0x227   : > { %v4880_v45 = vpop.f32.mrb[29].mxu1 }
 0x228   : > { %v7039_v1 = vadd.f32 %v4880_v45, %v4879_v18  ;;  %v4882_v46 = vpop.f32.mrb[30].mxu1  ;;  %v3145_v45 = vrot.slane %v2869_v29, 1 }
 0x229   : > { %v4883_v48 = vpop.f32.mrb[31].mxu1 }
 0x22a   : > { %v7042_v62 = vadd.f32 %v4883_v48, %v4882_v46 }
 0x22d   : > { %5446 = vmatmul.mubr.bf16.gmra.mrb[40].mxu0 %v3132_v26 }
 0x22e   : > { %5449 = vmatprep.mubr.bf16.mxu0 %v3135_v44  ;;  %v4885_v2 = vpop.f32.mrb[32].mxu1 }
 0x22f   : > { %v4886_v33 = vpop.f32.mrb[33].mxu1 }
 0x230   : > { %v4973_v55 = vpop.f32.mrb[64].mxu0  ;;  %v7050_v10 = vadd.f32 %v4886_v33, %v4885_v2  ;;  %v4888_v22 = vpop.f32.mrb[34].mxu1  ;;  %v3147_v2 = vsel %vm1380_vm7, %v3145_v45, %v3146_v39  ;;  %v2871_v33 = vld [vmem:[#allocation2 + $0xe0] sm:$0xfe]  ;;  %v3157_v45 = vrot.slane %v2873_v57, 1  ;;  %v3158_v39 = vrot.slane %v6970_v15, 1 }
 0x231   : > { %v4974_v4 = vpop.f32.mrb[65].mxu0  ;;  %v4889_v3 = vpop.f32.mrb[35].mxu1  ;;  %v3151_v59 = vrot.slane %v2871_v33, 1 }
 0x232   : > { %v4975_v61 = vadd.f32 %v4974_v4, %v4973_v55  ;;  %v4976_v43 = vpop.f32.mrb[66].mxu0  ;;  %v7053_v12 = vadd.f32 %v4889_v3, %v4888_v22 }
 0x233   : > { %v4977_v56 = vpop.f32.mrb[67].mxu0  ;;  %v3153_v13 = vsel %vm1380_vm7, %v3151_v59, %v3152_v21 }
 0x234   : > { %v7057_v25 = vadd.f32 %v4975_v61, %v6942_v8  ;;  %v4978_v20 = vadd.f32 %v4977_v56, %v4976_v43 }
 0x235   : > { %5450 = vmatmul.mubr.bf16.gmra.mrb[44].mxu0 %v3138_v51 }
 0x236   : > { %v7062_v32 = vadd.f32 %v4978_v20, %v6947_v58  ;;  %5453 = vmatprep.mubr.bf16.mxu0 %v3141_v31  ;;  %v4891_v35 = vpop.f32.mrb[36].mxu1  ;;  %v3150_v31 = vsel %vm1380_vm7, %v3148_v52, %v3149_v60 }
 0x237   : > { %v4892_v6 = vpop.f32.mrb[37].mxu1 }
 0x238   : > { %v4979_v8 = vpop.f32.mrb[68].mxu0  ;;  %v7067_v23 = vadd.f32 %v4892_v6, %v4891_v35  ;;  %v4894_v18 = vpop.f32.mrb[38].mxu1  ;;  %v2872_v35 = vld [vmem:[#allocation2 + $0xf0] sm:$0xfe] }
 0x239   : > { %v4980_v40 = vpop.f32.mrb[69].mxu0  ;;  %v4895_v54 = vpop.f32.mrb[39].mxu1  ;;  %v3154_v9 = vrot.slane %v2872_v35, 1 }
 0x23a   : > { %v4981_v58 = vadd.f32 %v4980_v40, %v4979_v8  ;;  %v4982_v46 = vpop.f32.mrb[70].mxu0  ;;  %v7070_v48 = vadd.f32 %v4895_v54, %v4894_v18 }
 0x23b   : > { %v4983_v5 = vpop.f32.mrb[71].mxu0 }
 0x23c   : > { %v7074_v26 = vadd.f32 %v4981_v58, %v6964_v19  ;;  %v4984_v44 = vadd.f32 %v4983_v5, %v4982_v46  ;;  %v3155_v46 = vrot.slane %v6950_v14, 1 }
 0x23d   : > { %5454 = vmatmul.mubr.bf16.gmra.mrb[48].mxu0 %v3144_v37 }
 0x23e   : > { %v7079_v34 = vadd.f32 %v4984_v44, %v6967_v38  ;;  %5457 = vmatprep.mubr.bf16.mxu0 %v3147_v2  ;;  %v4897_v0 = vpop.f32.mrb[40].mxu1  ;;  %v2874_v44 = vld [vmem:[#allocation2 + $0x110] sm:$0xfe]  ;;  %v3156_v63 = vsel %vm1380_vm7, %v3154_v9, %v3155_v46 }
 0x23f   : > { %v4898_v55 = vpop.f32.mrb[41].mxu1 }
 0x240   : > { %v4985_v27 = vpop.f32.mrb[72].mxu0  ;;  %v7081_v22 = vadd.f32 %v4898_v55, %v4897_v0  ;;  %v4900_v19 = vpop.f32.mrb[42].mxu1  ;;  %v3159_v0 = vsel %vm1380_vm7, %v3157_v45, %v3158_v39  ;;  %v3160_v55 = vrot.slane %v2874_v44, 1 }
 0x241   : > { %v4986_v4 = vpop.f32.mrb[73].mxu0  ;;  %v4901_v3 = vpop.f32.mrb[43].mxu1 }
 0x242   : > { %v4987_v61 = vadd.f32 %v4986_v4, %v4985_v27  ;;  %v4988_v43 = vpop.f32.mrb[74].mxu0  ;;  %v7084_v56 = vadd.f32 %v4901_v3, %v4900_v19  ;;  %v3161_v27 = vrot.slane %v6983_v17, 1 }
 0x243   : > { %v4989_v38 = vpop.f32.mrb[75].mxu0 }
 0x244   : > { %v7088_v20 = vadd.f32 %v4987_v61, %v6981_v47  ;;  %v4990_v51 = vadd.f32 %v4989_v38, %v4988_v43  ;;  %v3162_v43 = vsel %vm1380_vm7, %v3160_v55, %v3161_v27 }
 0x245   : > { %5458 = vmatmul.mubr.bf16.gmra.mrb[52].mxu0 %v3150_v31  ;;  %v5932_v31 = vld [vmem:[%s7501_s5 + $0x30] sm:$0xff]  }
 0x246   : > { %v7093_v29 = vadd.f32 %v4990_v51, %v6988_v42  ;;  %5461 = vmatprep.mubr.bf16.mxu0 %v3153_v13  ;;  %v4903_v28 = vpop.f32.mrb[44].mxu1  ;;  %5481 = vmatprep.subr.bf16.mxu1 %v5932_v31 }
 0x247   : > { %v4904_v6 = vpop.f32.mrb[45].mxu1  ;;  %5482 = vmatpush3.bf16.msra.mxu1 %v5932_v31 }
 0x248   : > { %v4991_v47 = vpop.f32.mrb[76].mxu0  ;;  %v7098_v8 = vadd.f32 %v4904_v6, %v4903_v28  ;;  %v4906_v18 = vpop.f32.mrb[46].mxu1 }
 0x249   : > { %v4992_v40 = vpop.f32.mrb[77].mxu0  ;;  %v4907_v54 = vpop.f32.mrb[47].mxu1 }
 0x24a   : > { %v4993_v42 = vadd.f32 %v4992_v40, %v4991_v47  ;;  %v4994_v58 = vpop.f32.mrb[78].mxu0  ;;  %v7101_v11 = vadd.f32 %v4907_v54, %v4906_v18 }
 0x24b   : > { %v4995_v5 = vpop.f32.mrb[79].mxu0 }
 0x24c   : > { %v7105_v37 = vadd.f32 %v4993_v42, %v6998_v49  ;;  %v4996_v2 = vadd.f32 %v4995_v5, %v4994_v58 }
 0x24d   : > { %5462 = vmatmul.mubr.bf16.gmra.mrb[56].mxu0 %v3156_v63 }
 0x24e   : > { %v7110_v33 = vadd.f32 %v4996_v2, %v7000_v53  ;;  %5465 = vmatprep.mubr.bf16.mxu0 %v3159_v0  ;;  %v4909_v14 = vpop.f32.mrb[48].mxu1 }
 0x24f   : > { %v4910_v52 = vpop.f32.mrb[49].mxu1 }
 0x250   : > { %v4997_v15 = vpop.f32.mrb[80].mxu0  ;;  %v7113_v19 = vadd.f32 %v4910_v52, %v4909_v14  ;;  %v4912_v49 = vpop.f32.mrb[50].mxu1  ;;  %v5933_v52 = vld [vmem:[%s7501_s5 + $0x38] sm:$0xff]  }
 0x251   : > { %v4998_v4 = vpop.f32.mrb[81].mxu0  ;;  %v4913_v59 = vpop.f32.mrb[51].mxu1  ;;  %5483 = vmatprep.subr.bf16.mxu1 %v5933_v52 }
 0x252   : > { %v4999_v3 = vadd.f32 %v4998_v4, %v4997_v15  ;;  %v5000_v61 = vpop.f32.mrb[82].mxu0  ;;  %v7116_v60 = vadd.f32 %v4913_v59, %v4912_v49  ;;  %5484 = vmatpush3.bf16.msra.mxu1 %v5933_v52 }
 0x253   : > { %v5001_v53 = vpop.f32.mrb[83].mxu0 }
 0x254   : > { %v7119_v38 = vadd.f32 %v4999_v3, %v7011_v41  ;;  %v5002_v21 = vadd.f32 %v5001_v53, %v5000_v61 }
 0x255   : > { %5466 = vmatmul.mubr.bf16.gmra.mrb[60].mxu0 %v3162_v43 }
 0x256   : > { %v7122_v17 = vadd.f32 %v5002_v21, %v7014_v36  ;;  %v4915_v51 = vpop.f32.mrb[52].mxu1 }
 0x257   : > { %v4916_v13 = vpop.f32.mrb[53].mxu1 }
 0x258   : > { %v5003_v35 = vpop.f32.mrb[84].mxu0  ;;  %v7127_v28 = vadd.f32 %v4916_v13, %v4915_v51  ;;  %v4918_v57 = vpop.f32.mrb[54].mxu1 }
 0x259   : > { %v5004_v50 = vpop.f32.mrb[85].mxu0  ;;  %v4919_v6 = vpop.f32.mrb[55].mxu1 }
 0x25a   : > { %v5005_v41 = vadd.f32 %v5004_v50, %v5003_v35  ;;  %v5006_v47 = vpop.f32.mrb[86].mxu0  ;;  %v7129_v9 = vadd.f32 %v4919_v6, %v4918_v57 }
 0x25b   : > { %v5007_v36 = vpop.f32.mrb[87].mxu0 }
 0x25c   : > { %v7132_v18 = vadd.f32 %v5005_v41, %v7020_v7  ;;  %v5008_v40 = vadd.f32 %v5007_v36, %v5006_v47 }
 0x25e   : > { %v7135_v45 = vadd.f32 %v5008_v40, %v7023_v30  ;;  %v4921_v54 = vpop.f32.mrb[56].mxu1 }
 0x25f   : > { %v4922_v42 = vpop.f32.mrb[57].mxu1 }
 0x260   : > { %v5009_v58 = vpop.f32.mrb[88].mxu0  ;;  %v7137_v46 = vadd.f32 %v4922_v42, %v4921_v54  ;;  %v4924_v5 = vpop.f32.mrb[58].mxu1 }
 0x261   : > { %v5010_v39 = vpop.f32.mrb[89].mxu0  ;;  %v4925_v44 = vpop.f32.mrb[59].mxu1 }
 0x262   : > { %v5011_v2 = vadd.f32 %v5010_v39, %v5009_v58  ;;  %v5012_v63 = vpop.f32.mrb[90].mxu0  ;;  %v7139_v0 = vadd.f32 %v4925_v44, %v4924_v5 }
 0x263   : > { %v5013_v14 = vpop.f32.mrb[91].mxu0 }
 0x264   : > { %v7142_v7 = vadd.f32 %v5011_v2, %v7031_v16  ;;  %v5014_v55 = vadd.f32 %v5013_v14, %v5012_v63 }
 0x266   : > { %v7145_v30 = vadd.f32 %v5014_v55, %v7034_v24  ;;  %v4927_v27 = vpop.f32.mrb[60].mxu1 }
 0x267   : > { %v4928_v15 = vpop.f32.mrb[61].mxu1 }
 0x268   : > { %v5015_v49 = vpop.f32.mrb[92].mxu0  ;;  %v7150_v4 = vadd.f32 %v4928_v15, %v4927_v27  ;;  %v4930_v59 = vpop.f32.mrb[62].mxu1 }
 0x269   : > { %v5016_v3 = vpop.f32.mrb[93].mxu0  ;;  %v4931_v61 = vpop.f32.mrb[63].mxu1 }
 0x26a   : > { %v5017_v16 = vadd.f32 %v5016_v3, %v5015_v49  ;;  %v5018_v43 = vpop.f32.mrb[94].mxu0  ;;  %v7152_v53 = vadd.f32 %v4931_v61, %v4930_v59 }
 0x26b   : > { %v5019_v24 = vpop.f32.mrb[95].mxu0 }
 0x26c   : > { %v7155_v21 = vadd.f32 %v5017_v16, %v7039_v1  ;;  %v5020_v51 = vadd.f32 %v5019_v24, %v5018_v43 }
 0x26e   : > { %v7158_v31 = vadd.f32 %v5020_v51, %v7042_v62  ;;  %v5109_v13 = vpop.f32.mrb[64].mxu1 }
 0x26f   : > { %v5110_v35 = vpop.f32.mrb[65].mxu1 }
 0x270   : > { %v5021_v57 = vpop.f32.mrb[96].mxu0  ;;  %v5111_v50 = vadd.f32 %v5110_v35, %v5109_v13  ;;  %v5112_v6 = vpop.f32.mrb[66].mxu1 }
 0x271   : > { %v5022_v41 = vpop.f32.mrb[97].mxu0  ;;  %v5113_v47 = vpop.f32.mrb[67].mxu1 }
 0x272   : > { %v5023_v36 = vadd.f32 %v5022_v41, %v5021_v57  ;;  %v5024_v40 = vpop.f32.mrb[98].mxu0  ;;  %v5114_v54 = vadd.f32 %v5113_v47, %v5112_v6  ;;  %v7161_v42 = vadd.f32 %v7057_v25, %v5111_v50 }
 0x273   : > { %v5025_v58 = vpop.f32.mrb[99].mxu0 }
 0x274   : > { %v7164_v1 = vadd.f32 %v5023_v36, %v7050_v10  ;;  %v5026_v5 = vadd.f32 %v5025_v58, %v5024_v40  ;;  %v7167_v62 = vadd.f32 %v7062_v32, %v5114_v54 }
 0x276   : > { %v7170_v39 = vadd.f32 %v5026_v5, %v7053_v12  ;;  %v5115_v44 = vpop.f32.mrb[68].mxu1 }
 0x277   : > { %v5116_v2 = vpop.f32.mrb[69].mxu1 }
 0x278   : > { %v5027_v63 = vpop.f32.mrb[100].mxu0  ;;  %v5117_v14 = vadd.f32 %v5116_v2, %v5115_v44  ;;  %v5118_v55 = vpop.f32.mrb[70].mxu1 }
 0x279   : > { %v5028_v27 = vpop.f32.mrb[101].mxu0  ;;  %v5119_v52 = vpop.f32.mrb[71].mxu1 }
 0x27a   : > { %v5029_v25 = vadd.f32 %v5028_v27, %v5027_v63  ;;  %v5030_v15 = vpop.f32.mrb[102].mxu0  ;;  %v5120_v49 = vadd.f32 %v5119_v52, %v5118_v55  ;;  %v7173_v10 = vadd.f32 %v7074_v26, %v5117_v14  ;;  %v7187_v26 = vld [vmem:[%s7503_s7] sm:$0xff]  }
 0x27b   : > { %v5031_v59 = vpop.f32.mrb[103].mxu0  ;;  %5517 = vmatprep.subr.bf16.mxu1 %v7187_v26 }
 0x27c   : > { %v7176_v32 = vadd.f32 %v5029_v25, %v7067_v23  ;;  %v5032_v3 = vadd.f32 %v5031_v59, %v5030_v15  ;;  %v7179_v12 = vadd.f32 %v7079_v34, %v5120_v49 }
 0x27e   : > { %v7182_v61 = vadd.f32 %v5032_v3, %v7070_v48  ;;  %v5121_v16 = vpop.f32.mrb[72].mxu1 }
 0x27f   : > { %v5122_v43 = vpop.f32.mrb[73].mxu1 }
 0x280   : > { %v5033_v24 = vpop.f32.mrb[104].mxu0  ;;  %v5123_v51 = vadd.f32 %v5122_v43, %v5121_v16  ;;  %v5124_v13 = vpop.f32.mrb[74].mxu1 }
 0x281   : > { %v5034_v35 = vpop.f32.mrb[105].mxu0  ;;  %v5125_v23 = vpop.f32.mrb[75].mxu1 }
 0x282   : > { %v5035_v57 = vadd.f32 %v5034_v35, %v5033_v24  ;;  %v5036_v50 = vpop.f32.mrb[106].mxu0  ;;  %v5126_v6 = vadd.f32 %v5125_v23, %v5124_v13  ;;  %v7190_v34 = vadd.f32 %v7088_v20, %v5123_v51 }
 0x283   : > { %v5037_v48 = vpop.f32.mrb[107].mxu0 }
 0x284   : > { %v7194_v41 = vadd.f32 %v5035_v57, %v7081_v22  ;;  %v5038_v47 = vadd.f32 %v5037_v48, %v5036_v50  ;;  %v7197_v36 = vadd.f32 %v7093_v29, %v5126_v6 }
 0x286   : > { %v7200_v40 = vadd.f32 %v5038_v47, %v7084_v56  ;;  %v5127_v54 = vpop.f32.mrb[76].mxu1 }
 0x287   : > { %v5128_v58 = vpop.f32.mrb[77].mxu1 }
 0x288   : > { %v5039_v5 = vpop.f32.mrb[108].mxu0  ;;  %v5129_v44 = vadd.f32 %v5128_v58, %v5127_v54  ;;  %v5130_v2 = vpop.f32.mrb[78].mxu1 }
 0x289   : > { %v5040_v20 = vpop.f32.mrb[109].mxu0  ;;  %v5131_v63 = vpop.f32.mrb[79].mxu1 }
 0x28a   : > { %v5041_v14 = vadd.f32 %v5040_v20, %v5039_v5  ;;  %v5042_v55 = vpop.f32.mrb[110].mxu0  ;;  %v5132_v27 = vadd.f32 %v5131_v63, %v5130_v2  ;;  %v7203_v22 = vadd.f32 %v7105_v37, %v5129_v44 }
 0x28b   : > { %v5043_v52 = vpop.f32.mrb[111].mxu0 }
 0x28c   : > { %v7206_v29 = vadd.f32 %v5041_v14, %v7098_v8  ;;  %v5044_v25 = vadd.f32 %v5043_v52, %v5042_v55  ;;  %v7209_v56 = vadd.f32 %v7110_v33, %v5132_v27 }
 0x28e   : > { %v7212_v15 = vadd.f32 %v5044_v25, %v7101_v11  ;;  %v5133_v49 = vpop.f32.mrb[80].mxu1 }
 0x28f   : > { %v5134_v59 = vpop.f32.mrb[81].mxu1 }
 0x290   : > { %v5045_v3 = vpop.f32.mrb[112].mxu0  ;;  %v5135_v16 = vadd.f32 %v5134_v59, %v5133_v49  ;;  %v5136_v43 = vpop.f32.mrb[82].mxu1 }
 0x291   : > { %v5046_v24 = vpop.f32.mrb[113].mxu0  ;;  %v5137_v51 = vpop.f32.mrb[83].mxu1 }
 0x292   : > { %v5047_v37 = vadd.f32 %v5046_v24, %v5045_v3  ;;  %v5048_v13 = vpop.f32.mrb[114].mxu0  ;;  %v5138_v35 = vadd.f32 %v5137_v51, %v5136_v43  ;;  %v7215_v8 = vadd.f32 %v7119_v38, %v5135_v16 }
 0x293   : > { %v5049_v23 = vpop.f32.mrb[115].mxu0 }
 0x294   : > { %v7218_v33 = vadd.f32 %v5047_v37, %v7113_v19  ;;  %v5050_v57 = vadd.f32 %v5049_v23, %v5048_v13  ;;  %v7221_v11 = vadd.f32 %v7122_v17, %v5138_v35 }
 0x296   : > { %v7224_v50 = vadd.f32 %v5050_v57, %v7116_v60  ;;  %v5139_v6 = vpop.f32.mrb[84].mxu1 }
 0x297   : > { %v5140_v48 = vpop.f32.mrb[85].mxu1 }
 0x298   : > { %v5051_v47 = vpop.f32.mrb[116].mxu0  ;;  %v5141_v54 = vadd.f32 %v5140_v48, %v5139_v6  ;;  %v5142_v58 = vpop.f32.mrb[86].mxu1 }
 0x299   : > { %v5052_v5 = vpop.f32.mrb[117].mxu0  ;;  %v5143_v44 = vpop.f32.mrb[87].mxu1 }
 0x29a   : > { %v5053_v38 = vadd.f32 %v5052_v5, %v5051_v47  ;;  %v5054_v2 = vpop.f32.mrb[118].mxu0  ;;  %v5144_v20 = vadd.f32 %v5143_v44, %v5142_v58  ;;  %v7227_v19 = vadd.f32 %v7132_v18, %v5141_v54 }
 0x29b   : > { %v5055_v63 = vpop.f32.mrb[119].mxu0 }
 0x29c   : > { %v7230_v17 = vadd.f32 %v5053_v38, %v7127_v28  ;;  %v5056_v14 = vadd.f32 %v5055_v63, %v5054_v2  ;;  %v7233_v60 = vadd.f32 %v7135_v45, %v5144_v20 }
 0x29e   : > { %v7236_v55 = vadd.f32 %v5056_v14, %v7129_v9  ;;  %v5145_v27 = vpop.f32.mrb[88].mxu1 }
 0x29f   : > { %v5146_v52 = vpop.f32.mrb[89].mxu1 }
 0x2a0   : > { %v5057_v25 = vpop.f32.mrb[120].mxu0  ;;  %v5147_v49 = vadd.f32 %v5146_v52, %v5145_v27  ;;  %v5148_v59 = vpop.f32.mrb[90].mxu1 }
 0x2a1   : > { %v5058_v3 = vpop.f32.mrb[121].mxu0  ;;  %v5149_v16 = vpop.f32.mrb[91].mxu1 }
 0x2a2   : > { %v5059_v18 = vadd.f32 %v5058_v3, %v5057_v25  ;;  %v5060_v43 = vpop.f32.mrb[122].mxu0  ;;  %v5150_v24 = vadd.f32 %v5149_v16, %v5148_v59  ;;  %v7239_v28 = vadd.f32 %v7142_v7, %v5147_v49 }
 0x2a3   : > { %v5061_v51 = vpop.f32.mrb[123].mxu0 }
 0x2a4   : > { %v7242_v45 = vadd.f32 %v5059_v18, %v7137_v46  ;;  %v5062_v37 = vadd.f32 %v5061_v51, %v5060_v43  ;;  %v7245_v9 = vadd.f32 %v7145_v30, %v5150_v24 }
 0x2a6   : > { %v7248_v13 = vadd.f32 %v5062_v37, %v7139_v0  ;;  %v5151_v35 = vpop.f32.mrb[92].mxu1 }
 0x2a7   : > { %v5152_v23 = vpop.f32.mrb[93].mxu1 }
 0x2a8   : > { %v5063_v57 = vpop.f32.mrb[124].mxu0  ;;  %v5153_v6 = vadd.f32 %v5152_v23, %v5151_v35  ;;  %v5154_v48 = vpop.f32.mrb[94].mxu1 }
 0x2a9   : > { %v5064_v47 = vpop.f32.mrb[125].mxu0  ;;  %v5155_v54 = vpop.f32.mrb[95].mxu1 }
 0x2aa   : > { %v5065_v7 = vadd.f32 %v5064_v47, %v5063_v57  ;;  %v5066_v58 = vpop.f32.mrb[126].mxu0  ;;  %v5156_v5 = vadd.f32 %v5155_v54, %v5154_v48  ;;  %v7251_v46 = vadd.f32 %v7155_v21, %v5153_v6 }
 0x2ab   : > { %v5067_v44 = vpop.f32.mrb[127].mxu0 }
 0x2ac   : > { %v7254_v30 = vadd.f32 %v5065_v7, %v7150_v4  ;;  %v5068_v38 = vadd.f32 %v5067_v44, %v5066_v58  ;;  %v7257_v0 = vadd.f32 %v7158_v31, %v5156_v5 }
 0x2ae   : > { %v7260_v2 = vadd.f32 %v5068_v38, %v7152_v53  ;;  %v5157_v20 = vpop.f32.mrb[96].mxu1 }
 0x2af   : > { %v5158_v63 = vpop.f32.mrb[97].mxu1 }
 0x2b0   : > { %v5159_v14 = vadd.f32 %v5158_v63, %v5157_v20  ;;  %v5160_v27 = vpop.f32.mrb[98].mxu1 }
 0x2b1   : > { %v5161_v52 = vpop.f32.mrb[99].mxu1 }
 0x2b2   : > { %v5162_v25 = vadd.f32 %v5161_v52, %v5160_v27  ;;  %v7263_v21 = vadd.f32 %v7164_v1, %v5159_v14 }
 0x2b4   : > { %v7266_v49 = vadd.f32 %v7170_v39, %v5162_v25 }
 0x2b6   : > { %v5163_v4 = vpop.f32.mrb[100].mxu1 }
 0x2b7   : > { %v5164_v59 = vpop.f32.mrb[101].mxu1 }
 0x2b8   : > { %v5165_v3 = vadd.f32 %v5164_v59, %v5163_v4  ;;  %v5166_v31 = vpop.f32.mrb[102].mxu1 }
 0x2b9   : > { %v5167_v16 = vpop.f32.mrb[103].mxu1 }
 0x2ba   : > { %v5168_v18 = vadd.f32 %v5167_v16, %v5166_v31  ;;  %v7269_v53 = vadd.f32 %v7176_v32, %v5165_v3 }
 0x2bc   : > { %v7272_v43 = vadd.f32 %v7182_v61, %v5168_v18 }
 0x2be   : > { %v5169_v24 = vpop.f32.mrb[104].mxu1 }
 0x2bf   : > { %v5170_v51 = vpop.f32.mrb[105].mxu1 }
 0x2c0   : > { %v5171_v37 = vadd.f32 %v5170_v51, %v5169_v24  ;;  %v5172_v1 = vpop.f32.mrb[106].mxu1 }
 0x2c1   : > { %v5173_v35 = vpop.f32.mrb[107].mxu1 }
 0x2c2   : > { %v5174_v23 = vadd.f32 %v5173_v35, %v5172_v1  ;;  %v7275_v39 = vadd.f32 %v7194_v41, %v5171_v37 }
 0x2c4   : > { %v7278_v57 = vadd.f32 %v7200_v40, %v5174_v23 }
 0x2c6   : > { %v5175_v6 = vpop.f32.mrb[108].mxu1 }
 0x2c7   : > { %v5176_v48 = vpop.f32.mrb[109].mxu1 }
 0x2c8   : > { %v5177_v47 = vadd.f32 %v5176_v48, %v5175_v6  ;;  %v5178_v32 = vpop.f32.mrb[110].mxu1 }
 0x2c9   : > { %v5179_v54 = vpop.f32.mrb[111].mxu1 }
 0x2ca   : > { %v5180_v7 = vadd.f32 %v5179_v54, %v5178_v32  ;;  %v7281_v61 = vadd.f32 %v7206_v29, %v5177_v47 }
 0x2cc   : > { %v7284_v58 = vadd.f32 %v7212_v15, %v5180_v7 }
 0x2ce   : > { %v5181_v5 = vpop.f32.mrb[112].mxu1 }
 0x2cf   : > { %v5182_v44 = vpop.f32.mrb[113].mxu1 }
 0x2d0   : > { %v5183_v38 = vadd.f32 %v5182_v44, %v5181_v5  ;;  %v5184_v41 = vpop.f32.mrb[114].mxu1 }
 0x2d1   : > { %v5185_v20 = vpop.f32.mrb[115].mxu1 }
 0x2d2   : > { %v5186_v63 = vadd.f32 %v5185_v20, %v5184_v41  ;;  %v7287_v40 = vadd.f32 %v7218_v33, %v5183_v38 }
 0x2d4   : > { %v7290_v14 = vadd.f32 %v7224_v50, %v5186_v63 }
 0x2d6   : > { %v5187_v27 = vpop.f32.mrb[116].mxu1 }
 0x2d7   : > { %v5188_v52 = vpop.f32.mrb[117].mxu1 }
 0x2d8   : > { %v5189_v25 = vadd.f32 %v5188_v52, %v5187_v27  ;;  %v5190_v29 = vpop.f32.mrb[118].mxu1 }
 0x2d9   : > { %v5191_v4 = vpop.f32.mrb[119].mxu1 }
 0x2da   : > { %v5192_v59 = vadd.f32 %v5191_v4, %v5190_v29  ;;  %v7293_v15 = vadd.f32 %v7230_v17, %v5189_v25 }
 0x2dc   : > { %v7296_v3 = vadd.f32 %v7236_v55, %v5192_v59 }
 0x2de   : > { %v5193_v31 = vpop.f32.mrb[120].mxu1 }
 0x2df   : > { %v5194_v16 = vpop.f32.mrb[121].mxu1 }
 0x2e0   : > { %v5195_v18 = vadd.f32 %v5194_v16, %v5193_v31  ;;  %v5196_v33 = vpop.f32.mrb[122].mxu1 }
 0x2e1   : > { %v5197_v24 = vpop.f32.mrb[123].mxu1 }
 0x2e2   : > { %v5198_v51 = vadd.f32 %v5197_v24, %v5196_v33  ;;  %v7299_v50 = vadd.f32 %v7242_v45, %v5195_v18  ;;  %v7313_v45 = vld [vmem:[%s7500_s4] ss:$0 sm:$0xff]  ;;  %v5935_v24 = vld [vmem:[%s7503_s7 + $0x8] sm:$0xff]  }
 0x2e4   : > { %v7302_v37 = vadd.f32 %v7248_v13, %v5198_v51 }
 0x2e6   : > { %v5199_v1 = vpop.f32.mrb[124].mxu1 }
 0x2e7   : > { %v5200_v35 = vpop.f32.mrb[125].mxu1 }
 0x2e8   : > { %v5201_v23 = vadd.f32 %v5200_v35, %v5199_v1  ;;  %v5202_v17 = vpop.f32.mrb[126].mxu1 }
 0x2e9   : > { %v5203_v6 = vpop.f32.mrb[127].mxu1 }
 0x2ea   : > { %v5204_v48 = vadd.f32 %v5203_v6, %v5202_v17  ;;  %v7305_v55 = vadd.f32 %v7254_v30, %v5201_v23 }
 0x2ec   : > { %v7308_v47 = vadd.f32 %v7260_v2, %v5204_v48 }
 0x2f0   : > { %v5439_v32 = vpop.f32.mrb[32].mxu0 }
 0x2f1   : > { %v5567_v13 = vadd.f32 %v7173_v10, %v5439_v32  ;;  %v3567_v54 = vpop.f32.mrb[33].mxu0 }
 0x2f2   : > { %v5570_v7 = vadd.f32 %v7161_v42, %v3567_v54  ;;  %v5440_v5 = vpop.f32.mrb[34].mxu0 }
 0x2f3   : > { %v3735_v44 = vadd.f32 %v5567_v13, %v7313_v45  ;;  %v5573_v30 = vadd.f32 %v7179_v12, %v5440_v5  ;;  %v3570_v38 = vpop.f32.mrb[35].mxu0 }
 0x2f4   : > { %v3733_v2 = vadd.f32 %v5570_v7, %v7313_v45  ;;  %v5576_v41 = vadd.f32 %v7167_v62, %v3570_v38  ;;  %v5937_v38 = vld [vmem:[%s7503_s7 + $0x18] sm:$0xff]  }
 0x2f5   : > { %v3736_v20 = vadd.f32 %v5573_v30, %v7313_v45  ;;  %v3767_v27 = vmax.f32 %v3735_v44, 0.0 }
 0x2f6   : > { %v3734_v63 = vadd.f32 %v5576_v41, %v7313_v45  ;;  %v3765_v10 = vmax.f32 %v3733_v2, 0.0 }
 0x2f7   : > { %v3768_v52 = vmax.f32 %v3736_v20, 0.0 }
 0x2f8   : > { %v3766_v25 = vmax.f32 %v3734_v63, 0.0  ;;  %v5443_v29 = vpop.f32.mrb[36].mxu0 }
 0x2f9   : > { %v3798_v42 = vpack.c.bf16 %v3768_v52, %v3767_v27  ;;  %v5579_v4 = vadd.f32 %v7203_v22, %v5443_v29  ;;  %v3583_v59 = vpop.f32.mrb[37].mxu0 }
 0x2fa   : > { %v5582_v12 = vadd.f32 %v7190_v34, %v3583_v59  ;;  %v5444_v31 = vpop.f32.mrb[38].mxu0  ;;  %v3797_v16 = vpack.c.bf16 %v3766_v25, %v3765_v10 }
 0x2fb   : > { %v3739_v18 = vadd.f32 %v5579_v4, %v7313_v45  ;;  %v5585_v62 = vadd.f32 %v7209_v56, %v5444_v31  ;;  %v3586_v33 = vpop.f32.mrb[39].mxu0  ;;  %v5936_v56 = vld [vmem:[%s7503_s7 + $0x10] sm:$0xff]  }
 0x2fc   : > { %v3737_v51 = vadd.f32 %v5582_v12, %v7313_v45  ;;  %v5588_v1 = vadd.f32 %v7197_v36, %v3586_v33  ;;  %5485 = vmatprep.mubr.bf16.mxu1 %v3797_v16 }
 0x2fd   : > { %v3740_v22 = vadd.f32 %v5585_v62, %v7313_v45  ;;  %5486 = vmatmul.mubr.bf16.vlgmr.msra.gmra.mrb[128].mxu1 %v3798_v42  ;;  %v3771_v35 = vmax.f32 %v3739_v18, 0.0  ;;  %v5939_v18 = vld [vmem:[%s7503_s7 + $0x28] sm:$0xff]  }
 0x2fe   : > { %v3738_v34 = vadd.f32 %v5588_v1, %v7313_v45  ;;  %5518 = vmatpush3.bf16.msra.mxu1 %v7187_v26  ;;  %v3769_v17 = vmax.f32 %v3737_v51, 0.0 }
 0x2ff   : > { %v3772_v23 = vmax.f32 %v3740_v22, 0.0  ;;  %5519 = vmatprep.subr.bf16.mxu1 %v5935_v24 }
 0x300   : > { %v3770_v6 = vmax.f32 %v3738_v34, 0.0  ;;  %v5447_v48 = vpop.f32.mrb[40].mxu0 }
 0x301   : > { %v5591_v36 = vadd.f32 %v7227_v19, %v5447_v48  ;;  %v3599_v32 = vpop.f32.mrb[41].mxu0  ;;  %v3800_v13 = vpack.c.bf16 %v3772_v23, %v3771_v35 }
 0x302   : > { %v5594_v54 = vadd.f32 %v7215_v8, %v3599_v32  ;;  %v5448_v7 = vpop.f32.mrb[42].mxu0  ;;  %v3799_v5 = vpack.c.bf16 %v3770_v6, %v3769_v17  ;;  %5520 = vmatpush3.bf16.msra.mxu1 %v5935_v24 }
 0x303   : > { %v3743_v26 = vadd.f32 %v5591_v36, %v7313_v45  ;;  %v5597_v44 = vadd.f32 %v7233_v60, %v5448_v7  ;;  %v3602_v30 = vpop.f32.mrb[43].mxu0  ;;  %5521 = vmatprep.subr.bf16.mxu1 %v5936_v56  ;;  %v5938_v60 = vld [vmem:[%s7503_s7 + $0x20] sm:$0xff]  }
 0x304   : > { %v3741_v2 = vadd.f32 %v5594_v54, %v7313_v45  ;;  %v5600_v19 = vadd.f32 %v7221_v11, %v3602_v30  ;;  %5489 = vmatprep.mubr.bf16.mxu1 %v3799_v5 }
 0x305   : > { %v3744_v8 = vadd.f32 %v5597_v44, %v7313_v45  ;;  %5490 = vmatmul.mubr.bf16.gmra.mrb[132].mxu1 %v3800_v13  ;;  %v3775_v20 = vmax.f32 %v3743_v26, 0.0  ;;  %v5941_v13 = vld [vmem:[%s7503_s7 + $0x38] sm:$0xff]  }
 0x306   : > { %v3742_v41 = vadd.f32 %v5600_v19, %v7313_v45  ;;  %5522 = vmatpush3.bf16.msra.mxu1 %v5936_v56  ;;  %v3773_v27 = vmax.f32 %v3741_v2, 0.0 }
 0x307   : > { %v3776_v63 = vmax.f32 %v3744_v8, 0.0  ;;  %5523 = vmatprep.subr.bf16.mxu1 %v5937_v38 }
 0x308   : > { %v3774_v52 = vmax.f32 %v3742_v41, 0.0  ;;  %v5451_v10 = vpop.f32.mrb[44].mxu0 }
 0x309   : > { %v5603_v25 = vadd.f32 %v7251_v46, %v5451_v10  ;;  %v3615_v11 = vpop.f32.mrb[45].mxu0  ;;  %v3802_v29 = vpack.c.bf16 %v3776_v63, %v3775_v20 }
 0x30a   : > { %v5606_v42 = vadd.f32 %v7239_v28, %v3615_v11  ;;  %v5452_v4 = vpop.f32.mrb[46].mxu0  ;;  %v3801_v59 = vpack.c.bf16 %v3774_v52, %v3773_v27  ;;  %5524 = vmatpush3.bf16.msra.mxu1 %v5937_v38 }
 0x30b   : > { %v3747_v12 = vadd.f32 %v5603_v25, %v7313_v45  ;;  %v5609_v31 = vadd.f32 %v7257_v0, %v5452_v4  ;;  %v3618_v16 = vpop.f32.mrb[47].mxu0  ;;  %5525 = vmatprep.subr.bf16.mxu1 %v5938_v60  ;;  %v5940_v0 = vld [vmem:[%s7503_s7 + $0x30] sm:$0xff]  }
 0x30c   : > { %v3745_v62 = vadd.f32 %v5606_v42, %v7313_v45  ;;  %v5612_v46 = vadd.f32 %v7245_v9, %v3618_v16  ;;  %5493 = vmatprep.mubr.bf16.mxu1 %v3801_v59 }
 0x30d   : > { %v3748_v28 = vadd.f32 %v5609_v31, %v7313_v45  ;;  %5494 = vmatmul.mubr.bf16.gmra.mrb[136].mxu1 %v3802_v29  ;;  %v3779_v24 = vmax.f32 %v3747_v12, 0.0 }
 0x30e   : > { %v3746_v33 = vadd.f32 %v5612_v46, %v7313_v45  ;;  %5526 = vmatpush3.bf16.msra.mxu1 %v5938_v60  ;;  %v3777_v1 = vmax.f32 %v3745_v62, 0.0 }
 0x30f   : > { %v3780_v51 = vmax.f32 %v3748_v28, 0.0  ;;  %5527 = vmatprep.subr.bf16.mxu1 %v5939_v18 }
 0x310   : > { %v3778_v22 = vmax.f32 %v3746_v33, 0.0  ;;  %v5455_v34 = vpop.f32.mrb[48].mxu0 }
 0x311   : > { %v5615_v35 = vadd.f32 %v7269_v53, %v5455_v34  ;;  %v3631_v9 = vpop.f32.mrb[49].mxu0  ;;  %v3804_v23 = vpack.c.bf16 %v3780_v51, %v3779_v24 }
 0x312   : > { %v5618_v56 = vadd.f32 %v7263_v21, %v3631_v9  ;;  %v5456_v17 = vpop.f32.mrb[50].mxu0  ;;  %v3803_v6 = vpack.c.bf16 %v3778_v22, %v3777_v1  ;;  %5528 = vmatpush3.bf16.msra.mxu1 %v5939_v18 }
 0x313   : > { %v3751_v48 = vadd.f32 %v5615_v35, %v7313_v45  ;;  %v5621_v36 = vadd.f32 %v7272_v43, %v5456_v17  ;;  %v3634_v32 = vpop.f32.mrb[51].mxu0  ;;  %5529 = vmatprep.subr.bf16.mxu1 %v5940_v0 }
 0x314   : > { %v3749_v54 = vadd.f32 %v5618_v56, %v7313_v45  ;;  %v5624_v53 = vadd.f32 %v7266_v49, %v3634_v32  ;;  %5497 = vmatprep.mubr.bf16.mxu1 %v3803_v6 }
 0x315   : > { %v3752_v21 = vadd.f32 %v5621_v36, %v7313_v45  ;;  %5498 = vmatmul.mubr.bf16.gmra.mrb[140].mxu1 %v3804_v23  ;;  %v3783_v5 = vmax.f32 %v3751_v48, 0.0 }
 0x316   : > { %v3750_v7 = vadd.f32 %v5624_v53, %v7313_v45  ;;  %5530 = vmatpush3.bf16.msra.mxu1 %v5940_v0  ;;  %v3781_v43 = vmax.f32 %v3749_v54, 0.0 }
 0x317   : > { %v3784_v26 = vmax.f32 %v3752_v21, 0.0  ;;  %5531 = vmatprep.subr.bf16.mxu1 %v5941_v13  ;;  %v5942_v21 = vld [vmem:[%s6041_s20] sm:$0xff]  }
 0x318   : > { %v3782_v44 = vmax.f32 %v3750_v7, 0.0  ;;  %v5459_v30 = vpop.f32.mrb[52].mxu0  ;;  %v5944_v7 = vld [vmem:[%s6041_s20 + $0x10] sm:$0xff]  }
 0x319   : > { %v5627_v38 = vadd.f32 %v7281_v61, %v5459_v30  ;;  %v3647_v2 = vpop.f32.mrb[53].mxu0  ;;  %v3806_v19 = vpack.c.bf16 %v3784_v26, %v3783_v5  ;;  %v5946_v5 = vld [vmem:[%s6041_s20 + $0x20] sm:$0xff]   ;;  %v5947_v26 = vld [vmem:[%s6041_s20 + $0x28] sm:$0xff]  }
 0x31a   : > { %v5630_v8 = vadd.f32 %v7275_v39, %v3647_v2  ;;  %v5460_v49 = vpop.f32.mrb[54].mxu0  ;;  %v3805_v41 = vpack.c.bf16 %v3782_v44, %v3781_v43  ;;  %5532 = vmatpush3.bf16.msra.mxu1 %v5941_v13  ;;  %v5948_v43 = vld [vmem:[%s6041_s20 + $0x30] sm:$0xff]   ;;  %v5949_v44 = vld [vmem:[%s6041_s20 + $0x38] sm:$0xff]   ;;  %v5950_v30 = vld [vmem:[%s6041_s20 + $0x40] sm:$0xff]  }
 0x31b   : > { %v3755_v20 = vadd.f32 %v5627_v38, %v7313_v45  ;;  %v5633_v63 = vadd.f32 %v7284_v58, %v5460_v49  ;;  %v3650_v60 = vpop.f32.mrb[55].mxu0  ;;  %v5951_v38 = vld [vmem:[%s6041_s20 + $0x48] sm:$0xff]   ;;  %v5952_v2 = vld [vmem:[%s6041_s20 + $0x50] sm:$0xff]  }
 0x31c   : > { %v3753_v27 = vadd.f32 %v5630_v8, %v7313_v45  ;;  %v5636_v52 = vadd.f32 %v7278_v57, %v3650_v60  ;;  %5501 = vmatprep.mubr.bf16.mxu1 %v3805_v41  ;;  %v5954_v8 = vld [vmem:[%s6041_s20 + $0x60] sm:$0xff]   ;;  %v5955_v49 = vld [vmem:[%s6041_s20 + $0x68] sm:$0xff]   ;;  %v5956_v41 = vld [vmem:[%s6041_s20 + $0x70] sm:$0xff]  }
 0x31d   : > { %v3756_v10 = vadd.f32 %v5633_v63, %v7313_v45  ;;  %5502 = vmatmul.mubr.bf16.gmra.mrb[144].mxu1 %v3806_v19  ;;  %v3787_v25 = vmax.f32 %v3755_v20, 0.0  ;;  %v5953_v19 = vld [vmem:[%s6041_s20 + $0x58] sm:$0xff]   ;;  %v4759_v63 = vld [vmem:[%s7502_s6] ss:$0 sm:$0xff] }
 0x31e   : > { %v3754_v61 = vadd.f32 %v5636_v52, %v7313_v45  ;;  %v3785_v11 = vmax.f32 %v3753_v27, 0.0  ;;  %v5957_v20 = vld [vmem:[%s6041_s20 + $0x78] sm:$0xff]   ;;  %v4768_v60 = vld [vmem:[%s7504_s8] ss:$0 sm:$0xff] }
 0x31f   : > { %v3788_v39 = vmax.f32 %v3756_v10, 0.0  ;;  %v7423_v27 = vadd.f32 %v4768_v60, %v4759_v63 }
 0x320   : > { %v3786_v29 = vmax.f32 %v3754_v61, 0.0  ;;  %v5463_v42 = vpop.f32.mrb[56].mxu0 }
 0x321   : > { %v5639_v4 = vadd.f32 %v7293_v15, %v5463_v42  ;;  %v3663_v59 = vpop.f32.mrb[57].mxu0  ;;  %v3808_v58 = vpack.c.bf16 %v3788_v39, %v3787_v25 }
 0x322   : > { %v5642_v12 = vadd.f32 %v7287_v40, %v3663_v59  ;;  %v5464_v31 = vpop.f32.mrb[58].mxu0  ;;  %v3807_v16 = vpack.c.bf16 %v3786_v29, %v3785_v11 }
 0x323   : > { %v3759_v57 = vadd.f32 %v5639_v4, %v7313_v45  ;;  %v5645_v18 = vadd.f32 %v7296_v3, %v5464_v31  ;;  %v3666_v62 = vpop.f32.mrb[59].mxu0 }
 0x324   : > { %v3757_v46 = vadd.f32 %v5642_v12, %v7313_v45  ;;  %v5648_v28 = vadd.f32 %v7290_v14, %v3666_v62  ;;  %5505 = vmatprep.mubr.bf16.mxu1 %v3807_v16 }
 0x325   : > { %v3760_v33 = vadd.f32 %v5645_v18, %v7313_v45  ;;  %5506 = vmatmul.mubr.bf16.gmra.mrb[148].mxu1 %v3808_v58  ;;  %v3791_v24 = vmax.f32 %v3759_v57, 0.0 }
 0x326   : > { %v3758_v15 = vadd.f32 %v5648_v28, %v7313_v45  ;;  %v3789_v40 = vmax.f32 %v3757_v46, 0.0 }
 0x327   : > { %v3792_v51 = vmax.f32 %v3760_v33, 0.0 }
 0x328   : > { %v3790_v0 = vmax.f32 %v3758_v15, 0.0  ;;  %v5467_v1 = vpop.f32.mrb[60].mxu0 }
 0x329   : > { %v5651_v22 = vadd.f32 %v7305_v55, %v5467_v1  ;;  %v3679_v34 = vpop.f32.mrb[61].mxu0  ;;  %v3810_v3 = vpack.c.bf16 %v3792_v51, %v3791_v24 }
 0x32a   : > { %v5654_v35 = vadd.f32 %v7299_v50, %v3679_v34  ;;  %v5468_v9 = vpop.f32.mrb[62].mxu0  ;;  %v3809_v23 = vpack.c.bf16 %v3790_v0, %v3789_v40 }
 0x32b   : > { %v3763_v14 = vadd.f32 %v5651_v22, %v7313_v45  ;;  %v5657_v56 = vadd.f32 %v7308_v47, %v5468_v9  ;;  %v3682_v17 = vpop.f32.mrb[63].mxu0 }
 0x32c   : > { %v3761_v6 = vadd.f32 %v5654_v35, %v7313_v45  ;;  %v5660_v48 = vadd.f32 %v7302_v37, %v3682_v17  ;;  %5509 = vmatprep.mubr.bf16.mxu1 %v3809_v23  ;;  %v5943_v37 = vld [vmem:[%s6041_s20 + $0x8] sm:$0xff]  }
 0x32d   : > { %v3764_v55 = vadd.f32 %v5657_v56, %v7313_v45  ;;  %5510 = vmatmul.mubr.bf16.gmra.mrb[152].mxu1 %v3810_v3  ;;  %v3795_v36 = vmax.f32 %v3763_v14, 0.0 }
 0x32e   : > { %v3762_v50 = vadd.f32 %v5660_v48, %v7313_v45  ;;  %v3793_v13 = vmax.f32 %v3761_v6, 0.0  ;;  %v5945_v45 = vld [vmem:[%s6041_s20 + $0x18] sm:$0xff]  }
 0x32f   : > { %v3796_v32 = vmax.f32 %v3764_v55, 0.0 }
 0x330   : > { %v3794_v47 = vmax.f32 %v3762_v50, 0.0 }
 0x331   : > { %v3812_v54 = vpack.c.bf16 %v3796_v32, %v3795_v36 }
 0x332   : > { %v3811_v53 = vpack.c.bf16 %v3794_v47, %v3793_v13 }
 0x334   : > { %5513 = vmatprep.mubr.bf16.mxu1 %v3811_v53 }
 0x335   : > { %5514 = vmatmul.mubr.bf16.gmra.mrb[156].mxu1 %v3812_v54 }
 0x336   : > { %5533 = vmatprep.mubr.bf16.mxu1 %v5942_v21 }
 0x33d   : > { %5534 = vmatmul.mubr.bf16.vlgmr.msra.gmra.mrb[128].mxu1 %v5943_v37 }
 0x33e   : > { %5537 = vmatprep.mubr.bf16.mxu1 %v5944_v7 }
 0x345   : > { %5538 = vmatmul.mubr.bf16.gmra.mrb[132].mxu1 %v5945_v45 }
 0x346   : > { %5541 = vmatprep.mubr.bf16.mxu1 %v5946_v5 }
 0x34d   : > { %5542 = vmatmul.mubr.bf16.gmra.mrb[136].mxu1 %v5947_v26 }
 0x34e   : > { %5545 = vmatprep.mubr.bf16.mxu1 %v5948_v43 }
 0x355   : > { %5546 = vmatmul.mubr.bf16.gmra.mrb[140].mxu1 %v5949_v44 }
 0x356   : > { %5549 = vmatprep.mubr.bf16.mxu1 %v5950_v30 }
 0x35d   : > { %5550 = vmatmul.mubr.bf16.gmra.mrb[144].mxu1 %v5951_v38 }
 0x35e   : > { %5553 = vmatprep.mubr.bf16.mxu1 %v5952_v2 }
 0x365   : > { %5554 = vmatmul.mubr.bf16.gmra.mrb[148].mxu1 %v5953_v19 }
 0x366   : > { %5557 = vmatprep.mubr.bf16.mxu1 %v5954_v8 }
 0x36d   : > { %5558 = vmatmul.mubr.bf16.gmra.mrb[152].mxu1 %v5955_v49 }
 0x36e   : > { %5561 = vmatprep.mubr.bf16.mxu1 %v5956_v41 }
 0x375   : > { %5562 = vmatmul.mubr.bf16.gmra.mrb[156].mxu1 %v5957_v20 }
 0x410   : > { %v5535_v52 = vpop.f32.mrb[128].mxu1 }
 0x411   : > { %v5661_v10 = vadd.f32 %v5535_v52, %v4759_v63  ;;  %v4278_v61 = vpop.f32.mrb[129].mxu1 }
 0x412   : > { %v5663_v25 = vadd.f32 %v4759_v63, %v4278_v61  ;;  %v5536_v39 = vpop.f32.mrb[130].mxu1 }
 0x413   : > { %v5662_v11 = vadd.f32 %v5661_v10, %v4768_v60  ;;  %v5666_v29 = vadd.f32 %v7423_v27, %v5536_v39  ;;  %v4281_v42 = vpop.f32.mrb[131].mxu1 }
 0x414   : > { %v5664_v4 = vadd.f32 %v5663_v25, %v4768_v60  ;;  %v5668_v59 = vadd.f32 %v7423_v27, %v4281_v42 }
 0x415   : > { %v4439_v58 = vmax.f32 %v5662_v11, 0.0  ;;  %v4440_v12 = vmax.f32 %v5666_v29, 0.0 }
 0x416   : > { %v4437_v31 = vmax.f32 %v5664_v4, 0.0  ;;  %v4438_v16 = vmax.f32 %v5668_v59, 0.0 }
 0x417   : > { %4471 = vst [vmem:[%s7430_s18 + $0x10] sm:$0xff] %v4439_v58  ;;  %4472 = vst [vmem:[%s7430_s18 + $0x18] sm:$0xff] %v4440_v12 }
 0x418   : > { %4469 = vst [vmem:[%s7430_s18] sm:$0xff] %v4437_v31  ;;  %4470 = vst [vmem:[%s7430_s18 + $0x8] sm:$0xff] %v4438_v16  ;;  %v5539_v57 = vpop.f32.mrb[132].mxu1 }
 0x419   : > { %v5670_v18 = vadd.f32 %v7423_v27, %v5539_v57  ;;  %v4294_v62 = vpop.f32.mrb[133].mxu1 }
 0x41a   : > { %v5672_v46 = vadd.f32 %v7423_v27, %v4294_v62  ;;  %v5540_v28 = vpop.f32.mrb[134].mxu1 }
 0x41b   : > { %v4443_v33 = vmax.f32 %v5670_v18, 0.0  ;;  %v5674_v15 = vadd.f32 %v7423_v27, %v5540_v28  ;;  %v4297_v24 = vpop.f32.mrb[135].mxu1 }
 0x41c   : > { %v4441_v51 = vmax.f32 %v5672_v46, 0.0  ;;  %v5676_v40 = vadd.f32 %v7423_v27, %v4297_v24 }
 0x41d   : > { %4475 = vst [vmem:[%s7430_s18 + $0x30] sm:$0xff] %v4443_v33  ;;  %v4444_v0 = vmax.f32 %v5674_v15, 0.0 }
 0x41e   : > { %4473 = vst [vmem:[%s7430_s18 + $0x20] sm:$0xff] %v4441_v51  ;;  %v4442_v1 = vmax.f32 %v5676_v40, 0.0 }
 0x41f   : > { %4476 = vst [vmem:[%s7430_s18 + $0x38] sm:$0xff] %v4444_v0 }
 0x420   : > { %4474 = vst [vmem:[%s7430_s18 + $0x28] sm:$0xff] %v4442_v1  ;;  %v5543_v22 = vpop.f32.mrb[136].mxu1 }
 0x421   : > { %v5678_v34 = vadd.f32 %v7423_v27, %v5543_v22  ;;  %v4310_v3 = vpop.f32.mrb[137].mxu1 }
 0x422   : > { %v5680_v35 = vadd.f32 %v7423_v27, %v4310_v3  ;;  %v5544_v9 = vpop.f32.mrb[138].mxu1 }
 0x423   : > { %v4447_v23 = vmax.f32 %v5678_v34, 0.0  ;;  %v5682_v14 = vadd.f32 %v7423_v27, %v5544_v9  ;;  %v4313_v56 = vpop.f32.mrb[139].mxu1 }
 0x424   : > { %v4445_v17 = vmax.f32 %v5680_v35, 0.0  ;;  %v5684_v6 = vadd.f32 %v7423_v27, %v4313_v56 }
 0x425   : > { %4479 = vst [vmem:[%s7430_s18 + $0x50] sm:$0xff] %v4447_v23  ;;  %v4448_v48 = vmax.f32 %v5682_v14, 0.0 }
 0x426   : > { %4477 = vst [vmem:[%s7430_s18 + $0x40] sm:$0xff] %v4445_v17  ;;  %v4446_v55 = vmax.f32 %v5684_v6, 0.0 }
 0x427   : > { %4480 = vst [vmem:[%s7430_s18 + $0x58] sm:$0xff] %v4448_v48 }
 0x428   : > { %4478 = vst [vmem:[%s7430_s18 + $0x48] sm:$0xff] %v4446_v55  ;;  %v5547_v50 = vpop.f32.mrb[140].mxu1 }
 0x429   : > { %v5686_v36 = vadd.f32 %v7423_v27, %v5547_v50  ;;  %v4326_v32 = vpop.f32.mrb[141].mxu1 }
 0x42a   : > { %v5688_v13 = vadd.f32 %v7423_v27, %v4326_v32  ;;  %v5548_v47 = vpop.f32.mrb[142].mxu1 }
 0x42b   : > { %v4451_v54 = vmax.f32 %v5686_v36, 0.0  ;;  %v5690_v53 = vadd.f32 %v7423_v27, %v5548_v47  ;;  %v4329_v21 = vpop.f32.mrb[143].mxu1 }
 0x42c   : > { %v4449_v37 = vmax.f32 %v5688_v13, 0.0  ;;  %v5692_v7 = vadd.f32 %v7423_v27, %v4329_v21 }
 0x42d   : > { %4483 = vst [vmem:[%s7430_s18 + $0x70] sm:$0xff] %v4451_v54  ;;  %v4452_v45 = vmax.f32 %v5690_v53, 0.0 }
 0x42e   : > { %4481 = vst [vmem:[%s7430_s18 + $0x60] sm:$0xff] %v4449_v37  ;;  %v4450_v5 = vmax.f32 %v5692_v7, 0.0 }
 0x42f   : > { %4484 = vst [vmem:[%s7430_s18 + $0x78] sm:$0xff] %v4452_v45 }
 0x430   : > { %4482 = vst [vmem:[%s7430_s18 + $0x68] sm:$0xff] %v4450_v5  ;;  %v5551_v26 = vpop.f32.mrb[144].mxu1 }
 0x431   : > { %v5694_v43 = vadd.f32 %v7423_v27, %v5551_v26  ;;  %v4342_v44 = vpop.f32.mrb[145].mxu1 }
 0x432   : > { %v5696_v30 = vadd.f32 %v7423_v27, %v4342_v44  ;;  %v5552_v38 = vpop.f32.mrb[146].mxu1 }
 0x433   : > { %v4455_v2 = vmax.f32 %v5694_v43, 0.0  ;;  %v5698_v19 = vadd.f32 %v7423_v27, %v5552_v38  ;;  %v4345_v8 = vpop.f32.mrb[147].mxu1 }
 0x434   : > { %v4453_v49 = vmax.f32 %v5696_v30, 0.0  ;;  %v5700_v41 = vadd.f32 %v7423_v27, %v4345_v8 }
 0x435   : > { %4487 = vst [vmem:[%s7430_s18 + $0x90] sm:$0xff] %v4455_v2  ;;  %v4456_v20 = vmax.f32 %v5698_v19, 0.0 }
 0x436   : > { %4485 = vst [vmem:[%s7430_s18 + $0x80] sm:$0xff] %v4453_v49  ;;  %v4454_v63 = vmax.f32 %v5700_v41, 0.0 }
 0x437   : > { %4488 = vst [vmem:[%s7430_s18 + $0x98] sm:$0xff] %v4456_v20 }
 0x438   : > { %4486 = vst [vmem:[%s7430_s18 + $0x88] sm:$0xff] %v4454_v63  ;;  %v5555_v60 = vpop.f32.mrb[148].mxu1 }
 0x439   : > { %v5702_v52 = vadd.f32 %v7423_v27, %v5555_v60  ;;  %v4358_v10 = vpop.f32.mrb[149].mxu1 }
 0x43a   : > { %v5704_v61 = vadd.f32 %v7423_v27, %v4358_v10  ;;  %v5556_v25 = vpop.f32.mrb[150].mxu1 }
 0x43b   : > { %v4459_v39 = vmax.f32 %v5702_v52, 0.0  ;;  %v5706_v11 = vadd.f32 %v7423_v27, %v5556_v25  ;;  %v4361_v29 = vpop.f32.mrb[151].mxu1 }
 0x43c   : > { %v4457_v42 = vmax.f32 %v5704_v61, 0.0  ;;  %v5708_v4 = vadd.f32 %v7423_v27, %v4361_v29 }
 0x43d   : > { %4491 = vst [vmem:[%s7430_s18 + $0xb0] sm:$0xff] %v4459_v39  ;;  %v4460_v59 = vmax.f32 %v5706_v11, 0.0 }
 0x43e   : > { %4489 = vst [vmem:[%s7430_s18 + $0xa0] sm:$0xff] %v4457_v42  ;;  %v4458_v58 = vmax.f32 %v5708_v4, 0.0 }
 0x43f   : > { %4492 = vst [vmem:[%s7430_s18 + $0xb8] sm:$0xff] %v4460_v59 }
 0x440   : > { %4490 = vst [vmem:[%s7430_s18 + $0xa8] sm:$0xff] %v4458_v58  ;;  %v5559_v12 = vpop.f32.mrb[152].mxu1 }
 0x441   : > { %v5710_v31 = vadd.f32 %v7423_v27, %v5559_v12  ;;  %v4374_v16 = vpop.f32.mrb[153].mxu1 }
 0x442   : > { %v5712_v57 = vadd.f32 %v7423_v27, %v4374_v16  ;;  %v5560_v18 = vpop.f32.mrb[154].mxu1 }
 0x443   : > { %v4463_v62 = vmax.f32 %v5710_v31, 0.0  ;;  %v5714_v46 = vadd.f32 %v7423_v27, %v5560_v18  ;;  %v4377_v28 = vpop.f32.mrb[155].mxu1 }
 0x444   : > { %v4461_v33 = vmax.f32 %v5712_v57, 0.0  ;;  %v5716_v15 = vadd.f32 %v7423_v27, %v4377_v28 }
 0x445   : > { %4495 = vst [vmem:[%s7430_s18 + $0xd0] sm:$0xff] %v4463_v62  ;;  %v4464_v24 = vmax.f32 %v5714_v46, 0.0 }
 0x446   : > { %4493 = vst [vmem:[%s7430_s18 + $0xc0] sm:$0xff] %v4461_v33  ;;  %v4462_v51 = vmax.f32 %v5716_v15, 0.0 }
 0x447   : > { %4496 = vst [vmem:[%s7430_s18 + $0xd8] sm:$0xff] %v4464_v24 }
 0x448   : > { %4494 = vst [vmem:[%s7430_s18 + $0xc8] sm:$0xff] %v4462_v51  ;;  %v5563_v40 = vpop.f32.mrb[156].mxu1 }
 0x449   : > { %v5718_v0 = vadd.f32 %v7423_v27, %v5563_v40  ;;  %v4390_v1 = vpop.f32.mrb[157].mxu1 }
 0x44a   : > { %v5720_v22 = vadd.f32 %v7423_v27, %v4390_v1  ;;  %v5564_v34 = vpop.f32.mrb[158].mxu1 }
 0x44b   : > { %v4467_v3 = vmax.f32 %v5718_v0, 0.0  ;;  %v5722_v35 = vadd.f32 %v7423_v27, %v5564_v34  ;;  %v4393_v9 = vpop.f32.mrb[159].mxu1 }
 0x44c   : > { %v4465_v23 = vmax.f32 %v5720_v22, 0.0  ;;  %v5724_v14 = vadd.f32 %v7423_v27, %v4393_v9 }
 0x44d   : > { %4499 = vst [vmem:[%s7430_s18 + $0xf0] sm:$0xff] %v4467_v3  ;;  %v4468_v56 = vmax.f32 %v5722_v35, 0.0 }
 0x44e   : > { %4497 = vst [vmem:[%s7430_s18 + $0xe0] sm:$0xff] %v4465_v23  ;;  %v4466_v17 = vmax.f32 %v5724_v14, 0.0 }
 0x44f   : > { %4500 = vst [vmem:[%s7430_s18 + $0xf8] sm:$0xff] %v4468_v56 }
 0x450   : > { %4498 = vst [vmem:[%s7430_s18 + $0xe8] sm:$0xff] %v4466_v17 }
 0x451 PF: > { %s19_s30 = sadd.s32 1, %s5965_s30  }
 0x452   : > { %p16_p4 = scmp.ge.s32.totalorder %s19_s30, 4  }
 0x454   :  { %18 = sbr.rel (!%p16_p4) target bundleno = 1 (0x1), region = 91 }

</bundles_post_ra>
